<compile_context>
chip_gen: v6e
topology: v6e:2x2x1
jax: 0.10.0
libtpu: 0.0.40
codegen_flags: <defaults>
</compile_context>

<pallas_src>
import functools

import jax
import jax.numpy as jnp
from jax.experimental import pallas as pl
from jax.experimental.pallas import tpu as pltpu

# --- small synthetic config (consistent with SiglipVisionConfig fields) ---
HIDDEN = 128          # config.hidden_size
INTERMEDIATE = 256    # config.intermediate_size
NUM_HEADS = 4         # config.num_attention_heads
HEAD_DIM = HIDDEN // NUM_HEADS
NUM_LAYERS = 2        # config.num_hidden_layers (small for test)
LN_EPS = 1e-6         # config.layer_norm_eps
BATCH = 2
SEQ = 16              # number of image tokens


# ----------------------------- Pallas kernel -----------------------------
def siglip_encoder_kernel(x_ref,
                          ln1w_ref, ln1b_ref,
                          wq_ref, bq_ref, wk_ref, bk_ref, wv_ref, bv_ref,
                          wo_ref, bo_ref,
                          ln2w_ref, ln2b_ref,
                          w1_ref, b1_ref, w2_ref, b2_ref,
                          o_ref,
                          h_scr,
                          *, batch, seq, num_heads, head_dim, eps):
    """One grid step == one encoder layer applied to the whole (B*S, D) batch.

    The hidden state is resident in VMEM scratch `h_scr` across the layer
    grid axis; parameter refs hold exactly this layer's (stacked) weights.
    """
    layer = pl.program_id(0)
    rows = batch * seq
    hidden = num_heads * head_dim

    # Initialize the resident hidden state from the input embeddings.
    @pl.when(layer == 0)
    def _():
        h_scr[...] = x_ref[...]

    h = h_scr[...]                                  # (rows, D) f32

    # ---- hoisted parameter reads / bias broadcasts (traced once per layer) --
    ln1w = ln1w_ref[0]                              # (1, D) f32
    ln1b = ln1b_ref[0]
    ln2w = ln2w_ref[0]
    ln2b = ln2b_ref[0]
    wq = wq_ref[0]                                  # (D, D) bf16, pre-scaled
    wk = wk_ref[0]
    wv = wv_ref[0]
    wo = wo_ref[0]
    w1 = w1_ref[0]                                  # (D, I) bf16
    w2 = w2_ref[0]                                  # (I, D) bf16
    bq = jnp.broadcast_to(bq_ref[0], (rows, hidden))
    bk = jnp.broadcast_to(bk_ref[0], (rows, hidden))
    bv = jnp.broadcast_to(bv_ref[0], (rows, hidden))
    bo = jnp.broadcast_to(bo_ref[0], (rows, hidden))
    b1 = jnp.broadcast_to(b1_ref[0], (rows, w1.shape[1]))
    b2 = jnp.broadcast_to(b2_ref[0], (rows, hidden))

    def layer_norm(z, w, b):
        mu = jnp.mean(z, axis=-1, keepdims=True)
        var = jnp.mean((z - mu) ** 2, axis=-1, keepdims=True)
        return (z - mu) * jax.lax.rsqrt(var + eps) * w + b

    def mlp(z):
        u = jnp.dot(z.astype(jnp.bfloat16), w1,
                    preferred_element_type=jnp.float32) + b1
        u = jax.nn.gelu(u, approximate=True)        # gelu(approximate='tanh')
        return jnp.dot(u.astype(jnp.bfloat16), w2,
                       preferred_element_type=jnp.float32) + b2

    # ---------------- attention block: h + Attn(LN1(h)) ----------------
    hn = layer_norm(h, ln1w, ln1b)                  # f32
    hn16 = hn.astype(jnp.bfloat16)
    q = jnp.dot(hn16, wq, preferred_element_type=jnp.float32) + bq   # scaled q
    k = jnp.dot(hn16, wk, preferred_element_type=jnp.float32) + bk
    v = jnp.dot(hn16, wv, preferred_element_type=jnp.float32) + bv

    def split_heads(t):
        # (rows, D) -> (batch*num_heads, seq, head_dim) using static slices.
        blocks = []
        for b in range(batch):
            rs = t[b * seq:(b + 1) * seq, :]        # (seq, D), sublane slice
            for hh in range(num_heads):
                blocks.append(rs[:, hh * head_dim:(hh + 1) * head_dim])
        return jnp.stack(blocks, axis=0)            # (B*H, S, hd)

    qh = split_heads(q).astype(jnp.bfloat16)
    kh = split_heads(k).astype(jnp.bfloat16)
    vh = split_heads(v).astype(jnp.bfloat16)

    # Head-batched attention (scores already scaled via pre-scaled wq/bq).
    s = jnp.einsum('nqd,nkd->nqk', qh, kh,
                   preferred_element_type=jnp.float32)       # (B*H, S, S) f32
    s = s - jnp.max(s, axis=-1, keepdims=True)
    p = jnp.exp(s)
    p = p * pl.reciprocal(jnp.sum(p, axis=-1, keepdims=True), approx=True)
    ctx = jnp.einsum('nqk,nkd->nqd', p.astype(jnp.bfloat16), vh,
                     preferred_element_type=jnp.float32)     # (B*H, S, hd) f32

    # Merge heads back to (rows, D): head hh occupies columns [hh*hd, (hh+1)*hd)
    per_batch = []
    for b in range(batch):
        per_batch.append(jnp.concatenate(
            [ctx[b * num_heads + hh] for hh in range(num_heads)], axis=-1))
    attn = jnp.concatenate(per_batch, axis=0)                # (rows, D)

    attn = jnp.dot(attn.astype(jnp.bfloat16), wo,
                   preferred_element_type=jnp.float32) + bo
    h = h + attn

    # ---- MLP block exactly as written: mlp -> LN2 -> mlp -> +residual ----
    residual = h
    u = mlp(h)
    u = layer_norm(u, ln2w, ln2b)
    u = mlp(u)
    new_h = residual + u

    h_scr[...] = new_h
    o_ref[...] = new_h.astype(o_ref.dtype)


# ----------------------------- wrapper -----------------------------
def prepare_params(layer_params):
    """Canonical-layout params -> kernel layout, stacked across layers.

    * Linear weights are (in, out) matmul layout, stored bf16 (MXU operands).
    * head_dim**-0.5 is folded into wq and bq.
    * Biases / LN params are kept f32 and reshaped to (1, N).
    Returns a list of 16 arrays, each with leading layer axis L.
    """
    scale = HEAD_DIM ** -0.5
    prepped = []
    for p in layer_params:
        (ln1w, ln1b, wq, bq, wk, bk, wv, bv, wo, bo,
         ln2w, ln2b, w1, b1, w2, b2) = p
        prepped.append((
            ln1w.reshape(1, -1).astype(jnp.float32),
            ln1b.reshape(1, -1).astype(jnp.float32),
            (wq * scale).astype(jnp.bfloat16),
            (bq * scale).reshape(1, -1).astype(jnp.float32),
            wk.astype(jnp.bfloat16), bk.reshape(1, -1).astype(jnp.float32),
            wv.astype(jnp.bfloat16), bv.reshape(1, -1).astype(jnp.float32),
            wo.astype(jnp.bfloat16), bo.reshape(1, -1).astype(jnp.float32),
            ln2w.reshape(1, -1).astype(jnp.float32),
            ln2b.reshape(1, -1).astype(jnp.float32),
            w1.astype(jnp.bfloat16), b1.reshape(1, -1).astype(jnp.float32),
            w2.astype(jnp.bfloat16), b2.reshape(1, -1).astype(jnp.float32),
        ))
    return [jnp.stack(arrs, axis=0) for arrs in zip(*prepped)]


def siglip_encoder(x, layer_params):
    """Full SiglipEncoder forward: all layers fused in one pallas_call."""
    B, S, D = x.shape
    rows = B * S
    num_layers = len(layer_params)
    stacked = prepare_params(layer_params)

    kernel = functools.partial(
        siglip_encoder_kernel, batch=B, seq=S,
        num_heads=NUM_HEADS, head_dim=HEAD_DIM, eps=LN_EPS)

    # x / out cover the whole flattened batch and are resident across layers.
    in_specs = [pl.BlockSpec((rows, D), lambda l: (0, 0))]
    for p in stacked:
        blk = (1,) + p.shape[1:]
        in_specs.append(pl.BlockSpec(blk, lambda l: (l, 0, 0)))

    out = pl.pallas_call(
        kernel,
        out_shape=jax.ShapeDtypeStruct((rows, D), jnp.float32),
        grid=(num_layers,),
        in_specs=in_specs,
        out_specs=pl.BlockSpec((rows, D), lambda l: (0, 0)),
        scratch_shapes=[pltpu.VMEM((rows, D), jnp.float32)],
        compiler_params=pltpu.CompilerParams(
            # Layer axis carries state (VMEM-resident hidden) -> "arbitrary".
            # At real SigLIP sizes on v7x, add a leading "parallel" token-tile
            # axis and set vmem_limit_bytes explicitly.
            dimension_semantics=("arbitrary",)),
    )(x.reshape(rows, D).astype(jnp.float32), *stacked)
    return out.reshape(B, S, D)


# ---------------- deterministic parameter init (canonical layout) ----------------
def init_layer_params(key):
    ks = jax.random.split(key, 16)

    def lin(kw, kb, din, dout):
        w = jax.random.normal(kw, (din, dout), jnp.float32) * 0.02
        b = jax.random.normal(kb, (dout,), jnp.float32) * 0.01
        return w, b

    ln1w = 1.0 + 0.05 * jax.random.normal(ks[0], (HIDDEN,), jnp.float32)
    ln1b = 0.05 * jax.random.normal(ks[1], (HIDDEN,), jnp.float32)
    wq, bq = lin(ks[2], ks[3], HIDDEN, HIDDEN)
    wk, bk = lin(ks[4], ks[5], HIDDEN, HIDDEN)
    wv, bv = lin(ks[6], ks[7], HIDDEN, HIDDEN)
    wo, bo = lin(ks[8], ks[9], HIDDEN, HIDDEN)
    ln2w = 1.0 + 0.05 * jax.random.normal(ks[10], (HIDDEN,), jnp.float32)
    ln2b = 0.05 * jax.random.normal(ks[11], (HIDDEN,), jnp.float32)
    w1, b1 = lin(ks[12], ks[13], HIDDEN, INTERMEDIATE)
    w2, b2 = lin(ks[14], ks[15], INTERMEDIATE, HIDDEN)
    return (ln1w, ln1b, wq, bq, wk, bk, wv, bv, wo, bo,
            ln2w, ln2b, w1, b1, w2, b2)


# ---------------- pure-JAX f32 reference (module semantics, for validation) ----------------
def ref_encoder_layer(x, p):
    (ln1w, ln1b, wq, bq, wk, bk, wv, bv, wo, bo,
     ln2w, ln2b, w1, b1, w2, b2) = p
    B, S, D = x.shape

    def ln(z, w, b):
        mu = jnp.mean(z, -1, keepdims=True)
        var = jnp.mean((z - mu) ** 2, -1, keepdims=True)
        return (z - mu) / jnp.sqrt(var + LN_EPS) * w + b

    def mlp(z):
        u = z @ w1 + b1
        u = jax.nn.gelu(u, approximate=True)
        return u @ w2 + b2

    res = x
    h = ln(x, ln1w, ln1b)
    q = (h @ wq + bq).reshape(B, S, NUM_HEADS, HEAD_DIM).transpose(0, 2, 1, 3)
    k = (h @ wk + bk).reshape(B, S, NUM_HEADS, HEAD_DIM).transpose(0, 2, 1, 3)
    v = (h @ wv + bv).reshape(B, S, NUM_HEADS, HEAD_DIM).transpose(0, 2, 1, 3)
    s = jnp.einsum('bhqd,bhkd->bhqk', q, k) * HEAD_DIM ** -0.5
    a = jnp.einsum('bhqk,bhkd->bhqd', jax.nn.softmax(s, axis=-1), v)
    a = a.transpose(0, 2, 1, 3).reshape(B, S, D) @ wo + bo
    h = res + a
    res = h
    u = mlp(h)
    u = ln(u, ln2w, ln2b)
    u = mlp(u)
    return res + u


def ref_encoder(x, layer_params):
    h = x
    for p in layer_params:
        h = ref_encoder_layer(h, p)
    return h


if __name__ == "__main__":
    root = jax.random.PRNGKey(0)
    kx, kp = jax.random.split(root)
    x = jax.random.normal(kx, (BATCH, SEQ, HIDDEN), jnp.float32)
    layer_keys = jax.random.split(kp, NUM_LAYERS)
    layer_params = [init_layer_params(k) for k in layer_keys]

    out = jax.block_until_ready(siglip_encoder(x, layer_params))
    ref = jax.block_until_ready(ref_encoder(x, layer_params))

    assert out.shape == (BATCH, SEQ, HIDDEN)
    assert bool(jnp.all(jnp.isfinite(out)))
    # Kernel uses bf16 MXU operands (f32 accumulation) + approx reciprocal in
    # softmax, so compare against the f32 reference with a modest tolerance.
    max_diff = float(jnp.max(jnp.abs(out - ref)))
    assert bool(jnp.allclose(out, ref, atol=2e-2, rtol=2e-2)), \
        f"max abs diff {max_diff}"
    print("KERNEL_OK")
</pallas_src>

<mosaic_0001>
module attributes {stable_mosaic.version = 11 : i64} {
  func.func @siglip_encoder_kernel(%arg0: i32, %arg1: memref<32x128xf32, #tpu.memory_space<vmem>>, %arg2: memref<1x1x128xf32, #tpu.memory_space<vmem>>, %arg3: memref<1x1x128xf32, #tpu.memory_space<vmem>>, %arg4: memref<1x128x128xbf16, #tpu.memory_space<vmem>>, %arg5: memref<1x1x128xf32, #tpu.memory_space<vmem>>, %arg6: memref<1x128x128xbf16, #tpu.memory_space<vmem>>, %arg7: memref<1x1x128xf32, #tpu.memory_space<vmem>>, %arg8: memref<1x128x128xbf16, #tpu.memory_space<vmem>>, %arg9: memref<1x1x128xf32, #tpu.memory_space<vmem>>, %arg10: memref<1x128x128xbf16, #tpu.memory_space<vmem>>, %arg11: memref<1x1x128xf32, #tpu.memory_space<vmem>>, %arg12: memref<1x1x128xf32, #tpu.memory_space<vmem>>, %arg13: memref<1x1x128xf32, #tpu.memory_space<vmem>>, %arg14: memref<1x128x256xbf16, #tpu.memory_space<vmem>>, %arg15: memref<1x1x256xf32, #tpu.memory_space<vmem>>, %arg16: memref<1x256x128xbf16, #tpu.memory_space<vmem>>, %arg17: memref<1x1x128xf32, #tpu.memory_space<vmem>>, %arg18: memref<32x128xf32, #tpu.memory_space<vmem>>, %arg19: memref<32x128xf32, #tpu.memory_space<vmem>>) attributes {dimension_semantics = [#tpu.dimension_semantics<arbitrary>], iteration_bounds = array<i64: 2>, scalar_prefetch = 0 : i64, scratch_operands = 1 : i64, tpu.core_type = #tpu.core_type<tc>, window_params = [{pipeline_mode = #tpu.pipeline_mode<synchronous>, transform_indices = @transform_0, window_bounds = array<i64: 32, 128>}, {transform_indices = @transform_1, window_bounds = array<i64: 1, 1, 128>}, {transform_indices = @transform_2, window_bounds = array<i64: 1, 1, 128>}, {transform_indices = @transform_3, window_bounds = array<i64: 1, 128, 128>}, {transform_indices = @transform_4, window_bounds = array<i64: 1, 1, 128>}, {transform_indices = @transform_5, window_bounds = array<i64: 1, 128, 128>}, {transform_indices = @transform_6, window_bounds = array<i64: 1, 1, 128>}, {transform_indices = @transform_7, window_bounds = array<i64: 1, 128, 128>}, {transform_indices = @transform_8, window_bounds = array<i64: 1, 1, 128>}, {transform_indices = @transform_9, window_bounds = array<i64: 1, 128, 128>}, {transform_indices = @transform_10, window_bounds = array<i64: 1, 1, 128>}, {transform_indices = @transform_11, window_bounds = array<i64: 1, 1, 128>}, {transform_indices = @transform_12, window_bounds = array<i64: 1, 1, 128>}, {transform_indices = @transform_13, window_bounds = array<i64: 1, 128, 256>}, {transform_indices = @transform_14, window_bounds = array<i64: 1, 1, 256>}, {transform_indices = @transform_15, window_bounds = array<i64: 1, 256, 128>}, {transform_indices = @transform_16, window_bounds = array<i64: 1, 1, 128>}, {pipeline_mode = #tpu.pipeline_mode<synchronous>, transform_indices = @transform_17, window_bounds = array<i64: 32, 128>}]} {
    %c0_i32 = arith.constant 0 : i32
    %0 = arith.cmpi eq, %arg0, %c0_i32 : i32
    %1 = arith.extui %0 : i1 to i32
    %c0_i32_0 = arith.constant 0 : i32
    %2 = arith.cmpi ne, %1, %c0_i32_0 : i32
    scf.if %2 {
      %c0_83 = arith.constant 0 : index
      %c0_84 = arith.constant 0 : index
      %236 = vector.load %arg1[%c0_83, %c0_84] : memref<32x128xf32, #tpu.memory_space<vmem>>, vector<32x128xf32>
      %c0_85 = arith.constant 0 : index
      %c0_86 = arith.constant 0 : index
      %237 = vector.load %arg19[%c0_85, %c0_86] : memref<32x128xf32, #tpu.memory_space<vmem>>, vector<32x128xf32>
      tpu.vector_store %arg19[%c0_85, %c0_86], %236 {strides = array<i32>} : memref<32x128xf32, #tpu.memory_space<vmem>>, vector<32x128xf32>,
    } else {
    }
    %c0 = arith.constant 0 : index
    %c0_1 = arith.constant 0 : index
    %3 = vector.load %arg19[%c0, %c0_1] : memref<32x128xf32, #tpu.memory_space<vmem>>, vector<32x128xf32>
    %c0_2 = arith.constant 0 : index
    %c0_3 = arith.constant 0 : index
    %c0_4 = arith.constant 0 : index
    %4 = vector.load %arg2[%c0_2, %c0_3, %c0_4] : memref<1x1x128xf32, #tpu.memory_space<vmem>>, vector<1x1x128xf32>
    %5 = vector.shape_cast %4 : vector<1x1x128xf32> to vector<1x128xf32>
    %c0_5 = arith.constant 0 : index
    %c0_6 = arith.constant 0 : index
    %c0_7 = arith.constant 0 : index
    %6 = vector.load %arg3[%c0_5, %c0_6, %c0_7] : memref<1x1x128xf32, #tpu.memory_space<vmem>>, vector<1x1x128xf32>
    %7 = vector.shape_cast %6 : vector<1x1x128xf32> to vector<1x128xf32>
    %c0_8 = arith.constant 0 : index
    %c0_9 = arith.constant 0 : index
    %c0_10 = arith.constant 0 : index
    %8 = vector.load %arg12[%c0_8, %c0_9, %c0_10] : memref<1x1x128xf32, #tpu.memory_space<vmem>>, vector<1x1x128xf32>
    %9 = vector.shape_cast %8 : vector<1x1x128xf32> to vector<1x128xf32>
    %c0_11 = arith.constant 0 : index
    %c0_12 = arith.constant 0 : index
    %c0_13 = arith.constant 0 : index
    %10 = vector.load %arg13[%c0_11, %c0_12, %c0_13] : memref<1x1x128xf32, #tpu.memory_space<vmem>>, vector<1x1x128xf32>
    %11 = vector.shape_cast %10 : vector<1x1x128xf32> to vector<1x128xf32>
    %c0_14 = arith.constant 0 : index
    %c0_15 = arith.constant 0 : index
    %c0_16 = arith.constant 0 : index
    %12 = vector.load %arg4[%c0_14, %c0_15, %c0_16] : memref<1x128x128xbf16, #tpu.memory_space<vmem>>, vector<1x128x128xbf16>
    %13 = vector.shape_cast %12 : vector<1x128x128xbf16> to vector<128x128xbf16>
    %c0_17 = arith.constant 0 : index
    %c0_18 = arith.constant 0 : index
    %c0_19 = arith.constant 0 : index
    %14 = vector.load %arg6[%c0_17, %c0_18, %c0_19] : memref<1x128x128xbf16, #tpu.memory_space<vmem>>, vector<1x128x128xbf16>
    %15 = vector.shape_cast %14 : vector<1x128x128xbf16> to vector<128x128xbf16>
    %c0_20 = arith.constant 0 : index
    %c0_21 = arith.constant 0 : index
    %c0_22 = arith.constant 0 : index
    %16 = vector.load %arg8[%c0_20, %c0_21, %c0_22] : memref<1x128x128xbf16, #tpu.memory_space<vmem>>, vector<1x128x128xbf16>
    %17 = vector.shape_cast %16 : vector<1x128x128xbf16> to vector<128x128xbf16>
    %c0_23 = arith.constant 0 : index
    %c0_24 = arith.constant 0 : index
    %c0_25 = arith.constant 0 : index
    %18 = vector.load %arg10[%c0_23, %c0_24, %c0_25] : memref<1x128x128xbf16, #tpu.memory_space<vmem>>, vector<1x128x128xbf16>
    %19 = vector.shape_cast %18 : vector<1x128x128xbf16> to vector<128x128xbf16>
    %c0_26 = arith.constant 0 : index
    %c0_27 = arith.constant 0 : index
    %c0_28 = arith.constant 0 : index
    %20 = vector.load %arg14[%c0_26, %c0_27, %c0_28] : memref<1x128x256xbf16, #tpu.memory_space<vmem>>, vector<1x128x256xbf16>
    %21 = vector.shape_cast %20 : vector<1x128x256xbf16> to vector<128x256xbf16>
    %c0_29 = arith.constant 0 : index
    %c0_30 = arith.constant 0 : index
    %c0_31 = arith.constant 0 : index
    %22 = vector.load %arg16[%c0_29, %c0_30, %c0_31] : memref<1x256x128xbf16, #tpu.memory_space<vmem>>, vector<1x256x128xbf16>
    %23 = vector.shape_cast %22 : vector<1x256x128xbf16> to vector<256x128xbf16>
    %c0_32 = arith.constant 0 : index
    %c0_33 = arith.constant 0 : index
    %c0_34 = arith.constant 0 : index
    %24 = vector.load %arg5[%c0_32, %c0_33, %c0_34] : memref<1x1x128xf32, #tpu.memory_space<vmem>>, vector<1x1x128xf32>
    %25 = vector.shape_cast %24 : vector<1x1x128xf32> to vector<1x128xf32>
    %26 = vector.shape_cast %25 : vector<1x128xf32> to vector<1x128xf32>
    %27 = vector.broadcast %26 : vector<1x128xf32> to vector<32x128xf32>
    %c0_35 = arith.constant 0 : index
    %c0_36 = arith.constant 0 : index
    %c0_37 = arith.constant 0 : index
    %28 = vector.load %arg7[%c0_35, %c0_36, %c0_37] : memref<1x1x128xf32, #tpu.memory_space<vmem>>, vector<1x1x128xf32>
    %29 = vector.shape_cast %28 : vector<1x1x128xf32> to vector<1x128xf32>
    %30 = vector.shape_cast %29 : vector<1x128xf32> to vector<1x128xf32>
    %31 = vector.broadcast %30 : vector<1x128xf32> to vector<32x128xf32>
    %c0_38 = arith.constant 0 : index
    %c0_39 = arith.constant 0 : index
    %c0_40 = arith.constant 0 : index
    %32 = vector.load %arg9[%c0_38, %c0_39, %c0_40] : memref<1x1x128xf32, #tpu.memory_space<vmem>>, vector<1x1x128xf32>
    %33 = vector.shape_cast %32 : vector<1x1x128xf32> to vector<1x128xf32>
    %34 = vector.shape_cast %33 : vector<1x128xf32> to vector<1x128xf32>
    %35 = vector.broadcast %34 : vector<1x128xf32> to vector<32x128xf32>
    %c0_41 = arith.constant 0 : index
    %c0_42 = arith.constant 0 : index
    %c0_43 = arith.constant 0 : index
    %36 = vector.load %arg11[%c0_41, %c0_42, %c0_43] : memref<1x1x128xf32, #tpu.memory_space<vmem>>, vector<1x1x128xf32>
    %37 = vector.shape_cast %36 : vector<1x1x128xf32> to vector<1x128xf32>
    %38 = vector.shape_cast %37 : vector<1x128xf32> to vector<1x128xf32>
    %39 = vector.broadcast %38 : vector<1x128xf32> to vector<32x128xf32>
    %c0_44 = arith.constant 0 : index
    %c0_45 = arith.constant 0 : index
    %c0_46 = arith.constant 0 : index
    %40 = vector.load %arg15[%c0_44, %c0_45, %c0_46] : memref<1x1x256xf32, #tpu.memory_space<vmem>>, vector<1x1x256xf32>
    %41 = vector.shape_cast %40 : vector<1x1x256xf32> to vector<1x256xf32>
    %42 = vector.shape_cast %41 : vector<1x256xf32> to vector<1x256xf32>
    %43 = vector.broadcast %42 : vector<1x256xf32> to vector<32x256xf32>
    %c0_47 = arith.constant 0 : index
    %c0_48 = arith.constant 0 : index
    %c0_49 = arith.constant 0 : index
    %44 = vector.load %arg17[%c0_47, %c0_48, %c0_49] : memref<1x1x128xf32, #tpu.memory_space<vmem>>, vector<1x1x128xf32>
    %45 = vector.shape_cast %44 : vector<1x1x128xf32> to vector<1x128xf32>
    %46 = vector.shape_cast %45 : vector<1x128xf32> to vector<1x128xf32>
    %47 = vector.broadcast %46 : vector<1x128xf32> to vector<32x128xf32>
    %cst = arith.constant dense<0.000000e+00> : vector<32xf32>
    %48 = vector.multi_reduction <add>, %3, %cst [1] : vector<32x128xf32> to vector<32xf32>
    %49 = vector.shape_cast %48 : vector<32xf32> to vector<32x1xf32>
    %cst_50 = arith.constant 1.280000e+02 : f32
    %50 = vector.broadcast %cst_50 : f32 to vector<32x1xf32>
    %51 = arith.divf %49, %50 : vector<32x1xf32>
    %52 = vector.broadcast %51 : vector<32x1xf32> to vector<32x128xf32>
    %53 = arith.subf %3, %52 : vector<32x128xf32>
    %54 = arith.mulf %53, %53 : vector<32x128xf32>
    %cst_51 = arith.constant dense<0.000000e+00> : vector<32xf32>
    %55 = vector.multi_reduction <add>, %54, %cst_51 [1] : vector<32x128xf32> to vector<32xf32>
    %56 = vector.shape_cast %55 : vector<32xf32> to vector<32x1xf32>
    %cst_52 = arith.constant 1.280000e+02 : f32
    %57 = vector.broadcast %cst_52 : f32 to vector<32x1xf32>
    %58 = arith.divf %56, %57 : vector<32x1xf32>
    %59 = vector.broadcast %51 : vector<32x1xf32> to vector<32x128xf32>
    %60 = arith.subf %3, %59 : vector<32x128xf32>
    %cst_53 = arith.constant 9.99999997E-7 : f32
    %61 = vector.broadcast %cst_53 : f32 to vector<32x1xf32>
    %62 = arith.addf %58, %61 : vector<32x1xf32>
    %63 = math.rsqrt %62 : vector<32x1xf32>
    %64 = vector.broadcast %63 : vector<32x1xf32> to vector<32x128xf32>
    %65 = arith.mulf %60, %64 : vector<32x128xf32>
    %66 = vector.broadcast %5 : vector<1x128xf32> to vector<32x128xf32>
    %67 = arith.mulf %65, %66 : vector<32x128xf32>
    %68 = vector.broadcast %7 : vector<1x128xf32> to vector<32x128xf32>
    %69 = arith.addf %67, %68 : vector<32x128xf32>
    %70 = arith.truncf %69 : vector<32x128xf32> to vector<32x128xbf16>
    %cst_54 = arith.constant dense<0.000000e+00> : vector<32x128xf32>
    %71 = tpu.matmul %70, %13, %cst_54 {dimension_numbers = #tpu.dot_dimension_numbers<[1], [0], [0], [1], [0, 0, 1, 1], [], []>} : vector<32x128xbf16>, vector<128x128xbf16>, vector<32x128xf32> -> vector<32x128xf32>
    %72 = arith.addf %71, %27 : vector<32x128xf32>
    %cst_55 = arith.constant dense<0.000000e+00> : vector<32x128xf32>
    %73 = tpu.matmul %70, %15, %cst_55 {dimension_numbers = #tpu.dot_dimension_numbers<[1], [0], [0], [1], [0, 0, 1, 1], [], []>} : vector<32x128xbf16>, vector<128x128xbf16>, vector<32x128xf32> -> vector<32x128xf32>
    %74 = arith.addf %73, %31 : vector<32x128xf32>
    %cst_56 = arith.constant dense<0.000000e+00> : vector<32x128xf32>
    %75 = tpu.matmul %70, %17, %cst_56 {dimension_numbers = #tpu.dot_dimension_numbers<[1], [0], [0], [1], [0, 0, 1, 1], [], []>} : vector<32x128xbf16>, vector<128x128xbf16>, vector<32x128xf32> -> vector<32x128xf32>
    %76 = arith.addf %75, %35 : vector<32x128xf32>
    %77 = vector.extract_strided_slice %72 {offsets = [0, 0], sizes = [16, 128], strides = [1, 1]} : vector<32x128xf32> to vector<16x128xf32>
    %78 = vector.extract_strided_slice %77 {offsets = [0, 0], sizes = [16, 32], strides = [1, 1]} : vector<16x128xf32> to vector<16x32xf32>
    %79 = vector.extract_strided_slice %77 {offsets = [0, 32], sizes = [16, 32], strides = [1, 1]} : vector<16x128xf32> to vector<16x32xf32>
    %80 = vector.extract_strided_slice %77 {offsets = [0, 64], sizes = [16, 32], strides = [1, 1]} : vector<16x128xf32> to vector<16x32xf32>
    %81 = vector.extract_strided_slice %77 {offsets = [0, 96], sizes = [16, 32], strides = [1, 1]} : vector<16x128xf32> to vector<16x32xf32>
    %82 = vector.extract_strided_slice %72 {offsets = [16, 0], sizes = [16, 128], strides = [1, 1]} : vector<32x128xf32> to vector<16x128xf32>
    %83 = vector.extract_strided_slice %82 {offsets = [0, 0], sizes = [16, 32], strides = [1, 1]} : vector<16x128xf32> to vector<16x32xf32>
    %84 = vector.extract_strided_slice %82 {offsets = [0, 32], sizes = [16, 32], strides = [1, 1]} : vector<16x128xf32> to vector<16x32xf32>
    %85 = vector.extract_strided_slice %82 {offsets = [0, 64], sizes = [16, 32], strides = [1, 1]} : vector<16x128xf32> to vector<16x32xf32>
    %86 = vector.extract_strided_slice %82 {offsets = [0, 96], sizes = [16, 32], strides = [1, 1]} : vector<16x128xf32> to vector<16x32xf32>
    %87 = vector.shape_cast %78 : vector<16x32xf32> to vector<1x16x32xf32>
    %88 = vector.shape_cast %79 : vector<16x32xf32> to vector<1x16x32xf32>
    %89 = vector.shape_cast %80 : vector<16x32xf32> to vector<1x16x32xf32>
    %90 = vector.shape_cast %81 : vector<16x32xf32> to vector<1x16x32xf32>
    %91 = vector.shape_cast %83 : vector<16x32xf32> to vector<1x16x32xf32>
    %92 = vector.shape_cast %84 : vector<16x32xf32> to vector<1x16x32xf32>
    %93 = vector.shape_cast %85 : vector<16x32xf32> to vector<1x16x32xf32>
    %94 = vector.shape_cast %86 : vector<16x32xf32> to vector<1x16x32xf32>
    %95 = tpu.concatenate %87, %88, %89, %90, %91, %92, %93, %94 in 0 : vector<1x16x32xf32>, vector<1x16x32xf32>, vector<1x16x32xf32>, vector<1x16x32xf32>, vector<1x16x32xf32>, vector<1x16x32xf32>, vector<1x16x32xf32>, vector<1x16x32xf32> -> vector<8x16x32xf32>
    %96 = arith.truncf %95 : vector<8x16x32xf32> to vector<8x16x32xbf16>
    %97 = vector.extract_strided_slice %74 {offsets = [0, 0], sizes = [16, 128], strides = [1, 1]} : vector<32x128xf32> to vector<16x128xf32>
    %98 = vector.extract_strided_slice %97 {offsets = [0, 0], sizes = [16, 32], strides = [1, 1]} : vector<16x128xf32> to vector<16x32xf32>
    %99 = vector.extract_strided_slice %97 {offsets = [0, 32], sizes = [16, 32], strides = [1, 1]} : vector<16x128xf32> to vector<16x32xf32>
    %100 = vector.extract_strided_slice %97 {offsets = [0, 64], sizes = [16, 32], strides = [1, 1]} : vector<16x128xf32> to vector<16x32xf32>
    %101 = vector.extract_strided_slice %97 {offsets = [0, 96], sizes = [16, 32], strides = [1, 1]} : vector<16x128xf32> to vector<16x32xf32>
    %102 = vector.extract_strided_slice %74 {offsets = [16, 0], sizes = [16, 128], strides = [1, 1]} : vector<32x128xf32> to vector<16x128xf32>
    %103 = vector.extract_strided_slice %102 {offsets = [0, 0], sizes = [16, 32], strides = [1, 1]} : vector<16x128xf32> to vector<16x32xf32>
    %104 = vector.extract_strided_slice %102 {offsets = [0, 32], sizes = [16, 32], strides = [1, 1]} : vector<16x128xf32> to vector<16x32xf32>
    %105 = vector.extract_strided_slice %102 {offsets = [0, 64], sizes = [16, 32], strides = [1, 1]} : vector<16x128xf32> to vector<16x32xf32>
    %106 = vector.extract_strided_slice %102 {offsets = [0, 96], sizes = [16, 32], strides = [1, 1]} : vector<16x128xf32> to vector<16x32xf32>
    %107 = vector.shape_cast %98 : vector<16x32xf32> to vector<1x16x32xf32>
    %108 = vector.shape_cast %99 : vector<16x32xf32> to vector<1x16x32xf32>
    %109 = vector.shape_cast %100 : vector<16x32xf32> to vector<1x16x32xf32>
    %110 = vector.shape_cast %101 : vector<16x32xf32> to vector<1x16x32xf32>
    %111 = vector.shape_cast %103 : vector<16x32xf32> to vector<1x16x32xf32>
    %112 = vector.shape_cast %104 : vector<16x32xf32> to vector<1x16x32xf32>
    %113 = vector.shape_cast %105 : vector<16x32xf32> to vector<1x16x32xf32>
    %114 = vector.shape_cast %106 : vector<16x32xf32> to vector<1x16x32xf32>
    %115 = tpu.concatenate %107, %108, %109, %110, %111, %112, %113, %114 in 0 : vector<1x16x32xf32>, vector<1x16x32xf32>, vector<1x16x32xf32>, vector<1x16x32xf32>, vector<1x16x32xf32>, vector<1x16x32xf32>, vector<1x16x32xf32>, vector<1x16x32xf32> -> vector<8x16x32xf32>
    %116 = arith.truncf %115 : vector<8x16x32xf32> to vector<8x16x32xbf16>
    %117 = vector.extract_strided_slice %76 {offsets = [0, 0], sizes = [16, 128], strides = [1, 1]} : vector<32x128xf32> to vector<16x128xf32>
    %118 = vector.extract_strided_slice %117 {offsets = [0, 0], sizes = [16, 32], strides = [1, 1]} : vector<16x128xf32> to vector<16x32xf32>
    %119 = vector.extract_strided_slice %117 {offsets = [0, 32], sizes = [16, 32], strides = [1, 1]} : vector<16x128xf32> to vector<16x32xf32>
    %120 = vector.extract_strided_slice %117 {offsets = [0, 64], sizes = [16, 32], strides = [1, 1]} : vector<16x128xf32> to vector<16x32xf32>
    %121 = vector.extract_strided_slice %117 {offsets = [0, 96], sizes = [16, 32], strides = [1, 1]} : vector<16x128xf32> to vector<16x32xf32>
    %122 = vector.extract_strided_slice %76 {offsets = [16, 0], sizes = [16, 128], strides = [1, 1]} : vector<32x128xf32> to vector<16x128xf32>
    %123 = vector.extract_strided_slice %122 {offsets = [0, 0], sizes = [16, 32], strides = [1, 1]} : vector<16x128xf32> to vector<16x32xf32>
    %124 = vector.extract_strided_slice %122 {offsets = [0, 32], sizes = [16, 32], strides = [1, 1]} : vector<16x128xf32> to vector<16x32xf32>
    %125 = vector.extract_strided_slice %122 {offsets = [0, 64], sizes = [16, 32], strides = [1, 1]} : vector<16x128xf32> to vector<16x32xf32>
    %126 = vector.extract_strided_slice %122 {offsets = [0, 96], sizes = [16, 32], strides = [1, 1]} : vector<16x128xf32> to vector<16x32xf32>
    %127 = vector.shape_cast %118 : vector<16x32xf32> to vector<1x16x32xf32>
    %128 = vector.shape_cast %119 : vector<16x32xf32> to vector<1x16x32xf32>
    %129 = vector.shape_cast %120 : vector<16x32xf32> to vector<1x16x32xf32>
    %130 = vector.shape_cast %121 : vector<16x32xf32> to vector<1x16x32xf32>
    %131 = vector.shape_cast %123 : vector<16x32xf32> to vector<1x16x32xf32>
    %132 = vector.shape_cast %124 : vector<16x32xf32> to vector<1x16x32xf32>
    %133 = vector.shape_cast %125 : vector<16x32xf32> to vector<1x16x32xf32>
    %134 = vector.shape_cast %126 : vector<16x32xf32> to vector<1x16x32xf32>
    %135 = tpu.concatenate %127, %128, %129, %130, %131, %132, %133, %134 in 0 : vector<1x16x32xf32>, vector<1x16x32xf32>, vector<1x16x32xf32>, vector<1x16x32xf32>, vector<1x16x32xf32>, vector<1x16x32xf32>, vector<1x16x32xf32>, vector<1x16x32xf32> -> vector<8x16x32xf32>
    %136 = arith.truncf %135 : vector<8x16x32xf32> to vector<8x16x32xbf16>
    "tpu.trace_start"() <{level = 10 : i32, message = "nqd,nkd->nqk"}> : () -> ()
    %cst_57 = arith.constant dense<0.000000e+00> : vector<8x16x16xf32>
    %137 = tpu.matmul %96, %116, %cst_57 {dimension_numbers = #tpu.dot_dimension_numbers<[2], [2], [1], [1], [0, 0, 0, 1, 1, 1], [0], [0]>} : vector<8x16x32xbf16>, vector<8x16x32xbf16>, vector<8x16x16xf32> -> vector<8x16x16xf32>
    "tpu.trace_stop"() : () -> ()
    %cst_58 = arith.constant dense<0xFF800000> : vector<8x16xf32>
    %138 = vector.multi_reduction <maximumf>, %137, %cst_58 [2] : vector<8x16x16xf32> to vector<8x16xf32>
    %139 = vector.shape_cast %138 : vector<8x16xf32> to vector<8x16x1xf32>
    %140 = vector.broadcast %139 : vector<8x16x1xf32> to vector<8x16x16xf32>
    %141 = arith.subf %137, %140 : vector<8x16x16xf32>
    %142 = math.exp %141 : vector<8x16x16xf32>
    %cst_59 = arith.constant dense<0.000000e+00> : vector<8x16xf32>
    %143 = vector.multi_reduction <add>, %142, %cst_59 [2] : vector<8x16x16xf32> to vector<8x16xf32>
    %144 = vector.shape_cast %143 : vector<8x16xf32> to vector<8x16x1xf32>
    %145 = tpu.reciprocal %144 {approx = true} : vector<8x16x1xf32> -> vector<8x16x1xf32>
    %146 = vector.broadcast %145 : vector<8x16x1xf32> to vector<8x16x16xf32>
    %147 = arith.mulf %142, %146 : vector<8x16x16xf32>
    %148 = arith.truncf %147 : vector<8x16x16xf32> to vector<8x16x16xbf16>
    "tpu.trace_start"() <{level = 10 : i32, message = "nqk,nkd->nqd"}> : () -> ()
    %cst_60 = arith.constant dense<0.000000e+00> : vector<8x16x32xf32>
    %149 = tpu.matmul %148, %136, %cst_60 {dimension_numbers = #tpu.dot_dimension_numbers<[2], [1], [1], [2], [0, 0, 0, 1, 1, 2], [0], [0]>} : vector<8x16x16xbf16>, vector<8x16x32xbf16>, vector<8x16x32xf32> -> vector<8x16x32xf32>
    "tpu.trace_stop"() : () -> ()
    %150 = vector.extract_strided_slice %149 {offsets = [0, 0, 0], sizes = [1, 16, 32], strides = [1, 1, 1]} : vector<8x16x32xf32> to vector<1x16x32xf32>
    %151 = vector.shape_cast %150 : vector<1x16x32xf32> to vector<16x32xf32>
    %152 = vector.extract_strided_slice %149 {offsets = [1, 0, 0], sizes = [1, 16, 32], strides = [1, 1, 1]} : vector<8x16x32xf32> to vector<1x16x32xf32>
    %153 = vector.shape_cast %152 : vector<1x16x32xf32> to vector<16x32xf32>
    %154 = vector.extract_strided_slice %149 {offsets = [2, 0, 0], sizes = [1, 16, 32], strides = [1, 1, 1]} : vector<8x16x32xf32> to vector<1x16x32xf32>
    %155 = vector.shape_cast %154 : vector<1x16x32xf32> to vector<16x32xf32>
    %156 = vector.extract_strided_slice %149 {offsets = [3, 0, 0], sizes = [1, 16, 32], strides = [1, 1, 1]} : vector<8x16x32xf32> to vector<1x16x32xf32>
    %157 = vector.shape_cast %156 : vector<1x16x32xf32> to vector<16x32xf32>
    %158 = tpu.concatenate %151, %153, %155, %157 in 1 : vector<16x32xf32>, vector<16x32xf32>, vector<16x32xf32>, vector<16x32xf32> -> vector<16x128xf32>
    %159 = vector.extract_strided_slice %149 {offsets = [4, 0, 0], sizes = [1, 16, 32], strides = [1, 1, 1]} : vector<8x16x32xf32> to vector<1x16x32xf32>
    %160 = vector.shape_cast %159 : vector<1x16x32xf32> to vector<16x32xf32>
    %161 = vector.extract_strided_slice %149 {offsets = [5, 0, 0], sizes = [1, 16, 32], strides = [1, 1, 1]} : vector<8x16x32xf32> to vector<1x16x32xf32>
    %162 = vector.shape_cast %161 : vector<1x16x32xf32> to vector<16x32xf32>
    %163 = vector.extract_strided_slice %149 {offsets = [6, 0, 0], sizes = [1, 16, 32], strides = [1, 1, 1]} : vector<8x16x32xf32> to vector<1x16x32xf32>
    %164 = vector.shape_cast %163 : vector<1x16x32xf32> to vector<16x32xf32>
    %165 = vector.extract_strided_slice %149 {offsets = [7, 0, 0], sizes = [1, 16, 32], strides = [1, 1, 1]} : vector<8x16x32xf32> to vector<1x16x32xf32>
    %166 = vector.shape_cast %165 : vector<1x16x32xf32> to vector<16x32xf32>
    %167 = tpu.concatenate %160, %162, %164, %166 in 1 : vector<16x32xf32>, vector<16x32xf32>, vector<16x32xf32>, vector<16x32xf32> -> vector<16x128xf32>
    %168 = tpu.concatenate %158, %167 in 0 : vector<16x128xf32>, vector<16x128xf32> -> vector<32x128xf32>
    %169 = arith.truncf %168 : vector<32x128xf32> to vector<32x128xbf16>
    %cst_61 = arith.constant dense<0.000000e+00> : vector<32x128xf32>
    %170 = tpu.matmul %169, %19, %cst_61 {dimension_numbers = #tpu.dot_dimension_numbers<[1], [0], [0], [1], [0, 0, 1, 1], [], []>} : vector<32x128xbf16>, vector<128x128xbf16>, vector<32x128xf32> -> vector<32x128xf32>
    %171 = arith.addf %170, %39 : vector<32x128xf32>
    %172 = arith.addf %3, %171 : vector<32x128xf32>
    %173 = arith.truncf %172 : vector<32x128xf32> to vector<32x128xbf16>
    %cst_62 = arith.constant dense<0.000000e+00> : vector<32x256xf32>
    %174 = tpu.matmul %173, %21, %cst_62 {dimension_numbers = #tpu.dot_dimension_numbers<[1], [0], [0], [1], [0, 0, 1, 1], [], []>} : vector<32x128xbf16>, vector<128x256xbf16>, vector<32x256xf32> -> vector<32x256xf32>
    %175 = arith.addf %174, %43 : vector<32x256xf32>
    %176 = arith.mulf %175, %175 : vector<32x256xf32>
    %177 = arith.mulf %175, %176 : vector<32x256xf32>
    %cst_63 = arith.constant 4.471500e-02 : f32
    %178 = vector.broadcast %cst_63 : f32 to vector<32x256xf32>
    %179 = arith.mulf %178, %177 : vector<32x256xf32>
    %180 = arith.addf %175, %179 : vector<32x256xf32>
    %cst_64 = arith.constant 0.797884583 : f32
    %181 = vector.broadcast %cst_64 : f32 to vector<32x256xf32>
    %182 = arith.mulf %181, %180 : vector<32x256xf32>
    %183 = math.tanh %182 : vector<32x256xf32>
    %cst_65 = arith.constant 1.000000e+00 : f32
    %184 = vector.broadcast %cst_65 : f32 to vector<32x256xf32>
    %185 = arith.addf %184, %183 : vector<32x256xf32>
    %cst_66 = arith.constant 5.000000e-01 : f32
    %186 = vector.broadcast %cst_66 : f32 to vector<32x256xf32>
    %187 = arith.mulf %186, %185 : vector<32x256xf32>
    %188 = arith.mulf %175, %187 : vector<32x256xf32>
    %189 = arith.truncf %188 : vector<32x256xf32> to vector<32x256xbf16>
    %cst_67 = arith.constant dense<0.000000e+00> : vector<32x128xf32>
    %190 = tpu.matmul %189, %23, %cst_67 {dimension_numbers = #tpu.dot_dimension_numbers<[1], [0], [0], [1], [0, 0, 1, 1], [], []>} : vector<32x256xbf16>, vector<256x128xbf16>, vector<32x128xf32> -> vector<32x128xf32>
    %191 = arith.addf %190, %47 : vector<32x128xf32>
    %cst_68 = arith.constant dense<0.000000e+00> : vector<32xf32>
    %192 = vector.multi_reduction <add>, %191, %cst_68 [1] : vector<32x128xf32> to vector<32xf32>
    %193 = vector.shape_cast %192 : vector<32xf32> to vector<32x1xf32>
    %cst_69 = arith.constant 1.280000e+02 : f32
    %194 = vector.broadcast %cst_69 : f32 to vector<32x1xf32>
    %195 = arith.divf %193, %194 : vector<32x1xf32>
    %196 = vector.broadcast %195 : vector<32x1xf32> to vector<32x128xf32>
    %197 = arith.subf %191, %196 : vector<32x128xf32>
    %198 = arith.mulf %197, %197 : vector<32x128xf32>
    %cst_70 = arith.constant dense<0.000000e+00> : vector<32xf32>
    %199 = vector.multi_reduction <add>, %198, %cst_70 [1] : vector<32x128xf32> to vector<32xf32>
    %200 = vector.shape_cast %199 : vector<32xf32> to vector<32x1xf32>
    %cst_71 = arith.constant 1.280000e+02 : f32
    %201 = vector.broadcast %cst_71 : f32 to vector<32x1xf32>
    %202 = arith.divf %200, %201 : vector<32x1xf32>
    %203 = vector.broadcast %195 : vector<32x1xf32> to vector<32x128xf32>
    %204 = arith.subf %191, %203 : vector<32x128xf32>
    %cst_72 = arith.constant 9.99999997E-7 : f32
    %205 = vector.broadcast %cst_72 : f32 to vector<32x1xf32>
    %206 = arith.addf %202, %205 : vector<32x1xf32>
    %207 = math.rsqrt %206 : vector<32x1xf32>
    %208 = vector.broadcast %207 : vector<32x1xf32> to vector<32x128xf32>
    %209 = arith.mulf %204, %208 : vector<32x128xf32>
    %210 = vector.broadcast %9 : vector<1x128xf32> to vector<32x128xf32>
    %211 = arith.mulf %209, %210 : vector<32x128xf32>
    %212 = vector.broadcast %11 : vector<1x128xf32> to vector<32x128xf32>
    %213 = arith.addf %211, %212 : vector<32x128xf32>
    %214 = arith.truncf %213 : vector<32x128xf32> to vector<32x128xbf16>
    %cst_73 = arith.constant dense<0.000000e+00> : vector<32x256xf32>
    %215 = tpu.matmul %214, %21, %cst_73 {dimension_numbers = #tpu.dot_dimension_numbers<[1], [0], [0], [1], [0, 0, 1, 1], [], []>} : vector<32x128xbf16>, vector<128x256xbf16>, vector<32x256xf32> -> vector<32x256xf32>
    %216 = arith.addf %215, %43 : vector<32x256xf32>
    %217 = arith.mulf %216, %216 : vector<32x256xf32>
    %218 = arith.mulf %216, %217 : vector<32x256xf32>
    %cst_74 = arith.constant 4.471500e-02 : f32
    %219 = vector.broadcast %cst_74 : f32 to vector<32x256xf32>
    %220 = arith.mulf %219, %218 : vector<32x256xf32>
    %221 = arith.addf %216, %220 : vector<32x256xf32>
    %cst_75 = arith.constant 0.797884583 : f32
    %222 = vector.broadcast %cst_75 : f32 to vector<32x256xf32>
    %223 = arith.mulf %222, %221 : vector<32x256xf32>
    %224 = math.tanh %223 : vector<32x256xf32>
    %cst_76 = arith.constant 1.000000e+00 : f32
    %225 = vector.broadcast %cst_76 : f32 to vector<32x256xf32>
    %226 = arith.addf %225, %224 : vector<32x256xf32>
    %cst_77 = arith.constant 5.000000e-01 : f32
    %227 = vector.broadcast %cst_77 : f32 to vector<32x256xf32>
    %228 = arith.mulf %227, %226 : vector<32x256xf32>
    %229 = arith.mulf %216, %228 : vector<32x256xf32>
    %230 = arith.truncf %229 : vector<32x256xf32> to vector<32x256xbf16>
    %cst_78 = arith.constant dense<0.000000e+00> : vector<32x128xf32>
    %231 = tpu.matmul %230, %23, %cst_78 {dimension_numbers = #tpu.dot_dimension_numbers<[1], [0], [0], [1], [0, 0, 1, 1], [], []>} : vector<32x256xbf16>, vector<256x128xbf16>, vector<32x128xf32> -> vector<32x128xf32>
    %232 = arith.addf %231, %47 : vector<32x128xf32>
    %233 = arith.addf %172, %232 : vector<32x128xf32>
    %c0_79 = arith.constant 0 : index
    %c0_80 = arith.constant 0 : index
    %234 = vector.load %arg19[%c0_79, %c0_80] : memref<32x128xf32, #tpu.memory_space<vmem>>, vector<32x128xf32>
    tpu.vector_store %arg19[%c0_79, %c0_80], %233 {strides = array<i32>} : memref<32x128xf32, #tpu.memory_space<vmem>>, vector<32x128xf32>,
    %c0_81 = arith.constant 0 : index
    %c0_82 = arith.constant 0 : index
    %235 = vector.load %arg18[%c0_81, %c0_82] : memref<32x128xf32, #tpu.memory_space<vmem>>, vector<32x128xf32>
    tpu.vector_store %arg18[%c0_81, %c0_82], %233 {strides = array<i32>} : memref<32x128xf32, #tpu.memory_space<vmem>>, vector<32x128xf32>,
    return
  }
  func.func @transform_0(%arg0: i32) -> (i32, i32) {
    %c0_i32 = arith.constant 0 : i32
    %c0_i32_0 = arith.constant 0 : i32
    %c0_i32_1 = arith.constant 0 : i32
    return %c0_i32, %c0_i32_0 : i32, i32
  }
  func.func @transform_1(%arg0: i32) -> (i32, i32, i32) {
    %c0_i32 = arith.constant 0 : i32
    %c0_i32_0 = arith.constant 0 : i32
    %c0_i32_1 = arith.constant 0 : i32
    return %arg0, %c0_i32, %c0_i32_0 : i32, i32, i32
  }
  func.func @transform_2(%arg0: i32) -> (i32, i32, i32) {
    %c0_i32 = arith.constant 0 : i32
    %c0_i32_0 = arith.constant 0 : i32
    %c0_i32_1 = arith.constant 0 : i32
    return %arg0, %c0_i32, %c0_i32_0 : i32, i32, i32
  }
  func.func @transform_3(%arg0: i32) -> (i32, i32, i32) {
    %c0_i32 = arith.constant 0 : i32
    %c0_i32_0 = arith.constant 0 : i32
    %c0_i32_1 = arith.constant 0 : i32
    return %arg0, %c0_i32, %c0_i32_0 : i32, i32, i32
  }
  func.func @transform_4(%arg0: i32) -> (i32, i32, i32) {
    %c0_i32 = arith.constant 0 : i32
    %c0_i32_0 = arith.constant 0 : i32
    %c0_i32_1 = arith.constant 0 : i32
    return %arg0, %c0_i32, %c0_i32_0 : i32, i32, i32
  }
  func.func @transform_5(%arg0: i32) -> (i32, i32, i32) {
    %c0_i32 = arith.constant 0 : i32
    %c0_i32_0 = arith.constant 0 : i32
    %c0_i32_1 = arith.constant 0 : i32
    return %arg0, %c0_i32, %c0_i32_0 : i32, i32, i32
  }
  func.func @transform_6(%arg0: i32) -> (i32, i32, i32) {
    %c0_i32 = arith.constant 0 : i32
    %c0_i32_0 = arith.constant 0 : i32
    %c0_i32_1 = arith.constant 0 : i32
    return %arg0, %c0_i32, %c0_i32_0 : i32, i32, i32
  }
  func.func @transform_7(%arg0: i32) -> (i32, i32, i32) {
    %c0_i32 = arith.constant 0 : i32
    %c0_i32_0 = arith.constant 0 : i32
    %c0_i32_1 = arith.constant 0 : i32
    return %arg0, %c0_i32, %c0_i32_0 : i32, i32, i32
  }
  func.func @transform_8(%arg0: i32) -> (i32, i32, i32) {
    %c0_i32 = arith.constant 0 : i32
    %c0_i32_0 = arith.constant 0 : i32
    %c0_i32_1 = arith.constant 0 : i32
    return %arg0, %c0_i32, %c0_i32_0 : i32, i32, i32
  }
  func.func @transform_9(%arg0: i32) -> (i32, i32, i32) {
    %c0_i32 = arith.constant 0 : i32
    %c0_i32_0 = arith.constant 0 : i32
    %c0_i32_1 = arith.constant 0 : i32
    return %arg0, %c0_i32, %c0_i32_0 : i32, i32, i32
  }
  func.func @transform_10(%arg0: i32) -> (i32, i32, i32) {
    %c0_i32 = arith.constant 0 : i32
    %c0_i32_0 = arith.constant 0 : i32
    %c0_i32_1 = arith.constant 0 : i32
    return %arg0, %c0_i32, %c0_i32_0 : i32, i32, i32
  }
  func.func @transform_11(%arg0: i32) -> (i32, i32, i32) {
    %c0_i32 = arith.constant 0 : i32
    %c0_i32_0 = arith.constant 0 : i32
    %c0_i32_1 = arith.constant 0 : i32
    return %arg0, %c0_i32, %c0_i32_0 : i32, i32, i32
  }
  func.func @transform_12(%arg0: i32) -> (i32, i32, i32) {
    %c0_i32 = arith.constant 0 : i32
    %c0_i32_0 = arith.constant 0 : i32
    %c0_i32_1 = arith.constant 0 : i32
    return %arg0, %c0_i32, %c0_i32_0 : i32, i32, i32
  }
  func.func @transform_13(%arg0: i32) -> (i32, i32, i32) {
    %c0_i32 = arith.constant 0 : i32
    %c0_i32_0 = arith.constant 0 : i32
    %c0_i32_1 = arith.constant 0 : i32
    return %arg0, %c0_i32, %c0_i32_0 : i32, i32, i32
  }
  func.func @transform_14(%arg0: i32) -> (i32, i32, i32) {
    %c0_i32 = arith.constant 0 : i32
    %c0_i32_0 = arith.constant 0 : i32
    %c0_i32_1 = arith.constant 0 : i32
    return %arg0, %c0_i32, %c0_i32_0 : i32, i32, i32
  }
  func.func @transform_15(%arg0: i32) -> (i32, i32, i32) {
    %c0_i32 = arith.constant 0 : i32
    %c0_i32_0 = arith.constant 0 : i32
    %c0_i32_1 = arith.constant 0 : i32
    return %arg0, %c0_i32, %c0_i32_0 : i32, i32, i32
  }
  func.func @transform_16(%arg0: i32) -> (i32, i32, i32) {
    %c0_i32 = arith.constant 0 : i32
    %c0_i32_0 = arith.constant 0 : i32
    %c0_i32_1 = arith.constant 0 : i32
    return %arg0, %c0_i32, %c0_i32_0 : i32, i32, i32
  }
  func.func @transform_17(%arg0: i32) -> (i32, i32) {
    %c0_i32 = arith.constant 0 : i32
    %c0_i32_0 = arith.constant 0 : i32
    %c0_i32_1 = arith.constant 0 : i32
    return %c0_i32, %c0_i32_0 : i32, i32
  }
}

</mosaic_0001>

<bundles_post_ra>
// kernel: tpu_custom_call.1
= control target key start
LH: loop header
LB: loop body
LE: loop exit
PB: predicated region body
PF: predicated region fallthrough
CT: control target
= control target key end

     0   :  { %s6046_s0 = inlined_call_operand.hbm [shape: f32[32,128], index: 0, kind: input, shape index: {}]   ;;  %s6047_s1 = inlined_call_operand.hbm [shape: f32[2,1,128], index: 1, kind: input, shape index: {}]   ;;  %s6048_s2 = inlined_call_operand.vmem [shape: f32[2,1,128], index: 2, kind: input, shape index: {}]   ;;  %s6049_s3 = inlined_call_operand.hbm [shape: bf16[2,128,128], index: 3, kind: input, shape index: {}]   ;;  %s6050_s4 = inlined_call_operand.hbm [shape: f32[2,1,128], index: 4, kind: input, shape index: {}]   ;;  %s6051_s5 = inlined_call_operand.hbm [shape: bf16[2,128,128], index: 5, kind: input, shape index: {}]   ;;  %s6052_s6 = inlined_call_operand.vmem [shape: f32[2,1,128], index: 6, kind: input, shape index: {}]   ;;  %s6053_s7 = inlined_call_operand.hbm [shape: bf16[2,128,128], index: 7, kind: input, shape index: {}]   ;;  %s6054_s8 = inlined_call_operand.vmem [shape: f32[2,1,128], index: 8, kind: input, shape index: {}]   ;;  %s6055_s9 = inlined_call_operand.hbm [shape: bf16[2,128,128], index: 9, kind: input, shape index: {}]   ;;  %s6056_s10 = inlined_call_operand.vmem [shape: f32[2,1,128], index: 10, kind: input, shape index: {}]   ;;  %s6057_s11 = inlined_call_operand.vmem [shape: f32[2,1,128], index: 11, kind: input, shape index: {}]   ;;  %s6058_s12 = inlined_call_operand.vmem [shape: f32[2,1,128], index: 12, kind: input, shape index: {}]   ;;  %s6059_s13 = inlined_call_operand.hbm [shape: bf16[2,128,256], index: 13, kind: input, shape index: {}]   ;;  %s6060_s14 = inlined_call_operand.vmem [shape: f32[2,1,256], index: 14, kind: input, shape index: {}]   ;;  %s6061_s15 = inlined_call_operand.hbm [shape: bf16[2,256,128], index: 15, kind: input, shape index: {}]   ;;  %s6062_s16 = inlined_call_operand.vmem [shape: f32[2,1,128], index: 16, kind: input, shape index: {}]   ;;  %s6063_s17 = inlined_call_operand.hbm [shape: f32[32,128], index: 17, kind: output, shape index: {}]  }
   0x1   :  { %6083 = sst [smem:[#allocation29_spill]] %s6046_s0 }
   0x2   :  { %6084 = sst [smem:[#allocation30_spill]] %s6047_s1 }
   0x3   :  { %6085 = sst [smem:[#allocation31_spill]] %s6048_s2 }
   0x4   :  { %6086 = sst [smem:[#allocation32_spill]] %s6049_s3 }
   0x5   :  { %6087 = sst [smem:[#allocation33_spill]] %s6050_s4 }
   0x6   :  { %6088 = sst [smem:[#allocation34_spill]] %s6051_s5 }
   0x7   :  { %6089 = sst [smem:[#allocation35_spill]] %s6052_s6 }
   0x8   :  { %6090 = sst [smem:[#allocation36_spill]] %s6053_s7 }
   0x9   :  { %6091 = sst [smem:[#allocation37_spill]] %s6054_s8 }
   0xa   :  { %6092 = sst [smem:[#allocation38_spill]] %s6055_s9 }
   0xb   :  { %6093 = sst [smem:[#allocation39_spill]] %s6056_s10 }
   0xc   :  { %6094 = sst [smem:[#allocation40_spill]] %s6057_s11 }
   0xd   :  { %6095 = sst [smem:[#allocation41_spill]] %s6058_s12 }
   0xe   :  { %6096 = sst [smem:[#allocation42_spill]] %s6059_s13 }
   0xf   :  { %6097 = sst [smem:[#allocation43_spill]] %s6060_s14 }
  0x10   :  { %6098 = sst [smem:[#allocation44_spill]] %s6061_s15 }
  0x11   :  { %6099 = sst [smem:[#allocation45_spill]] %s6062_s16 }
  0x12   :  { %6100 = sst [smem:[#allocation46_spill]] %s6063_s17 }
  0x13   :  { %22 = vsyncpa [#allocation4], 0 }
  0x14   :  { %23 = vsyncpa [#allocation7], 0 }
  0x15   :  { %25 = vsyncpa [#allocation7 + $0x1], 0 }
  0x16   :  { %26 = vsyncpa [#allocation10], 0 }
  0x17   :  { %28 = vsyncpa [#allocation10 + $0x1], 0 }
  0x18   :  { %29 = vsyncpa [#allocation13], 0 }
  0x19   :  { %31 = vsyncpa [#allocation13 + $0x1], 0 }
  0x1a   :  { %32 = vsyncpa [#allocation16], 0 }
  0x1b   :  { %34 = vsyncpa [#allocation16 + $0x1], 0 }
  0x1c   :  { %35 = vsyncpa [#allocation5], 0  ;;  %s4894_s24 = smov 0   ;;  %s4896_s25 = smov 0  }
  0x1d   :  { %s4898_s26 = smov 0   ;;  %s4900_s27 = smov 0  }
  0x1e LB: > { %6101 = sst [smem:[#allocation25_spill]] %s4772_s25  ;;  %s4915_s28 = sadd.s32 1, %s4780_s27   ;;  %s4780_s27 = sphi %s4900_s27, %s6157_s27   ;;  %s4776_s26 = sphi %s4898_s26, %s6160_s26   ;;  %s4772_s25 = sphi %s4896_s25, %s6159_s25   ;;  %s4768_s24 = sphi %s4894_s24, %s6158_s24  }
  0x1f   : > { %6102 = sst [smem:[#allocation26_spill]] %s4776_s26  ;;  %s69_s29 = sadd.s32 1, %s4776_s26 }
  0x20   : > { %6103 = sst [smem:[#allocation27_spill]] %s4915_s28  ;;  %s66_s0 = ssub.s32 %s4780_s27, %s4915_s28 }
  0x21   : > { %p76_p0 = scmp.ne.s32.totalorder %s4776_s26, %s4772_s25  ;;  %p67_p1 = scmp.eq.s32.totalorder %s66_s0, 0 }
  0x22   : > { %p77_p2 = scmp.eq.s32.totalorder %s4780_s27, 0  ;;  %p4094_p3 = scmp.lt.s32.totalorder %s4780_s27, 2 }
  0x23   : > { %s4925_s30 = scalar_select %p67_p1, %s4776_s26, %s69_s29  }
  0x24   : > { %p78_p4 = por %p77_p2, %p76_p0  ;;  %s4928_s18 = sand.u32 1, %s4780_s27  }
  0x25   : > { %6104 = sst [smem:[#allocation28_spill]] %s4925_s30  ;;  %s4931_s19 = sand.u32 1, %s4776_s26  }
  0x26   : > { %s6068_s1 = sshll.u32 %s4780_s27, 4  ;;  %s6105_s22 = sld [smem:[#allocation30_spill]] }
  0x27   : > { %s533_s29 = scalar_lea.vmem [#allocation6], %s4931_s19  ;;  %p4944_p5 = pnand %p4094_p3, %p78_p4 }
  0x28   : > { %s540_s0 = sshll.u32 %s533_s29, 4  ;;  %s4949_s26 = sshll.u32 %s4931_s19, 6  ;;  %s4942_s0 = int_to_ptr.vmem [resolvable:$true] %s540_s0 }
  0x29   : > { %p4956_p7 = pneg %p4944_p5 }
  0x2c   : > { %s4939_s23 = scalar_lea.hbm %s6105_s22, %s6068_s1  ;;  %s4457_s1 = scalar_lea.hbm %s6105_s22, 32 }
  0x2d   : > { %s4452_s17 = scalar_lea.hbm %s4939_s23, 16  ;;  %p4458_p10 = scmp.lt.s32.totalorder %s4939_s23, %s6105_s22 }
  0x2e   : > { %p4453_p6 = scmp.ne.s32.totalorder %s4939_s23, %s4452_s17  ;;  %p4459_p11 = scmp.lt.s32.totalorder %s4457_s1, %s4452_s17 }
  0x30   : > { %p4455_p8 = pnand %p4956_p7, %p4453_p6  ;;  %p4460_p12 = por %p4459_p11, %p4458_p10 }
  0x32   : > { %p4456_p9 = pneg %p4455_p8 }
  0x34   : > { %p4461_p13 = pnand %p4460_p12, %p4456_p9 }
  0x36   : > { %4464 = shalt.err (!%p4461_p13)
}
  0x37   : > { %s4465_s28 = scalar_lea.vmem %s4942_s0, 16  ;;  %s4782_s12 = smov [#allocation6]  }
  0x38   : > { %p4466_p0 = scmp.ne.s32.totalorder %s4942_s0, %s4465_s28  ;;  %s4470_s21 = sshll.u32 %s4782_s12, 4  ;;  %s4471_s21 = int_to_ptr.vmem [resolvable:$false] %s4470_s21 }
  0x39   : > { %s4472_s29 = scalar_lea.vmem %s4471_s21, 32  ;;  %p4473_p3 = scmp.lt.s32.totalorder %s4942_s0, %s4471_s21 }
  0x3a   : > { %p4468_p1 = pnand %p4466_p0, %p4956_p7  ;;  %p4474_p4 = scmp.lt.s32.totalorder %s4472_s29, %s4465_s28 }
  0x3c   : > { %p4469_p2 = pneg %p4468_p1  ;;  %p4475_p6 = por %p4474_p4, %p4473_p3 }
  0x3e   : > { %p4476_p8 = pnand %p4475_p6, %p4469_p2 }
  0x40   : > { %4479 = shalt.err (!%p4476_p8)
}
  0x41   : > { %s6108_s14 = scalar_lea.sflag [#allocation7], %s4928_s18  ;;  %s6109_s12 = sshll.u32 %s4780_s27, 4 }
  0x42   : > { %4071 = dma.hbm_to_vmem [thread:$0]  (!%p4944_p5), %s4939_s23, 16, %s4942_s0, %s6108_s14  }
  0x43   : > { %s6110_s4 = sld [smem:[#allocation33_spill]]  ;;  %s577_s1 = scalar_lea.vmem [#allocation9], %s4931_s19 }
  0x44   : > { %s584_s21 = sshll.u32 %s577_s1, 4  ;;  %s4989_s29 = sshll.u32 %s4780_s27, 10  ;;  %s585_s21 = int_to_ptr.vmem [resolvable:$true] %s584_s21 }
  0x49   : > { %s4985_s28 = scalar_lea.hbm %s6110_s4, %s6109_s12  ;;  %s4485_s14 = scalar_lea.hbm %s6110_s4, 32 }
  0x4a   : > { %s4480_s11 = scalar_lea.hbm %s4985_s28, 16  ;;  %p4486_p12 = scmp.lt.s32.totalorder %s4985_s28, %s6110_s4 }
  0x4b   : > { %p4481_p9 = scmp.ne.s32.totalorder %s4985_s28, %s4480_s11  ;;  %p4487_p13 = scmp.lt.s32.totalorder %s4485_s14, %s4480_s11 }
  0x4d   : > { %p4483_p10 = pnand %p4481_p9, %p4956_p7  ;;  %p4488_p0 = por %p4487_p13, %p4486_p12 }
  0x4f   : > { %p4484_p11 = pneg %p4483_p10 }
  0x51   : > { %p4489_p1 = pnand %p4488_p0, %p4484_p11 }
  0x53   : > { %4492 = shalt.err (!%p4489_p1)
}
  0x54   : > { %s4493_s17 = scalar_lea.vmem %s585_s21, 16  ;;  %s4783_s1 = smov [#allocation9]  }
  0x55   : > { %p4494_p2 = scmp.ne.s32.totalorder %s585_s21, %s4493_s17  ;;  %s4498_s22 = sshll.u32 %s4783_s1, 4  ;;  %s4499_s22 = int_to_ptr.vmem [resolvable:$false] %s4498_s22 }
  0x56   : > { %s4500_s10 = scalar_lea.vmem %s4499_s22, 32  ;;  %p4501_p6 = scmp.lt.s32.totalorder %s585_s21, %s4499_s22 }
  0x57   : > { %p4496_p3 = pnand %p4494_p2, %p4956_p7  ;;  %p4502_p8 = scmp.lt.s32.totalorder %s4500_s10, %s4493_s17 }
  0x59   : > { %p4497_p4 = pneg %p4496_p3  ;;  %p4503_p9 = por %p4502_p8, %p4501_p6 }
  0x5b   : > { %p4504_p10 = pnand %p4503_p9, %p4497_p4 }
  0x5d   : > { %4507 = shalt.err (!%p4504_p10)
}
  0x5e   : > { %s6111_s11 = scalar_lea.sflag [#allocation10], %s4928_s18  ;;  %s6112_s7 = sld [smem:[#allocation36_spill]] }
  0x5f   : > { %4077 = dma.hbm_to_vmem [thread:$0]  (!%p4944_p5), %s4985_s28, 16, %s585_s21, %s6111_s11  }
  0x60   : > { %s622_s10 = scalar_lea.vmem [#allocation12], %s4949_s26  ;;  %s6070_s12 = scalar_lea.sflag [#allocation13], %s4928_s18 }
  0x61   : > { %s629_s22 = sshll.u32 %s622_s10, 4  ;;  %s5017_s22 = int_to_ptr.vmem [resolvable:$true] %s629_s22 }
  0x64   : > { %s5014_s14 = scalar_lea.hbm %s6112_s7, %s4989_s29  ;;  %s4513_s21 = scalar_lea.hbm %s6112_s7, 2048 }
  0x65   : > { %s4508_s16 = scalar_lea.hbm %s5014_s14, 1024  ;;  %p4514_p0 = scmp.lt.s32.totalorder %s5014_s14, %s6112_s7 }
  0x66   : > { %p4509_p11 = scmp.ne.s32.totalorder %s5014_s14, %s4508_s16  ;;  %p4515_p1 = scmp.lt.s32.totalorder %s4513_s21, %s4508_s16 }
  0x68   : > { %p4511_p12 = pnand %p4509_p11, %p4956_p7  ;;  %p4516_p2 = por %p4515_p1, %p4514_p0 }
  0x6a   : > { %p4512_p13 = pneg %p4511_p12 }
  0x6c   : > { %p4517_p3 = pnand %p4516_p2, %p4512_p13 }
  0x6e   : > { %4520 = shalt.err (!%p4517_p3)
}
  0x6f   : > { %s4521_s23 = scalar_lea.vmem %s5017_s22, 1024  ;;  %s4784_s0 = smov [#allocation12]  }
  0x70   : > { %p4522_p4 = scmp.ne.s32.totalorder %s5017_s22, %s4521_s23  ;;  %s4526_s10 = sshll.u32 %s4784_s0, 4  ;;  %s4527_s10 = int_to_ptr.vmem [resolvable:$false] %s4526_s10 }
  0x71   : > { %s4528_s17 = scalar_lea.vmem %s4527_s10, 2048  ;;  %p4529_p9 = scmp.lt.s32.totalorder %s5017_s22, %s4527_s10 }
  0x72   : > { %p4524_p6 = pnand %p4522_p4, %p4956_p7  ;;  %p4530_p10 = scmp.lt.s32.totalorder %s4528_s17, %s4521_s23 }
  0x74   : > { %p4525_p8 = pneg %p4524_p6  ;;  %p4531_p11 = por %p4530_p10, %p4529_p9 }
  0x76   : > { %p4532_p12 = pnand %p4531_p11, %p4525_p8 }
  0x78   : > { %4535 = shalt.err (!%p4532_p12)
}
  0x79   : > { %s6071_s16 = smov 64   ;;  %s6078_s28 = smov 4  }
  0x7a   : > { %4083 = dma.hbm_to_vmem [thread:$0]  (!%p4944_p5), %s5014_s14, 1024, %s5017_s22, %s6070_s12, %s6071_s16, %s6071_s16, %s6078_s28  }
  0x7b   : > { %s3621_s21 = sshll.u32 %s4931_s19, 7  ;;  %s3734_s1 = sshll.u32 %s4780_s27, 11 }
  0x7c   : > { %s6113_s13 = sld [smem:[#allocation42_spill]]  ;;  %s688_s10 = scalar_lea.vmem [#allocation15], %s3621_s21 }
  0x7d   : > { %s695_s17 = sshll.u32 %s688_s10, 4  ;;  %s6073_s4 = scalar_lea.sflag [#allocation16], %s4928_s18  ;;  %s5056_s17 = int_to_ptr.vmem [resolvable:$true] %s695_s17 }
  0x82   : > { %s5052_s0 = scalar_lea.hbm %s6113_s13, %s3734_s1  ;;  %s4541_s11 = scalar_lea.hbm %s6113_s13, 4096 }
  0x83   : > { %s4536_s7 = scalar_lea.hbm %s5052_s0, 2048  ;;  %p4542_p2 = scmp.lt.s32.totalorder %s5052_s0, %s6113_s13 }
  0x84   : > { %p4537_p13 = scmp.ne.s32.totalorder %s5052_s0, %s4536_s7  ;;  %p4543_p3 = scmp.lt.s32.totalorder %s4541_s11, %s4536_s7 }
  0x86   : > { %p4539_p0 = pnand %p4537_p13, %p4956_p7  ;;  %p4544_p4 = por %p4543_p3, %p4542_p2 }
  0x88   : > { %p4540_p1 = pneg %p4539_p0 }
  0x8a   : > { %p4545_p6 = pnand %p4544_p4, %p4540_p1 }
  0x8c   : > { %4548 = shalt.err (!%p4545_p6)
}
  0x8d   : > { %s4549_s10 = scalar_lea.vmem %s5056_s17, 2048  ;;  %s4787_s16 = smov [#allocation15]  }
  0x8e   : > { %p4550_p8 = scmp.ne.s32.totalorder %s5056_s17, %s4549_s10  ;;  %s4554_s14 = sshll.u32 %s4787_s16, 4  ;;  %s4555_s14 = int_to_ptr.vmem [resolvable:$false] %s4554_s14 }
  0x8f   : > { %s4556_s22 = scalar_lea.vmem %s4555_s14, 4096  ;;  %p4557_p11 = scmp.lt.s32.totalorder %s5056_s17, %s4555_s14 }
  0x90   : > { %p4552_p9 = pnand %p4550_p8, %p4956_p7  ;;  %p4558_p12 = scmp.lt.s32.totalorder %s4556_s22, %s4549_s10 }
  0x92   : > { %p4553_p10 = pneg %p4552_p9  ;;  %p4559_p13 = por %p4558_p12, %p4557_p11 }
  0x94   : > { %p4560_p0 = pnand %p4559_p13, %p4553_p10 }
  0x96   : > { %4563 = shalt.err (!%p4560_p0)
}
  0x97   : > { %s6074_s7 = smov 128   ;;  %s6075_s12 = smov 8  }
  0x98   : > { %4089 = dma.hbm_to_vmem [thread:$0]  (!%p4944_p5), %s5052_s0, 2048, %s5056_s17, %s6073_s4, %s6074_s7, %s6074_s7, %s6075_s12  }
  0x99   : > { %s6114_s15 = sld [smem:[#allocation44_spill]]  ;;  %s5093_s10 = scalar_lea.vmem [#allocation17], %s3621_s21 }
  0x9a   : > { %s5097_s22 = sadd.s32 4294967295, %s4780_s27   ;;  %p82_p1 = scmp.ne.s32.totalorder %s4772_s25, %s4768_s24 }
  0x9b   : > { %p6076_p2 = scmp.eq.s32.totalorder %s5097_s22, 0  ;;  %p3604_p3 = scmp.ge.s32.totalorder %s4780_s27, 1 }
  0x9c   : > { %p504_p4 = scmp.lt.s32.totalorder %s4780_s27, 3  ;;  %s6117_s3 = sld [smem:[#allocation32_spill]] }
  0x9d   : > { %p5107_p8 = por %p6076_p2, %p82_p1  ;;  %s557_s16 = scalar_lea.vmem [#allocation8], %s4949_s26 }
  0x9e   : > { %p5111_p9 = pnand %p3604_p3, %p504_p4  ;;  %s564_s11 = sshll.u32 %s557_s16, 4  ;;  %s565_s11 = int_to_ptr.vmem [resolvable:$true] %s564_s11 }
  0x9f   : > { %s5089_s23 = scalar_lea.hbm %s6114_s15, %s3734_s1  ;;  %s4790_s1 = smov [#allocation3]  }
  0xa0   : > { %s6115_s19 = scalar_select %p5107_p8, 1, 0 }
  0xa1   : > { %s6116_s21 = scalar_select %p5111_p9, 1, 0 }
  0xa2   : > { %s516_s0 = sshll.u32 %s4790_s1, 4  ;;  %p4064_p10 = pneg %p5111_p9  ;;  %s5115_s0 = int_to_ptr.vmem [resolvable:$true] %s516_s0 }
  0xa3   : > { %s5123_s27 = scalar_lea.hbm %s6117_s3, %s4989_s29  ;;  %s4569_s17 = scalar_lea.hbm %s6117_s3, 2048 }
  0xa4   : > { %p5128_p11 = pnand %p4064_p10, %p6076_p2  ;;  %s4564_s1 = scalar_lea.hbm %s5123_s27, 1024 }
  0xa5   : > { %p4565_p12 = scmp.ne.s32.totalorder %s5123_s27, %s4564_s1  ;;  %p4570_p1 = scmp.lt.s32.totalorder %s5123_s27, %s6117_s3 }
  0xa6   : > { %s6118_s4 = scalar_select %p5128_p11, 1, 0 }
  0xa7   : > { %p4567_p13 = pnand %p4565_p12, %p4956_p7  ;;  %p4571_p3 = scmp.lt.s32.totalorder %s4569_s17, %s4564_s1 }
  0xa9   : > { %p4568_p0 = pneg %p4567_p13  ;;  %p4572_p4 = por %p4571_p3, %p4570_p1 }
  0xab   : > { %p4573_p10 = pnand %p4572_p4, %p4568_p0 }
  0xad   : > { %4576 = shalt.err (!%p4573_p10)
}
  0xae   : > { %s4577_s16 = scalar_lea.vmem %s565_s11, 1024  ;;  %s4791_s28 = smov [#allocation8]  }
  0xaf   : > { %p4578_p6 = scmp.ne.s32.totalorder %s565_s11, %s4577_s16  ;;  %s4582_s13 = sshll.u32 %s4791_s28, 4  ;;  %s4583_s13 = int_to_ptr.vmem [resolvable:$false] %s4582_s13 }
  0xb0   : > { %s4584_s8 = scalar_lea.vmem %s4583_s13, 2048  ;;  %p4585_p12 = scmp.lt.s32.totalorder %s565_s11, %s4583_s13 }
  0xb1   : > { %p4580_p2 = pnand %p4578_p6, %p4956_p7  ;;  %p4586_p13 = scmp.lt.s32.totalorder %s4584_s8, %s4577_s16 }
  0xb3   : > { %p4581_p8 = pneg %p4580_p2  ;;  %p4587_p9 = por %p4586_p13, %p4585_p12 }
  0xb5   : > { %p4588_p11 = pnand %p4587_p9, %p4581_p8 }
  0xb7   : > { %4591 = shalt.err (!%p4588_p11)
}
  0xb8   : > { %s6119_s7 = smov 4   ;;  %s6120_s12 = smov 64  }
  0xb9   : > { %s6121_s14 = scalar_lea.sflag [#allocation7], %s4928_s18  ;;  %s6122_s5 = sld [smem:[#allocation34_spill]] }
  0xba   : > { %4074 = dma.hbm_to_vmem [thread:$0]  (!%p4944_p5), %s5123_s27, 1024, %s565_s11, %s6121_s14, %s6120_s12, %s6120_s12, %s6119_s7  }
  0xbb   : > { %p6123_p2 = scmp.ne.s32.totalorder %s6118_s4, 0  ;;  %s4603_s1 = scalar_lea.vmem %s5115_s0, 512 }
  0xbc   : > { %p4604_p8 = scmp.ne.s32.totalorder %s5115_s0, %s4603_s1  ;;  %p4611_p0 = scmp.lt.s32.totalorder %s5115_s0, %s5115_s0 }
  0xbd   : > { %p4594_p6 = pneg %p6123_p2  ;;  %p4612_p1 = scmp.lt.s32.totalorder %s4603_s1, %s4603_s1 }
  0xbf   : > { %s5157_s8 = scalar_lea.hbm %s6122_s5, %s4989_s29  ;;  %p4606_p9 = pnand %p4604_p8, %p4594_p6 }
  0xc0   : > { %p4613_p3 = por %p4612_p1, %p4611_p0 }
  0xc1   : > { %p4607_p11 = pneg %p4606_p9 }
  0xc3   : > { %p4614_p4 = pnand %p4613_p3, %p4607_p11 }
  0xc5   : > { %4617 = shalt.err (!%p4614_p4)
}
  0xc6   : > { %s6124_s27 = smov 8   ;;  %s6125_s11 = smov 128  }
  0xc7   : > { %s6126_s16 = sld [smem:[#allocation29_spill]]  ;;  %s595_s14 = scalar_lea.vmem [#allocation11], %s4949_s26 }
  0xc8   : > { %s602_s28 = sshll.u32 %s595_s14, 4  ;;  %s6127_s9 = sld [smem:[#allocation38_spill]]  ;;  %s5175_s28 = int_to_ptr.vmem [resolvable:$true] %s602_s28 }
  0xc9   : > { %s4618_s3 = scalar_lea.hbm %s5157_s8, 1024  ;;  %s4623_s6 = scalar_lea.hbm %s6122_s5, 2048 }
  0xca   : > { %p4619_p10 = scmp.ne.s32.totalorder %s5157_s8, %s4618_s3  ;;  %p4625_p6 = scmp.lt.s32.totalorder %s4623_s6, %s4618_s3 }
  0xcc   : > { %p4621_p12 = pnand %p4619_p10, %p4956_p7 }
  0xcd   : > { %4067 = dma.hbm_to_vmem [thread:$0]  (!%p6123_p2), %s6126_s16, 512, %s5115_s0, [#allocation4], %s6125_s11, %s6125_s11, %s6124_s27  }
  0xce   : > { %s5181_s1 = scalar_lea.hbm %s6127_s9, %s4989_s29  ;;  %p4622_p13 = pneg %p4621_p12 }
  0xcf   : > { %p4624_p2 = scmp.lt.s32.totalorder %s5157_s8, %s6122_s5 }
  0xd1   : > { %p4626_p8 = por %p4625_p6, %p4624_p2 }
  0xd3   : > { %p4627_p9 = pnand %p4626_p8, %p4622_p13 }
  0xd5   : > { %4630 = shalt.err (!%p4627_p9)
}
  0xd6   : > { %s4631_s29 = scalar_lea.vmem %s5175_s28, 1024  ;;  %s4792_s27 = smov [#allocation11]  }
  0xd7   : > { %p4632_p11 = scmp.ne.s32.totalorder %s5175_s28, %s4631_s29  ;;  %s4636_s11 = sshll.u32 %s4792_s27, 4  ;;  %s4637_s11 = int_to_ptr.vmem [resolvable:$false] %s4636_s11 }
  0xd8   : > { %s4638_s16 = scalar_lea.vmem %s4637_s11, 2048  ;;  %p4639_p3 = scmp.lt.s32.totalorder %s5175_s28, %s4637_s11 }
  0xd9   : > { %p4634_p0 = pnand %p4632_p11, %p4956_p7  ;;  %p4640_p4 = scmp.lt.s32.totalorder %s4638_s16, %s4631_s29 }
  0xdb   : > { %p4635_p1 = pneg %p4634_p0  ;;  %p4641_p10 = por %p4640_p4, %p4639_p3 }
  0xdd   : > { %p4642_p12 = pnand %p4641_p10, %p4635_p1 }
  0xdf   : > { %4645 = shalt.err (!%p4642_p12)
}
  0xe0   : > { %s6128_s2 = scalar_lea.sflag [#allocation10], %s4928_s18  ;;  %s6129_s3 = sshll.u32 %s5093_s10, 4  ;;  %s5210_s3 = int_to_ptr.vmem [resolvable:$true] %s6129_s3 }
  0xe1   : > { %4080 = dma.hbm_to_vmem [thread:$0]  (!%p4944_p5), %s5157_s8, 1024, %s5175_s28, %s6128_s2, %s6120_s12, %s6120_s12, %s6119_s7  }
  0xe2   : > { %s649_s6 = scalar_lea.vmem [#allocation14], %s4949_s26  ;;  %s4646_s13 = scalar_lea.hbm %s5181_s1, 1024 }
  0xe3   : > { %s656_s14 = sshll.u32 %s649_s6, 4  ;;  %p4647_p13 = scmp.ne.s32.totalorder %s5181_s1, %s4646_s13  ;;  %s657_s14 = int_to_ptr.vmem [resolvable:$true] %s656_s14 }
  0xe4   : > { %s4651_s17 = scalar_lea.hbm %s6127_s9, 2048  ;;  %p4652_p8 = scmp.lt.s32.totalorder %s5181_s1, %s6127_s9 }
  0xe5   : > { %p4649_p2 = pnand %p4647_p13, %p4956_p7  ;;  %p4653_p9 = scmp.lt.s32.totalorder %s4651_s17, %s4646_s13 }
  0xe7   : > { %p4650_p6 = pneg %p4649_p2  ;;  %p4654_p11 = por %p4653_p9, %p4652_p8 }
  0xe9   : > { %p4655_p0 = pnand %p4654_p11, %p4650_p6 }
  0xeb   : > { %4658 = shalt.err (!%p4655_p0)
}
  0xec   : > { %s4659_s26 = scalar_lea.vmem %s657_s14, 1024  ;;  %s4793_s10 = smov [#allocation14]  }
  0xed   : > { %p4660_p1 = scmp.ne.s32.totalorder %s657_s14, %s4659_s26  ;;  %s4664_s8 = sshll.u32 %s4793_s10, 4  ;;  %s4665_s8 = int_to_ptr.vmem [resolvable:$false] %s4664_s8 }
  0xee   : > { %s4666_s28 = scalar_lea.vmem %s4665_s8, 2048  ;;  %p4667_p10 = scmp.lt.s32.totalorder %s657_s14, %s4665_s8 }
  0xef   : > { %p4662_p3 = pnand %p4660_p1, %p4956_p7  ;;  %p4668_p12 = scmp.lt.s32.totalorder %s4666_s28, %s4659_s26 }
  0xf1   : > { %p4663_p4 = pneg %p4662_p3  ;;  %p4669_p13 = por %p4668_p12, %p4667_p10 }
  0xf3   : > { %p4670_p2 = pnand %p4669_p13, %p4663_p4 }
  0xf5   : > { %4673 = shalt.err (!%p4670_p2)
}
  0xf6   : > { %s6130_s27 = scalar_lea.sflag [#allocation13], %s4928_s18  ;;  %s4674_s11 = scalar_lea.hbm %s5089_s23, 2048 }
  0xf7   : > { %4086 = dma.hbm_to_vmem [thread:$0]  (!%p4944_p5), %s5181_s1, 1024, %s657_s14, %s6130_s27, %s6120_s12, %s6120_s12, %s6119_s7  }
  0xf8   : > { %p4675_p6 = scmp.ne.s32.totalorder %s5089_s23, %s4674_s11  ;;  %s4679_s6 = scalar_lea.hbm %s6114_s15, 4096 }
  0xf9   : > { %p4680_p11 = scmp.lt.s32.totalorder %s5089_s23, %s6114_s15  ;;  %p4681_p0 = scmp.lt.s32.totalorder %s4679_s6, %s4674_s11 }
  0xfa   : > { %p4677_p8 = pnand %p4675_p6, %p4956_p7 }
  0xfb   : > { %p4682_p1 = por %p4681_p0, %p4680_p11 }
  0xfc   : > { %p4678_p9 = pneg %p4677_p8 }
  0xfe   : > { %p4683_p3 = pnand %p4682_p1, %p4678_p9 }
 0x100   : > { %4686 = shalt.err (!%p4683_p3)
}
 0x101   : > { %s4687_s1 = scalar_lea.vmem %s5210_s3, 2048  ;;  %s4794_s14 = smov [#allocation17]  }
 0x102   : > { %p4688_p4 = scmp.ne.s32.totalorder %s5210_s3, %s4687_s1  ;;  %s4692_s24 = sshll.u32 %s4794_s14, 4  ;;  %s4693_s24 = int_to_ptr.vmem [resolvable:$false] %s4692_s24 }
 0x103   : > { %s4694_s17 = scalar_lea.vmem %s4693_s24, 4096  ;;  %p4695_p13 = scmp.lt.s32.totalorder %s5210_s3, %s4693_s24 }
 0x104   : > { %p4690_p10 = pnand %p4688_p4, %p4956_p7  ;;  %p4696_p2 = scmp.lt.s32.totalorder %s4694_s17, %s4687_s1 }
 0x106   : > { %p4691_p12 = pneg %p4690_p10  ;;  %p4697_p6 = por %p4696_p2, %p4695_p13 }
 0x108   : > { %p4698_p8 = pnand %p4697_p6, %p4691_p12 }
 0x10a   : > { %4701 = shalt.err (!%p4698_p8)
}
 0x10b   : > { %s6131_s0 = scalar_lea.sflag [#allocation16], %s4928_s18  ;;  %p6132_p7 = scmp.ne.s32.totalorder %s6116_s21, 0 }
 0x10c   : > { %4092 = dma.hbm_to_vmem [thread:$0]  (!%p4944_p5), %s5089_s23, 2048, %s5210_s3, %s6131_s0, %s6120_s12, %s6120_s12, %s6119_s7  }
 0x10d   : > { %741 = sbr.rel (%p6132_p7) target bundleno = 3292 (0xcdc), region = 88  ;;  %p6133_p9 = scmp.eq.s32.totalorder (!%p6132_p7), %s5097_s22, 0 }
 0x112   : > { %4743 = dma.done.wait (%p6133_p9), [#allocation4], 512   ;;  %p6134_p11 = pmov %p6133_p9 }
 0x113   : > { %s747_s30 = sand.u32 1, %s5097_s22   ;;  %s5267_s20 = sand.u32 1, %s4772_s25  }
 0x114   : > { %4745 = vsyncadd (%p6134_p11), [#allocation4], 4294966784  ;;  %s748_s18 = scalar_lea.sflag [#allocation7], %s747_s30  ;;  %p6135_p0 = scmp.ne.s32.totalorder %s6115_s19, 0 }
 0x116   : > { %4747 = dma.done.wait (%p6135_p0), %s748_s18, 1040  }
 0x117   : > { %4749 = vsyncadd (%p6135_p0), %s748_s18, 4294966256  ;;  %s3629_s23 = sshll.u32 %s5267_s20, 6  ;;  %s765_s7 = scalar_lea.sflag [#allocation10], %s747_s30 }
 0x118   : > { %s5275_s21 = scalar_lea.vmem [#allocation8], %s3629_s23 }
 0x119   : > { %4751 = dma.done.wait (%p6135_p0), %s765_s7, 1040  }
 0x11a   : > { %4753 = vsyncadd (%p6135_p0), %s765_s7, 4294966256  ;;  %s5282_s3 = scalar_lea.vmem [#allocation11], %s3629_s23  ;;  %s782_s26 = scalar_lea.sflag [#allocation13], %s747_s30 }
 0x11b   : > { %s5284_s10 = scalar_lea.vmem [#allocation12], %s3629_s23 }
 0x11c   : > { %4755 = dma.done.wait (%p6135_p0), %s782_s26, 2048  }
 0x11d   : > { %4757 = vsyncadd (%p6135_p0), %s782_s26, 4294965248  ;;  %s3633_s8 = sshll.u32 %s5267_s20, 7  ;;  %s5291_s28 = scalar_lea.vmem [#allocation14], %s3629_s23 }
 0x11e   : > { %s800_s27 = scalar_lea.sflag [#allocation16], %s747_s30  ;;  %s5293_s11 = scalar_lea.vmem [#allocation15], %s3633_s8 }
 0x11f   : > { %4759 = dma.done.wait (%p6135_p0), %s800_s27, 4096  }
 0x120   : > { %4761 = vsyncadd (%p6135_p0), %s800_s27, 4294963200  ;;  %p916_p5 = scmp.lt.s32.totalorder %s5097_s22, 1  ;;  %s6138_s30 = sld [smem:[#allocation37_spill]] }
 0x121   : > { %s6139_s26 = sld [smem:[#allocation39_spill]]  ;;  %s5337_s23 = scalar_lea.vmem [#allocation17], %s3633_s8 }
 0x122   : > { %s5301_s16 = scalar_select %p916_p5, %s5097_s22, 1 }
 0x123   : > { %s6140_s12 = sld [smem:[#allocation40_spill]]  ;;  %p6144_p1 = scmp.ne.s32.totalorder %s5097_s22, 0 }
 0x124   : > { %s6141_s15 = sld [smem:[#allocation41_spill]]  ;;  %s3635_s4 = sshll.u32 %s5301_s16, 1 }
 0x125   : > { %s6142_s19 = sld [smem:[#allocation45_spill]] }
 0x126   : > { %s924_s18 = scalar_lea.vmem %s6138_s30, %s5301_s16  ;;  %s6143_s0 = sld [smem:[#allocation43_spill]] }
 0x127   : > { %s927_s27 = scalar_lea.vmem %s6139_s26, %s5301_s16 }
 0x128   : > { %945 = sbr.rel (%p6144_p1) target bundleno = 304 (0x130), region = 128 }
 0x129   : > { %s930_s29 = scalar_lea.vmem %s6140_s12, %s5301_s16 }
 0x12a   : > { %s933_s13 = scalar_lea.vmem %s6141_s15, %s5301_s16 }
 0x12b   : > { %s940_s14 = scalar_lea.vmem %s6142_s19, %s5301_s16 }
 0x12c   : > { %s5335_s30 = scalar_lea.vmem %s6143_s0, %s3635_s4 }
 0x12d   : > { %v946_v0 = vld [vmem:[#allocation3] sm:$0xff]  ;;  %v947_v1 = vld [vmem:[#allocation3 + $0x8] sm:$0xff]  ;;  %v948_v2 = vld [vmem:[#allocation3 + $0x10] sm:$0xff] }
 0x12e   : > { %950 = vst [vmem:[#allocation2 + $0x10] sm:$0xff] %v946_v0  ;;  %951 = vst [vmem:[#allocation2] sm:$0xff] %v947_v1  ;;  %v949_v3 = vld [vmem:[#allocation3 + $0x18] sm:$0xff] }
 0x12f   : > { %952 = vst [vmem:[#allocation2 + $0x18] sm:$0xff] %v948_v2  ;;  %953 = vst [vmem:[#allocation2 + $0x8] sm:$0xff] %v949_v3 }
 0x130 PF: > { %v4264_v24 = vld [vmem:[%s5275_s21 + $0x38] sm:$0xff]   ;;  %v4266_v26 = vld [vmem:[%s5275_s21 + $0x30] sm:$0xff]   ;;  %v4268_v28 = vld [vmem:[%s5275_s21 + $0x28] sm:$0xff]   ;;  %s6145_s5 = scalar_lea.vmem [#allocation6], %s5267_s20  ;;  %s6146_s25 = sld [smem:[#allocation31_spill]]  ;;  %vm4796_vm0 = vmmov 0  }
 0x131   : > { %v4265_v25 = vld [vmem:[%s5282_s3 + $0x38] sm:$0xff]   ;;  %3864 = vmatprep.subr.bf16.mxu0 %v4264_v24  ;;  %v4267_v27 = vld [vmem:[%s5282_s3 + $0x30] sm:$0xff]   ;;  %v4269_v29 = vld [vmem:[%s5282_s3 + $0x28] sm:$0xff]   ;;  %s6148_s12 = scalar_lea.vmem [#allocation9], %s5267_s20  ;;  %s6149_s8 = sld [smem:[#allocation35_spill]]  ;;  %vm1623_vm1 = vcmask 261120  }
 0x132   : > { %3865 = vmatpush3.bf16.msra.mxu0 %v4264_v24  ;;  %3884 = vmatprep.subr.bf16.mxu1 %v4265_v25  ;;  %v4270_v30 = vld [vmem:[%s5275_s21 + $0x20] sm:$0xff]   ;;  %v4272_v32 = vld [vmem:[%s5275_s21 + $0x18] sm:$0xff]   ;;  %v4274_v34 = vld [vmem:[%s5275_s21 + $0x10] sm:$0xff]   ;;  %s4797_s20 = smov 96   ;;  %s4798_s24 = smov 32   ;;  %vm2000_vm2 = vcmask 130048  }
 0x133   : > { %3885 = vmatpush3.bf16.msra.mxu1 %v4265_v25  ;;  %3866 = vmatprep.subr.bf16.mxu0 %v4266_v26  ;;  %v4271_v31 = vld [vmem:[%s5282_s3 + $0x20] sm:$0xff]   ;;  %v4273_v33 = vld [vmem:[%s5282_s3 + $0x18] sm:$0xff]   ;;  %v4275_v35 = vld [vmem:[%s5282_s3 + $0x10] sm:$0xff]   ;;  %s4799_s7 = smov 64   ;;  %vm2563_vm3 = vcmask 523264   ;;  %vm2566_vm4 = vcmask 785408  }
 0x134   : > { %3886 = vmatprep.subr.bf16.mxu1 %v4267_v27  ;;  %v4276_v36 = vld [vmem:[%s5275_s21 + $0x8] sm:$0xff]   ;;  %v4278_v38 = vld [vmem:[%s5275_s21] sm:$0xff]   ;;  %v3642_v55 = vld [vmem:[%s6145_s5] ss:$0 sm:$0xff]  ;;  %p4096_p3 = scmp.eq.s32.totalorder %s5097_s22, 1 }
 0x135   : > { %v954_v4 = vld [vmem:[#allocation2 + $0x10] sm:$0xff]  ;;  %v955_v6 = vld [vmem:[#allocation2] sm:$0xff] }
 0x136   : > { %v956_v5 = vld [vmem:[#allocation2 + $0x18] sm:$0xff]  ;;  %1121 = vadd.xlane.f32.xlu0 %v954_v4  ;;  %v957_v7 = vld [vmem:[#allocation2 + $0x8] sm:$0xff]  ;;  %3867 = vmatpush3.bf16.msra.mxu0 %v4266_v26  ;;  %s6147_s21 = scalar_lea.vmem %s6146_s25, %s5301_s16 }
 0x137   : > { %1125 = vadd.xlane.f32.xlu1 %v956_v5  ;;  %3887 = vmatpush3.bf16.msra.mxu1 %v4267_v27  ;;  %v4277_v37 = vld [vmem:[%s5282_s3 + $0x8] sm:$0xff]   ;;  %v4279_v39 = vld [vmem:[%s5282_s3] sm:$0xff]   ;;  %v4280_v40 = vld [vmem:[%s5284_s10 + $0x38] sm:$0xff]   ;;  %s6150_s4 = scalar_lea.vmem %s6149_s8, %s5301_s16 }
 0x138   : > { %3868 = vmatprep.subr.bf16.mxu0 %v4268_v28  ;;  %3888 = vmatprep.subr.bf16.mxu1 %v4269_v29  ;;  %v3643_v60 = vld [vmem:[%s6147_s21] ss:$0 sm:$0xff] }
 0x139   : > { %v3638_v25 = vld [vmem:[%s6150_s4] ss:$0 sm:$0xff] }
 0x13a   : > { %1123 = vadd.xlane.f32.xlu0 %v955_v6  ;;  %3869 = vmatpush3.bf16.msra.mxu0 %v4268_v28 }
 0x13b   : > { %1127 = vadd.xlane.f32.xlu1 %v957_v7  ;;  %3889 = vmatpush3.bf16.msra.mxu1 %v4269_v29 }
 0x13c   : > { %3870 = vmatprep.subr.bf16.mxu0 %v4270_v30  ;;  %3890 = vmatprep.subr.bf16.mxu1 %v4271_v31 }
 0x13e   : > { %3871 = vmatpush3.bf16.msra.mxu0 %v4270_v30 }
 0x13f   : > { %3891 = vmatpush3.bf16.msra.mxu1 %v4271_v31  ;;  %3872 = vmatprep.subr.bf16.mxu0 %v4272_v32 }
 0x140   : > { %3892 = vmatprep.subr.bf16.mxu1 %v4273_v33 }
 0x142   : > { %3873 = vmatpush3.bf16.msra.mxu0 %v4272_v32 }
 0x143   : > { %3893 = vmatpush3.bf16.msra.mxu1 %v4273_v33  ;;  %3874 = vmatprep.subr.bf16.mxu0 %v4274_v34 }
 0x144   : > { %3894 = vmatprep.subr.bf16.mxu1 %v4275_v35 }
 0x146   : > { %3875 = vmatpush3.bf16.msra.mxu0 %v4274_v34 }
 0x147   : > { %3895 = vmatpush3.bf16.msra.mxu1 %v4275_v35  ;;  %3876 = vmatprep.subr.bf16.mxu0 %v4276_v36 }
 0x148   : > { %3896 = vmatprep.subr.bf16.mxu1 %v4277_v37 }
 0x14a   : > { %3877 = vmatpush3.bf16.msra.mxu0 %v4276_v36 }
 0x14b   : > { %3897 = vmatpush3.bf16.msra.mxu1 %v4277_v37  ;;  %3878 = vmatprep.subr.bf16.mxu0 %v4278_v38 }
 0x14c   : > { %3898 = vmatprep.subr.bf16.mxu1 %v4279_v39 }
 0x14e   : > { %3879 = vmatpush3.bf16.msra.mxu0 %v4278_v38 }
 0x14f   : > { %3899 = vmatpush3.bf16.msra.mxu1 %v4279_v39  ;;  %3904 = vmatprep.subr.bf16.mxu0 %v4280_v40 }
 0x1bf   : > { %v1122_v8 = vpop.xlane.xlu0 %1121 }
 0x1c0   : > { %v1126_v9 = vpop.xlane.xlu1 %1125  ;;  %v1130_v10 = vmul.f32 0.0078125, %v1122_v8 }
 0x1c1   : > { %v1132_v11 = vmul.f32 0.0078125, %v1126_v9  ;;  %v4281_v9 = vld [vmem:[%s5284_s10 + $0x30] sm:$0xff]  }
 0x1c2   : > { %v5341_v12 = vsub.f32 %v954_v4, %v1130_v10  ;;  %v4282_v10 = vld [vmem:[%s5284_s10 + $0x28] sm:$0xff]  }
 0x1c3   : > { %v5343_v13 = vsub.f32 %v956_v5, %v1132_v11  ;;  %v1124_v14 = vpop.xlane.xlu0 %1123  ;;  %v4283_v11 = vld [vmem:[%s5284_s10 + $0x20] sm:$0xff]  }
 0x1c4   : > { %v1128_v15 = vpop.xlane.xlu1 %1127  ;;  %v1131_v16 = vmul.f32 0.0078125, %v1124_v14  ;;  %v1138_v17 = vmul.f32 %v5341_v12, %v5341_v12  ;;  %v4286_v14 = vld [vmem:[%s5284_s10 + $0x8] sm:$0xff]  }
 0x1c5   : > { %v1133_v18 = vmul.f32 0.0078125, %v1128_v15  ;;  %v1140_v21 = vmul.f32 %v5343_v13, %v5343_v13  ;;  %v4287_v15 = vld [vmem:[%s5284_s10] sm:$0xff]  }
 0x1c6   : > { %v5347_v19 = vsub.f32 %v955_v6, %v1131_v16  ;;  %1142 = vadd.xlane.f32.xlu0 %v1138_v17  ;;  %v4795_v16 = vmov 0.0  }
 0x1c7   : > { %v5349_v20 = vsub.f32 %v957_v7, %v1133_v18  ;;  %3924 = vmatprep.subr.bf16.mxu1 %v4795_v16 }
 0x1c8   : > { %v1139_v22 = vmul.f32 %v5347_v19, %v5347_v19 }
 0x1c9   : > { %v1141_v23 = vmul.f32 %v5349_v20, %v5349_v20 }
 0x1ca   : > { %1146 = vadd.xlane.f32.xlu0 %v1140_v21  ;;  %1144 = vadd.xlane.f32.xlu1 %v1139_v22 }
 0x1ce   : > { %1148 = vadd.xlane.f32.xlu1 %v1141_v23 }
 0x24f   : > { %v1143_v41 = vpop.xlane.xlu0 %1142 }
 0x250   : > { %v1150_v42 = vmul.f32 0.0078125, %v1143_v41 }
 0x252   : > { %v1154_v43 = vadd.f32 1e-06, %v1150_v42 }
 0x253   : > { %v1145_v44 = vpop.xlane.xlu1 %1144  ;;  %v1147_v45 = vpop.xlane.xlu0 %1146 }
 0x254   : > { %4336 = vrsqrt.f32 %v1154_v43  ;;  %v1151_v46 = vmul.f32 0.0078125, %v1145_v44  ;;  %v1152_v47 = vmul.f32 0.0078125, %v1147_v45  ;;  %v3639_v44 = vld [vmem:[%s924_s18] ss:$0 sm:$0xff] }
 0x256   : > { %v1155_v48 = vadd.f32 1e-06, %v1151_v46  ;;  %v1156_v49 = vadd.f32 1e-06, %v1152_v47 }
 0x257   : > { %v1149_v50 = vpop.xlane.xlu1 %1148 }
 0x258   : > { %4338 = vrsqrt.f32 %v1155_v48  ;;  %v1153_v51 = vmul.f32 0.0078125, %v1149_v50 }
 0x259   : > { %4340 = vrsqrt.f32 %v1156_v49 }
 0x25a   : > { %v1157_v52 = vadd.f32 1e-06, %v1153_v51 }
 0x25c   : > { %4342 = vrsqrt.f32 %v1157_v52 }
 0x261   : > { %v4337_v53 = vpop.eup %4336 }
 0x262   : > { %v1162_v54 = vmul.f32 %v4337_v53, %v5341_v12  ;;  %v4284_v12 = vld [vmem:[%s5284_s10 + $0x18] sm:$0xff]  }
 0x264   : > { %v1172_v59 = vmul.f32 %v3642_v55, %v1162_v54 }
 0x265   : > { %v4339_v56 = vpop.eup %4338 }
 0x266   : > { %v4341_v57 = vpop.eup %4340  ;;  %v1163_v58 = vmul.f32 %v4339_v56, %v5347_v19  ;;  %v1182_v0 = vadd.f32 %v3643_v60, %v1172_v59  ;;  %v3637_v19 = vld [vmem:[%s6148_s12] ss:$0 sm:$0xff] }
 0x267   : > { %v1164_v61 = vmul.f32 %v4341_v57, %v5343_v13  ;;  %v4285_v13 = vld [vmem:[%s5284_s10 + $0x10] sm:$0xff]  }
 0x268   : > { %v1173_v62 = vmul.f32 %v3642_v55, %v1163_v58 }
 0x269   : > { %v4343_v63 = vpop.eup %4342  ;;  %v1174_v3 = vmul.f32 %v3642_v55, %v1164_v61 }
 0x26a   : > { %v1183_v1 = vadd.f32 %v3643_v60, %v1173_v62  ;;  %v1165_v2 = vmul.f32 %v4343_v63, %v5349_v20 }
 0x26b   : > { %v1184_v6 = vadd.f32 %v3643_v60, %v1174_v3 }
 0x26c   : > { %v1186_v4 = vpack.c.bf16 %v1183_v1, %v1182_v0  ;;  %v1175_v5 = vmul.f32 %v3642_v55, %v1165_v2 }
 0x26e   : > { %3880 = vmatprep.mubr.bf16.mxu0 %v1186_v4  ;;  %3900 = vmatprep.mubr.bf16.mxu1 %v1186_v4  ;;  %v1185_v7 = vadd.f32 %v3643_v60, %v1175_v5 }
 0x270   : > { %v1187_v8 = vpack.c.bf16 %v1185_v7, %v1184_v6 }
 0x272   : > { %3881 = vmatmul.mubr.bf16.vlgmr.msra.gmra.mxu0 %v1187_v8  ;;  %3901 = vmatmul.mubr.bf16.vlgmr.msra.gmra.mxu1 %v1187_v8 }
 0x273   : > { %3905 = vmatpush3.bf16.msra.mxu0 %v4280_v40  ;;  %3920 = vmatprep.mubr.bf16.mxu0 %v1186_v4 }
 0x274   : > { %3906 = vmatprep.subr.bf16.mxu0 %v4281_v9  ;;  %3926 = vmatprep.mubr.msk.bf16.mxu1 %vm4796_vm0, %v4795_v16 }
 0x277   : > { %3907 = vmatpush3.bf16.msra.mxu0 %v4281_v9 }
 0x278   : > { %3908 = vmatprep.subr.bf16.mxu0 %v4282_v10 }
 0x27b   : > { %3909 = vmatpush3.bf16.msra.mxu0 %v4282_v10 }
 0x27c   : > { %3910 = vmatprep.subr.bf16.mxu0 %v4283_v11 }
 0x27f   : > { %3911 = vmatpush3.bf16.msra.mxu0 %v4283_v11 }
 0x280   : > { %3912 = vmatprep.subr.bf16.mxu0 %v4284_v12 }
 0x283   : > { %3913 = vmatpush3.bf16.msra.mxu0 %v4284_v12 }
 0x284   : > { %3914 = vmatprep.subr.bf16.mxu0 %v4285_v13 }
 0x287   : > { %3915 = vmatpush3.bf16.msra.mxu0 %v4285_v13 }
 0x288   : > { %3916 = vmatprep.subr.bf16.mxu0 %v4286_v14 }
 0x28b   : > { %3917 = vmatpush3.bf16.msra.mxu0 %v4286_v14 }
 0x28c   : > { %3918 = vmatprep.subr.bf16.mxu0 %v4287_v15 }
 0x28f   : > { %3919 = vmatpush3.bf16.msra.mxu0 %v4287_v15 }
 0x290   : > { %3972 = vmatprep.subr.bf16.mxu0 %v4795_v16 }
 0x292   : > { %3921 = vmatmul.mubr.bf16.vlgmr.msra.gmra.mxu0 %v1187_v8 }
 0x293   : > { %3974 = vmatprep.mubr.msk.bf16.mxu0 %vm4796_vm0, %v4795_v16 }
 0x332   : > { %v3882_v17 = vpop.f32.mrf.mxu0  ;;  %v3902_v18 = vpop.f32.mrf.mxu1 }
 0x333   : > { %v5400_v24 = vadd.f32 %v3882_v17, %v3637_v19  ;;  %v5413_v35 = vadd.f32 %v3902_v18, %v3638_v25 }
 0x334   : > { %v1270_v20 = vpop.f32.mrf.mxu0  ;;  %v1367_v21 = vpop.f32.mrf.mxu1 }
 0x335   : > { %v1271_v27 = vadd.f32 %v3637_v19, %v1270_v20  ;;  %v1368_v28 = vadd.f32 %v3638_v25, %v1367_v21 }
 0x336   : > { %v3883_v22 = vpop.f32.mrf.mxu0  ;;  %v3903_v23 = vpop.f32.mrf.mxu1 }
 0x337   : > { %v5407_v26 = vadd.f32 %v3883_v22, %v3637_v19  ;;  %v5411_v32 = vadd.f32 %v3903_v23, %v3638_v25 }
 0x338   : > { %v1273_v29 = vpop.f32.mrf.mxu0  ;;  %v1370_v30 = vpop.f32.mrf.mxu1 }
 0x339   : > { %v1523_v31 = vpack.c.bf16 %v5407_v26, %v5400_v24  ;;  %v1274_v33 = vadd.f32 %v3637_v19, %v1273_v29  ;;  %v1371_v34 = vadd.f32 %v3638_v25, %v1370_v30  ;;  %v1571_v40 = vpack.c.bf16 %v5411_v32, %v5413_v35 }
 0x33a   : > { %v4174_v41 = vpack.i.bf16 %v5411_v32, %v5413_v35  ;;  %v4179_v43 = vpack.i.bf16 %v5407_v26, %v5400_v24 }
 0x33b   : > { %v4144_v36 = vpack.i.bf16 %v1371_v34, %v1368_v28  ;;  %v4149_v37 = vpack.i.bf16 %v1274_v33, %v1271_v27  ;;  %v1567_v38 = vpack.c.bf16 %v1371_v34, %v1368_v28  ;;  %v1519_v42 = vpack.c.bf16 %v1274_v33, %v1271_v27 }
 0x33c   : > { %v1816_v25 = vsel %vm1623_vm1, %v1571_v40, 0 }
 0x33d   : > { %4145 = vrot.lane.b32.xlu0 %v4144_v36, %s4797_s20  ;;  %4150 = vrot.lane.b32.xlu1 %v4149_v37, %s4797_s20  ;;  %v1628_v39 = vsel %vm1623_vm1, %v1567_v38, 0 }
 0x33e   : > { %3925 = vmatpush3.bf16.xpose.msra.mxu1 %v1628_v39 }
 0x33f   : > { %3930 = vmatprep.subr.bf16.mxu1 %v4795_v16 }
 0x341   : > { %4165 = vrot.lane.b32.xlu0 %v4144_v36, %s4798_s24  ;;  %4155 = vrot.lane.b32.xlu1 %v4144_v36, %s4799_s7 }
 0x345   : > { %4175 = vrot.lane.b32.xlu0 %v4174_v41, %s4797_s20  ;;  %4160 = vrot.lane.b32.xlu1 %v4149_v37, %s4799_s7 }
 0x346   : > { %3927 = vmatmul.mubr.msk.bf16.vlgmr.msra.gmra.mxu1 %vm1623_vm1, %v1519_v42 }
 0x347   : > { %3932 = vmatprep.mubr.msk.bf16.mxu1 %vm4796_vm0, %v4795_v16 }
 0x349   : > { %4185 = vrot.lane.b32.xlu0 %v4174_v41, %s4799_s7  ;;  %4170 = vrot.lane.b32.xlu1 %v4149_v37, %s4798_s24 }
 0x34d   : > { %4195 = vrot.lane.b32.xlu0 %v4174_v41, %s4798_s24  ;;  %4180 = vrot.lane.b32.xlu1 %v4179_v43, %s4797_s20 }
 0x351   : > { %4190 = vrot.lane.b32.xlu1 %v4179_v43, %s4799_s7 }
 0x352   : > { %v3922_v45 = vpop.f32.mrf.mxu0 }
 0x353   : > { %v5442_v46 = vadd.f32 %v3922_v45, %v3639_v44 }
 0x354   : > { %v1464_v47 = vpop.f32.mrf.mxu0 }
 0x355   : > { %4200 = vrot.lane.b32.xlu1 %v4179_v43, %s4798_s24  ;;  %v1465_v50 = vadd.f32 %v3639_v44, %v1464_v47 }
 0x356   : > { %v3923_v48 = vpop.f32.mrf.mxu0 }
 0x357   : > { %v5445_v49 = vadd.f32 %v3923_v48, %v3639_v44 }
 0x358   : > { %v1467_v51 = vpop.f32.mrf.mxu0 }
 0x359   : > { %v1468_v52 = vadd.f32 %v3639_v44, %v1467_v51  ;;  %v5449_v53 = vpack.i.bf16 %v5445_v49, %v5442_v46  ;;  %v1619_v54 = vpack.c.bf16 %v5445_v49, %v5442_v46 }
 0x35b   : > { %v1615_v55 = vpack.c.bf16 %v1468_v52, %v1465_v50  ;;  %v5453_v56 = vpack.i.bf16 %v1468_v52, %v1465_v50 }
 0x35d   : > { %3973 = vmatpush3.bf16.msra.mxu0 %v1615_v55 }
 0x35e   : > { %3984 = vmatprep.subr.bf16.mxu0 %v4795_v16 }
 0x3af   : > { %v4146_v57 = vpop.permute.xlu0 %4145  ;;  %v4151_v58 = vpop.permute.xlu1 %4150 }
 0x3b0   : > { %v4148_v59 = vunpack.i.h.bf16 %v4146_v57  ;;  %v4147_v60 = vunpack.i.l.bf16 %v4146_v57  ;;  %v4153_v2 = vunpack.i.h.bf16 %v4151_v58  ;;  %v4152_v3 = vunpack.i.l.bf16 %v4151_v58 }
 0x3b2   : > { %v1568_v61 = vpack.c.bf16 %v4148_v59, %v4147_v60  ;;  %v1520_v6 = vpack.c.bf16 %v4153_v2, %v4152_v3 }
 0x3b3   : > { %v4156_v62 = vpop.permute.xlu1 %4155  ;;  %v4166_v5 = vpop.permute.xlu0 %4165 }
 0x3b4   : > { %v4158_v63 = vunpack.i.h.bf16 %v4156_v62  ;;  %v4157_v0 = vunpack.i.l.bf16 %v4156_v62  ;;  %v1675_v1 = vsel %vm1623_vm1, %v1568_v61, 0  ;;  %v4168_v8 = vunpack.i.h.bf16 %v4166_v5 }
 0x3b5   : > { %3931 = vmatpush3.bf16.xpose.msra.mxu1 %v1675_v1  ;;  %v4167_v9 = vunpack.i.l.bf16 %v4166_v5 }
 0x3b6   : > { %3936 = vmatprep.subr.bf16.mxu1 %v4795_v16  ;;  %v1569_v4 = vpack.c.bf16 %v4158_v63, %v4157_v0 }
 0x3b7   : > { %v4161_v7 = vpop.permute.xlu1 %4160  ;;  %v1570_v13 = vpack.c.bf16 %v4168_v8, %v4167_v9  ;;  %v4176_v20 = vpop.permute.xlu0 %4175 }
 0x3b8   : > { %v1722_v10 = vsel %vm1623_vm1, %v1569_v4, 0  ;;  %v4163_v11 = vunpack.i.h.bf16 %v4161_v7  ;;  %v4162_v12 = vunpack.i.l.bf16 %v4161_v7  ;;  %v4178_v22 = vunpack.i.h.bf16 %v4176_v20 }
 0x3b9   : > { %v1769_v17 = vsel %vm1623_vm1, %v1570_v13, 0  ;;  %v4177_v23 = vunpack.i.l.bf16 %v4176_v20 }
 0x3ba   : > { %v1521_v14 = vpack.c.bf16 %v4163_v11, %v4162_v12 }
 0x3bb   : > { %v4171_v15 = vpop.permute.xlu1 %4170  ;;  %v1572_v27 = vpack.c.bf16 %v4178_v22, %v4177_v23  ;;  %v4186_v28 = vpop.permute.xlu0 %4185 }
 0x3bc   : > { %3933 = vmatmul.mubr.msk.bf16.vlgmr.msra.gmra.mxu1 %vm1623_vm1, %v1520_v6  ;;  %v4173_v18 = vunpack.i.h.bf16 %v4171_v15  ;;  %v4172_v19 = vunpack.i.l.bf16 %v4171_v15  ;;  %v4188_v30 = vunpack.i.h.bf16 %v4186_v28  ;;  %v4187_v33 = vunpack.i.l.bf16 %v4186_v28 }
 0x3bd   : > { %3937 = vmatpush3.bf16.xpose.msra.mxu1 %v1722_v10  ;;  %3938 = vmatprep.mubr.msk.bf16.mxu1 %vm4796_vm0, %v4795_v16  ;;  %v1863_v32 = vsel %vm1623_vm1, %v1572_v27, 0 }
 0x3be   : > { %3942 = vmatprep.subr.bf16.mxu1 %v4795_v16  ;;  %v1522_v21 = vpack.c.bf16 %v4173_v18, %v4172_v19  ;;  %v1573_v36 = vpack.c.bf16 %v4188_v30, %v4187_v33 }
 0x3bf   : > { %v4181_v29 = vpop.permute.xlu1 %4180  ;;  %v4196_v37 = vpop.permute.xlu0 %4195 }
 0x3c0   : > { %v4183_v34 = vunpack.i.h.bf16 %v4181_v29  ;;  %v4182_v35 = vunpack.i.l.bf16 %v4181_v29  ;;  %v4198_v40 = vunpack.i.h.bf16 %v4196_v37  ;;  %v4197_v41 = vunpack.i.l.bf16 %v4196_v37 }
 0x3c1   : > { %v1910_v24 = vsel %vm1623_vm1, %v1573_v36, 0 }
 0x3c2   : > { %v1524_v38 = vpack.c.bf16 %v4183_v34, %v4182_v35  ;;  %v1574_v42 = vpack.c.bf16 %v4198_v40, %v4197_v41 }
 0x3c3   : > { %v4191_v39 = vpop.permute.xlu1 %4190 }
 0x3c4   : > { %3939 = vmatmul.mubr.msk.bf16.vlgmr.msra.gmra.mxu1 %vm1623_vm1, %v1521_v14  ;;  %v4193_v26 = vunpack.i.h.bf16 %v4191_v39  ;;  %v1957_v45 = vsel %vm1623_vm1, %v1574_v42, 0 }
 0x3c5   : > { %3943 = vmatpush3.bf16.xpose.msra.mxu1 %v1769_v17  ;;  %3944 = vmatprep.mubr.msk.bf16.mxu1 %vm4796_vm0, %v4795_v16 }
 0x3c6   : > { %3948 = vmatprep.subr.bf16.mxu1 %v4795_v16 }
 0x3c7   : > { %v4201_v44 = vpop.permute.xlu1 %4200 }
 0x3c8   : > { %v4203_v47 = vunpack.i.h.bf16 %v4201_v44  ;;  %v4202_v48 = vunpack.i.l.bf16 %v4201_v44 }
 0x3ca   : > { %v1526_v50 = vpack.c.bf16 %v4203_v47, %v4202_v48 }
 0x3cc   : > { %3945 = vmatmul.mubr.msk.bf16.vlgmr.msra.gmra.mxu1 %vm1623_vm1, %v1522_v21 }
 0x3cd   : > { %3949 = vmatpush3.bf16.xpose.msra.mxu1 %v1816_v25  ;;  %3950 = vmatprep.mubr.msk.bf16.mxu1 %vm4796_vm0, %v4795_v16 }
 0x3ce   : > { %3954 = vmatprep.subr.bf16.mxu1 %v4795_v16 }
 0x3d4   : > { %3951 = vmatmul.mubr.msk.bf16.vlgmr.msra.gmra.mxu1 %vm1623_vm1, %v1523_v31  ;;  %v4192_v31 = vunpack.i.l.bf16 %v4191_v39 }
 0x3d5   : > { %3955 = vmatpush3.bf16.xpose.msra.mxu1 %v1863_v32  ;;  %3956 = vmatprep.mubr.msk.bf16.mxu1 %vm4796_vm0, %v4795_v16 }
 0x3d6   : > { %3960 = vmatprep.subr.bf16.mxu1 %v4795_v16  ;;  %v1525_v43 = vpack.c.bf16 %v4193_v26, %v4192_v31 }
 0x3dc   : > { %3957 = vmatmul.mubr.msk.bf16.vlgmr.msra.gmra.mxu1 %vm1623_vm1, %v1524_v38 }
 0x3dd   : > { %3961 = vmatpush3.bf16.xpose.msra.mxu1 %v1910_v24  ;;  %3962 = vmatprep.mubr.msk.bf16.mxu1 %vm4796_vm0, %v4795_v16 }
 0x3de   : > { %3966 = vmatprep.subr.bf16.mxu1 %v4795_v16 }
 0x3e4   : > { %3963 = vmatmul.mubr.msk.bf16.vlgmr.msra.gmra.mxu1 %vm1623_vm1, %v1525_v43 }
 0x3e5   : > { %3967 = vmatpush3.bf16.xpose.msra.mxu1 %v1957_v45  ;;  %3968 = vmatprep.mubr.msk.bf16.mxu1 %vm4796_vm0, %v4795_v16 }
 0x3e6   : > { %3978 = vmatprep.subr.bf16.mxu1 %v4795_v16 }
 0x3ec   : > { %3969 = vmatmul.mubr.msk.bf16.vlgmr.msra.gmra.mxu1 %vm1623_vm1, %v1526_v50 }
 0x3ed   : > { %3980 = vmatprep.mubr.msk.bf16.mxu1 %vm4796_vm0, %v4795_v16 }
 0x406   : > { %v1664_v51 = vpop.f32.mrf.mxu1 }
 0x407   : > { %v2001_v52 = vsel %vm2000_vm2, %v1664_v51, -inf }
 0x408   : > { %2002 = vmax.xlane.f32.xlu0 %v2001_v52  ;;  %v3928_v55 = vpop.f32.mrf.mxu1 }
 0x40a   : > { %v1667_v57 = vpop.f32.mrf.mxu1 }
 0x40b   : > { %v2004_v58 = vsel %vm2000_vm2, %v1667_v57, -inf }
 0x40c   : > { %2005 = vmax.xlane.f32.xlu1 %v2004_v58  ;;  %v3929_v59 = vpop.f32.mrf.mxu1 }
 0x47c   : > { %v5499_v60 = vpop.f32.mrf.mxu1 }
 0x47d   : > { %v2007_v61 = vsel %vm2000_vm2, %v5499_v60, -inf }
 0x47e   : > { %2008 = vmax.xlane.f32.xlu0 %v2007_v61  ;;  %v3934_v62 = vpop.f32.mrf.mxu1 }
 0x480   : > { %v5503_v63 = vpop.f32.mrf.mxu1 }
 0x481   : > { %v2010_v0 = vsel %vm2000_vm2, %v5503_v63, -inf }
 0x482   : > { %2011 = vmax.xlane.f32.xlu0 %v2010_v0  ;;  %v3935_v1 = vpop.f32.mrf.mxu1 }
 0x484   : > { %v5507_v2 = vpop.f32.mrf.mxu1 }
 0x485   : > { %v2013_v3 = vsel %vm2000_vm2, %v5507_v2, -inf }
 0x486   : > { %2014 = vmax.xlane.f32.xlu0 %v2013_v3  ;;  %v3940_v4 = vpop.f32.mrf.mxu1 }
 0x488   : > { %v5511_v5 = vpop.f32.mrf.mxu1 }
 0x489   : > { %v2016_v6 = vsel %vm2000_vm2, %v5511_v5, -inf }
 0x48a   : > { %2017 = vmax.xlane.f32.xlu1 %v2016_v6  ;;  %v3941_v7 = vpop.f32.mrf.mxu1 }
 0x48c   : > { %v5515_v8 = vpop.f32.mrf.mxu1 }
 0x48d   : > { %v2019_v9 = vsel %vm2000_vm2, %v5515_v8, -inf }
 0x48e   : > { %2020 = vmax.xlane.f32.xlu0 %v2019_v9  ;;  %v3946_v10 = vpop.f32.mrf.mxu1 }
 0x490   : > { %v5519_v11 = vpop.f32.mrf.mxu1 }
 0x491   : > { %v2022_v12 = vsel %vm2000_vm2, %v5519_v11, -inf  ;;  %v2003_v19 = vpop.xlane.xlu0 %2002 }
 0x492   : > { %2023 = vmax.xlane.f32.xlu1 %v2022_v12  ;;  %v3947_v13 = vpop.f32.mrf.mxu1  ;;  %v2049_v22 = vsub.f32 %v1664_v51, %v2003_v19 }
 0x494   : > { %v5523_v15 = vpop.f32.mrf.mxu1  ;;  %v2065_v29 = vmul.f32 1.442695, %v2049_v22 }
 0x495   : > { %v2006_v14 = vpop.xlane.xlu1 %2005  ;;  %v2025_v18 = vsel %vm2000_vm2, %v5523_v15, -inf }
 0x496   : > { %v2050_v17 = vsub.f32 %v1667_v57, %v2006_v14  ;;  %2026 = vmax.xlane.f32.xlu0 %v2025_v18  ;;  %v3952_v20 = vpop.f32.mrf.mxu1 }
 0x498   : > { %v5527_v21 = vpop.f32.mrf.mxu1  ;;  %v2067_v23 = vmul.f32 1.442695, %v2050_v17 }
 0x499   : > { %v2028_v25 = vsel %vm2000_vm2, %v5527_v21, -inf }
 0x49a   : > { %2029 = vmax.xlane.f32.xlu1 %v2028_v25  ;;  %v3953_v27 = vpop.f32.mrf.mxu1  ;;  %4344 = vpow2.f32 %v2067_v23 }
 0x49b   : > { %4346 = vpow2.f32 %v2065_v29 }
 0x49c   : > { %v5531_v28 = vpop.f32.mrf.mxu1 }
 0x49d   : > { %v2031_v30 = vsel %vm2000_vm2, %v5531_v28, -inf }
 0x49e   : > { %2032 = vmax.xlane.f32.xlu0 %v2031_v30  ;;  %v3958_v33 = vpop.f32.mrf.mxu1 }
 0x4a0   : > { %v5535_v32 = vpop.f32.mrf.mxu1 }
 0x4a1   : > { %v2034_v34 = vsel %vm2000_vm2, %v5535_v32, -inf }
 0x4a2   : > { %2035 = vmax.xlane.f32.xlu1 %v2034_v34  ;;  %v3959_v35 = vpop.f32.mrf.mxu1 }
 0x4a4   : > { %v5539_v36 = vpop.f32.mrf.mxu1 }
 0x4a5   : > { %v2037_v37 = vsel %vm2000_vm2, %v5539_v36, -inf }
 0x4a6   : > { %2038 = vmax.xlane.f32.xlu0 %v2037_v37  ;;  %v3964_v38 = vpop.f32.mrf.mxu1 }
 0x4a7   : > { %v5547_v41 = vpop.eup %4344 }
 0x4a8   : > { %v5543_v39 = vpop.f32.mrf.mxu1  ;;  %v2100_v31 = vsel %vm2000_vm2, %v5547_v41, 0.0  ;;  %v5555_v43 = vpop.eup %4346 }
 0x4a9   : > { %v2040_v40 = vsel %vm2000_vm2, %v5543_v39, -inf  ;;  %v2097_v47 = vsel %vm2000_vm2, %v5555_v43, 0.0 }
 0x4aa   : > { %2041 = vmax.xlane.f32.xlu1 %v2040_v40  ;;  %v3965_v24 = vpop.f32.mrf.mxu1 }
 0x4ac   : > { %v5549_v26 = vpop.f32.mrf.mxu1 }
 0x4ad   : > { %v2043_v42 = vsel %vm2000_vm2, %v5549_v26, -inf }
 0x4ae   : > { %2101 = vadd.xlane.f32.xlu1 %v2100_v31  ;;  %2044 = vmax.xlane.f32.xlu0 %v2043_v42  ;;  %v3970_v44 = vpop.f32.mrf.mxu1 }
 0x4b0   : > { %v5557_v45 = vpop.f32.mrf.mxu1 }
 0x4b1   : > { %v2046_v50 = vsel %vm2000_vm2, %v5557_v45, -inf }
 0x4b2   : > { %2098 = vadd.xlane.f32.xlu0 %v2097_v47  ;;  %v3971_v48 = vpop.f32.mrf.mxu1 }
 0x4bf   : > { %4210 = vrot.lane.b32.xlu1 %v5453_v56, %s4799_s7 }
 0x4c8   : > { %4205 = vrot.lane.b32.xlu0 %v5453_v56, %s4797_s20 }
 0x4e3   : > { %2047 = vmax.xlane.f32.xlu1 %v2046_v50 }
 0x4f4   : > { %4215 = vrot.lane.b32.xlu1 %v5453_v56, %s4798_s24 }
 0x4f8   : > { %4220 = vrot.lane.b32.xlu1 %v5449_v53, %s4797_s20 }
 0x507   : > { %v2009_v51 = vpop.xlane.xlu0 %2008 }
 0x508   : > { %v2051_v52 = vsub.f32 %v5499_v60, %v2009_v51 }
 0x50a   : > { %v2069_v55 = vmul.f32 1.442695, %v2051_v52 }
 0x50b   : > { %v2012_v57 = vpop.xlane.xlu0 %2011 }
 0x50c   : > { %4348 = vpow2.f32 %v2069_v55  ;;  %v2052_v58 = vsub.f32 %v5503_v63, %v2012_v57 }
 0x50e   : > { %v2071_v59 = vmul.f32 1.442695, %v2052_v58 }
 0x50f   : > { %v2015_v61 = vpop.xlane.xlu0 %2014 }
 0x510   : > { %4350 = vpow2.f32 %v2071_v59  ;;  %v2053_v62 = vsub.f32 %v5507_v2, %v2015_v61 }
 0x512   : > { %v2073_v0 = vmul.f32 1.442695, %v2053_v62 }
 0x513   : > { %v2018_v1 = vpop.xlane.xlu1 %2017 }
 0x514   : > { %4352 = vpow2.f32 %v2073_v0  ;;  %v2054_v56 = vsub.f32 %v5511_v5, %v2018_v1 }
 0x516   : > { %v2075_v3 = vmul.f32 1.442695, %v2054_v56 }
 0x517   : > { %v2021_v4 = vpop.xlane.xlu0 %2020 }
 0x518   : > { %4354 = vpow2.f32 %v2075_v3  ;;  %v2055_v60 = vsub.f32 %v5515_v8, %v2021_v4 }
 0x519   : > { %v5576_v6 = vpop.eup %4348 }
 0x51a   : > { %v2077_v7 = vmul.f32 1.442695, %v2055_v60  ;;  %v2103_v63 = vsel %vm2000_vm2, %v5576_v6, 0.0 }
 0x51b   : > { %v2024_v9 = vpop.xlane.xlu1 %2023  ;;  %2104 = vadd.xlane.f32.xlu0 %v2103_v63 }
 0x51c   : > { %4356 = vpow2.f32 %v2077_v7  ;;  %v2056_v2 = vsub.f32 %v5519_v11, %v2024_v9 }
 0x51d   : > { %v5581_v10 = vpop.eup %4350 }
 0x51e   : > { %v2079_v12 = vmul.f32 1.442695, %v2056_v2  ;;  %v2106_v5 = vsel %vm2000_vm2, %v5581_v10, 0.0 }
 0x51f   : > { %v2027_v13 = vpop.xlane.xlu0 %2026  ;;  %2107 = vadd.xlane.f32.xlu1 %v2106_v5 }
 0x520   : > { %4358 = vpow2.f32 %v2079_v12  ;;  %v2057_v8 = vsub.f32 %v5523_v15, %v2027_v13 }
 0x521   : > { %v5586_v14 = vpop.eup %4352 }
 0x522   : > { %v2081_v17 = vmul.f32 1.442695, %v2057_v8  ;;  %v2109_v18 = vsel %vm2000_vm2, %v5586_v14, 0.0 }
 0x523   : > { %v2030_v19 = vpop.xlane.xlu1 %2029  ;;  %2110 = vadd.xlane.f32.xlu0 %v2109_v18 }
 0x524   : > { %4360 = vpow2.f32 %v2081_v17  ;;  %v2058_v11 = vsub.f32 %v5527_v21, %v2030_v19 }
 0x525   : > { %v5591_v20 = vpop.eup %4354 }
 0x526   : > { %v2083_v22 = vmul.f32 1.442695, %v2058_v11  ;;  %v2112_v23 = vsel %vm2000_vm2, %v5591_v20, 0.0 }
 0x527   : > { %v2033_v25 = vpop.xlane.xlu0 %2032  ;;  %2113 = vadd.xlane.f32.xlu1 %v2112_v23 }
 0x528   : > { %4362 = vpow2.f32 %v2083_v22  ;;  %v2059_v15 = vsub.f32 %v5531_v28, %v2033_v25 }
 0x529   : > { %v5596_v27 = vpop.eup %4356 }
 0x52a   : > { %v2085_v29 = vmul.f32 1.442695, %v2059_v15  ;;  %v2115_v30 = vsel %vm2000_vm2, %v5596_v27, 0.0 }
 0x52b   : > { %v2036_v33 = vpop.xlane.xlu1 %2035  ;;  %2116 = vadd.xlane.f32.xlu0 %v2115_v30 }
 0x52c   : > { %4364 = vpow2.f32 %v2085_v29  ;;  %v2060_v21 = vsub.f32 %v5535_v32, %v2036_v33 }
 0x52d   : > { %v5601_v34 = vpop.eup %4358 }
 0x52e   : > { %v2087_v35 = vmul.f32 1.442695, %v2060_v21  ;;  %v2118_v37 = vsel %vm2000_vm2, %v5601_v34, 0.0 }
 0x52f   : > { %v2039_v38 = vpop.xlane.xlu0 %2038  ;;  %2119 = vadd.xlane.f32.xlu1 %v2118_v37 }
 0x530   : > { %4366 = vpow2.f32 %v2087_v35  ;;  %v2061_v28 = vsub.f32 %v5539_v36, %v2039_v38 }
 0x531   : > { %v5606_v40 = vpop.eup %4360 }
 0x532   : > { %v2089_v24 = vmul.f32 1.442695, %v2061_v28  ;;  %v2121_v31 = vsel %vm2000_vm2, %v5606_v40, 0.0 }
 0x533   : > { %v2042_v42 = vpop.xlane.xlu1 %2041  ;;  %2122 = vadd.xlane.f32.xlu0 %v2121_v31 }
 0x534   : > { %4368 = vpow2.f32 %v2089_v24  ;;  %v2062_v32 = vsub.f32 %v5543_v39, %v2042_v42 }
 0x535   : > { %v5611_v44 = vpop.eup %4362 }
 0x536   : > { %v2091_v47 = vmul.f32 1.442695, %v2062_v32  ;;  %v2124_v48 = vsel %vm2000_vm2, %v5611_v44, 0.0 }
 0x537   : > { %v2045_v50 = vpop.xlane.xlu0 %2044  ;;  %2125 = vadd.xlane.f32.xlu1 %v2124_v48  ;;  %v2102_v36 = vpop.xlane.xlu1 %2101 }
 0x538   : > { %4370 = vpow2.f32 %v2091_v47  ;;  %v2063_v51 = vsub.f32 %v5549_v26, %v2045_v50 }
 0x539   : > { %v5616_v52 = vpop.eup %4364  ;;  %4372 = vrcp.f32 %v2102_v36 }
 0x53a   : > { %v2093_v55 = vmul.f32 1.442695, %v2063_v51  ;;  %v2127_v57 = vsel %vm2000_vm2, %v5616_v52, 0.0 }
 0x53b   : > { %2128 = vadd.xlane.f32.xlu0 %v2127_v57  ;;  %v2099_v39 = vpop.xlane.xlu0 %2098  ;;  %v4211_v60 = vpop.permute.xlu1 %4210 }
 0x53c   : > { %4374 = vpow2.f32 %v2093_v55  ;;  %v4213_v2 = vunpack.i.h.bf16 %v4211_v60  ;;  %v4212_v12 = vunpack.i.l.bf16 %v4211_v60 }
 0x53d   : > { %v5620_v58 = vpop.eup %4366  ;;  %4376 = vrcp.f32 %v2099_v39 }
 0x53e   : > { %v2130_v59 = vsel %vm2000_vm2, %v5620_v58, 0.0  ;;  %v1617_v18 = vpack.c.bf16 %v4213_v2, %v4212_v12 }
 0x53f   : > { %v4206_v61 = vpop.permute.xlu0 %4205  ;;  %2131 = vadd.xlane.f32.xlu1 %v2130_v59 }
 0x540   : > { %v4208_v62 = vunpack.i.h.bf16 %v4206_v61  ;;  %v4207_v26 = vunpack.i.l.bf16 %v4206_v61 }
 0x541   : > { %v5624_v0 = vpop.eup %4368 }
 0x542   : > { %v1616_v1 = vpack.c.bf16 %v4208_v62, %v4207_v26  ;;  %v2133_v56 = vsel %vm2000_vm2, %v5624_v0, 0.0 }
 0x543   : > { %2134 = vadd.xlane.f32.xlu0 %v2133_v56 }
 0x544   : > { %3979 = vmatpush3.bf16.msra.mxu1 %v1616_v1 }
 0x545   : > { %v5628_v3 = vpop.eup %4370  ;;  %3990 = vmatprep.subr.bf16.mxu1 %v4795_v16 }
 0x546   : > { %v2136_v4 = vsel %vm2000_vm2, %v5628_v3, 0.0  ;;  %v4373_v7 = vpop.eup %4372 }
 0x547   : > { %2137 = vadd.xlane.f32.xlu1 %v2136_v4  ;;  %v2162_v8 = vmul.f32 %v4373_v7, %v5547_v41 }
 0x549   : > { %v5633_v63 = vpop.eup %4374 }
 0x54a   : > { %v4377_v9 = vpop.eup %4376  ;;  %v2139_v5 = vsel %vm2000_vm2, %v5633_v63, 0.0 }
 0x54b   : > { %2140 = vadd.xlane.f32.xlu0 %v2139_v5  ;;  %v2161_v13 = vmul.f32 %v4377_v9, %v5555_v43 }
 0x54d   : > { %v2177_v17 = vpack.c.bf16 %v2162_v8, %v2161_v13 }
 0x54f   : > { %3975 = vmatmul.mubr.msk.bf16.vlgmr.msra.gmra.mxu0 %vm2000_vm2, %v2177_v17 }
 0x550   : > { %3985 = vmatpush3.bf16.msra.mxu0 %v1617_v18  ;;  %3986 = vmatprep.mubr.msk.bf16.mxu0 %vm4796_vm0, %v4795_v16 }
 0x551   : > { %3996 = vmatprep.subr.bf16.mxu0 %v4795_v16 }
 0x561   : > { %4225 = vrot.lane.b32.xlu0 %v5449_v53, %s4799_s7 }
 0x56c   : > { %v2048_v19 = vpop.xlane.xlu1 %2047 }
 0x56d   : > { %v2064_v11 = vsub.f32 %v5557_v45, %v2048_v19 }
 0x56f   : > { %v2095_v22 = vmul.f32 1.442695, %v2064_v11 }
 0x570   : > { %v4216_v23 = vpop.permute.xlu1 %4215 }
 0x571   : > { %4378 = vpow2.f32 %v2095_v22  ;;  %v4218_v37 = vunpack.i.h.bf16 %v4216_v23  ;;  %v4217_v38 = vunpack.i.l.bf16 %v4216_v23 }
 0x573   : > { %v1618_v42 = vpack.c.bf16 %v4218_v37, %v4217_v38 }
 0x574   : > { %v4221_v25 = vpop.permute.xlu1 %4220 }
 0x575   : > { %v4222_v39 = vunpack.i.l.bf16 %v4221_v25 }
 0x57e   : > { %v5646_v43 = vpop.eup %4378 }
 0x57f   : > { %v2142_v41 = vsel %vm2000_vm2, %v5646_v43, 0.0 }
 0x580   : > { %2143 = vadd.xlane.f32.xlu1 %v2142_v41 }
 0x591   : > { %4230 = vrot.lane.b32.xlu1 %v5449_v53, %s4798_s24 }
 0x5a4   : > { %v2105_v15 = vpop.xlane.xlu0 %2104 }
 0x5a5   : > { %4380 = vrcp.f32 %v2105_v15 }
 0x5a8   : > { %v2108_v29 = vpop.xlane.xlu1 %2107 }
 0x5a9   : > { %4382 = vrcp.f32 %v2108_v29 }
 0x5ac   : > { %v2111_v30 = vpop.xlane.xlu0 %2110 }
 0x5ad   : > { %4384 = vrcp.f32 %v2111_v30 }
 0x5b0   : > { %v2114_v45 = vpop.xlane.xlu1 %2113 }
 0x5b1   : > { %4386 = vrcp.f32 %v2114_v45 }
 0x5b2   : > { %v4381_v33 = vpop.eup %4380 }
 0x5b3   : > { %v2163_v28 = vmul.f32 %v4381_v33, %v5576_v6 }
 0x5b4   : > { %v2117_v21 = vpop.xlane.xlu0 %2116 }
 0x5b5   : > { %4388 = vrcp.f32 %v2117_v21 }
 0x5b6   : > { %v4383_v35 = vpop.eup %4382 }
 0x5b7   : > { %v2164_v53 = vmul.f32 %v4383_v35, %v5581_v10 }
 0x5b8   : > { %v2120_v24 = vpop.xlane.xlu1 %2119 }
 0x5b9   : > { %4390 = vrcp.f32 %v2120_v24  ;;  %v2178_v31 = vpack.c.bf16 %v2164_v53, %v2163_v28 }
 0x5ba   : > { %v4385_v32 = vpop.eup %4384 }
 0x5bb   : > { %3981 = vmatmul.mubr.msk.bf16.vlgmr.msra.gmra.mxu1 %vm2000_vm2, %v2178_v31  ;;  %v2165_v6 = vmul.f32 %v4385_v32, %v5586_v14  ;;  %v4223_v14 = vunpack.i.h.bf16 %v4221_v25 }
 0x5bc   : > { %3991 = vmatpush3.bf16.msra.mxu1 %v1618_v42  ;;  %v2123_v47 = vpop.xlane.xlu0 %2122  ;;  %3992 = vmatprep.mubr.msk.bf16.mxu1 %vm4796_vm0, %v4795_v16 }
 0x5bd   : > { %4002 = vmatprep.subr.bf16.mxu1 %v4795_v16  ;;  %4392 = vrcp.f32 %v2123_v47  ;;  %v1620_v26 = vpack.c.bf16 %v4223_v14, %v4222_v39  ;;  %v4288_v39 = vld [vmem:[%s5291_s28 + $0x38] sm:$0xff]  }
 0x5be   : > { %v4387_v48 = vpop.eup %4386 }
 0x5bf   : > { %v2166_v10 = vmul.f32 %v4387_v48, %v5591_v20 }
 0x5c0   : > { %v2126_v50 = vpop.xlane.xlu1 %2125 }
 0x5c1   : > { %4394 = vrcp.f32 %v2126_v50  ;;  %v2179_v36 = vpack.c.bf16 %v2166_v10, %v2165_v6 }
 0x5c2   : > { %v4389_v51 = vpop.eup %4388 }
 0x5c3   : > { %3987 = vmatmul.mubr.msk.bf16.vlgmr.msra.gmra.mxu0 %vm2000_vm2, %v2179_v36  ;;  %v2167_v20 = vmul.f32 %v4389_v51, %v5596_v27 }
 0x5c4   : > { %3997 = vmatpush3.bf16.msra.mxu0 %v1619_v54  ;;  %v2129_v55 = vpop.xlane.xlu0 %2128  ;;  %3998 = vmatprep.mubr.msk.bf16.mxu0 %vm4796_vm0, %v4795_v16 }
 0x5c5   : > { %4008 = vmatprep.subr.bf16.mxu0 %v4795_v16  ;;  %4396 = vrcp.f32 %v2129_v55 }
 0x5c6   : > { %v4391_v57 = vpop.eup %4390 }
 0x5c7   : > { %v2168_v59 = vmul.f32 %v4391_v57, %v5601_v34 }
 0x5c8   : > { %v2132_v61 = vpop.xlane.xlu1 %2131 }
 0x5c9   : > { %4398 = vrcp.f32 %v2132_v61  ;;  %v2180_v62 = vpack.c.bf16 %v2168_v59, %v2167_v20  ;;  %v4289_v20 = vld [vmem:[%s5291_s28 + $0x30] sm:$0xff]  }
 0x5ca   : > { %v4393_v46 = vpop.eup %4392 }
 0x5cb   : > { %3993 = vmatmul.mubr.msk.bf16.vlgmr.msra.gmra.mxu1 %vm2000_vm2, %v2180_v62  ;;  %v2169_v27 = vmul.f32 %v4393_v46, %v5606_v40 }
 0x5cc   : > { %4003 = vmatpush3.bf16.msra.mxu1 %v1620_v26  ;;  %v2135_v49 = vpop.xlane.xlu0 %2134  ;;  %4004 = vmatprep.mubr.msk.bf16.mxu1 %vm4796_vm0, %v4795_v16  ;;  %v4290_v26 = vld [vmem:[%s5291_s28 + $0x28] sm:$0xff]  }
 0x5cd   : > { %4014 = vmatprep.subr.bf16.mxu1 %v4795_v16  ;;  %4400 = vrcp.f32 %v2135_v49 }
 0x5ce   : > { %v4395_v54 = vpop.eup %4394 }
 0x5cf   : > { %v2170_v34 = vmul.f32 %v4395_v54, %v5611_v44  ;;  %v4291_v54 = vld [vmem:[%s5291_s28 + $0x20] sm:$0xff]  }
 0x5d0   : > { %v2138_v1 = vpop.xlane.xlu1 %2137 }
 0x5d1   : > { %4402 = vrcp.f32 %v2138_v1  ;;  %v2181_v56 = vpack.c.bf16 %v2170_v34, %v2169_v27  ;;  %v4292_v1 = vld [vmem:[%s5291_s28 + $0x18] sm:$0xff]  }
 0x5d2   : > { %v4397_v4 = vpop.eup %4396 }
 0x5d3   : > { %3999 = vmatmul.mubr.msk.bf16.vlgmr.msra.gmra.mxu0 %vm2000_vm2, %v2181_v56  ;;  %v2171_v9 = vmul.f32 %v4397_v4, %v5616_v52  ;;  %v4293_v56 = vld [vmem:[%s5291_s28 + $0x10] sm:$0xff]   ;;  %v4294_v4 = vld [vmem:[%s5291_s28 + $0x8] sm:$0xff]  }
 0x5d4   : > { %v2141_v60 = vpop.xlane.xlu0 %2140  ;;  %4010 = vmatprep.mubr.msk.bf16.mxu0 %vm4796_vm0, %v4795_v16 }
 0x5d5   : > { %4404 = vrcp.f32 %v2141_v60  ;;  %v4295_v60 = vld [vmem:[%s5291_s28] sm:$0xff]  }
 0x5d6   : > { %v4399_v7 = vpop.eup %4398 }
 0x5d7   : > { %v2172_v2 = vmul.f32 %v4399_v7, %v5620_v58  ;;  %v5711_v7 = vld [vmem:[%s5293_s11 + $0x70] ss:$8 sps:$4 sm:$0xff]  }
 0x5d8   : > { %v4226_v12 = vpop.permute.xlu0 %4225 }
 0x5d9   : > { %v4228_v5 = vunpack.i.h.bf16 %v4226_v12  ;;  %v4227_v40 = vunpack.i.l.bf16 %v4226_v12  ;;  %v2182_v13 = vpack.c.bf16 %v2172_v2, %v2171_v9  ;;  %v5714_v9 = vld [vmem:[%s5293_s11 + $0x74] ss:$8 sps:$4 sm:$0xff]   ;;  %v5717_v12 = vld [vmem:[%s5293_s11 + $0x64] ss:$8 sps:$4 sm:$0xff]  }
 0x5da   : > { %v4401_v8 = vpop.eup %4400 }
 0x5db   : > { %v1621_v44 = vpack.c.bf16 %v4228_v5, %v4227_v40  ;;  %4005 = vmatmul.mubr.msk.bf16.vlgmr.msra.gmra.mxu1 %vm2000_vm2, %v2182_v13  ;;  %v2173_v18 = vmul.f32 %v4401_v8, %v5624_v0  ;;  %v5722_v40 = vld [vmem:[%s5293_s11 + $0x60] ss:$8 sps:$4 sm:$0xff]   ;;  %v5726_v13 = vld [vmem:[%s5293_s11 + $0x54] ss:$8 sps:$4 sm:$0xff]  }
 0x5dc   : > { %4016 = vmatprep.mubr.msk.bf16.mxu1 %vm4796_vm0, %v4795_v16 }
 0x5dd   : > { %4009 = vmatpush3.bf16.msra.mxu0 %v1621_v44 }
 0x5de   : > { %v4403_v17 = vpop.eup %4402  ;;  %4020 = vmatprep.subr.bf16.mxu0 %v4288_v39 }
 0x5df   : > { %v2174_v19 = vmul.f32 %v4403_v17, %v5628_v3 }
 0x5e1   : > { %v2183_v52 = vpack.c.bf16 %v2174_v19, %v2173_v18  ;;  %v5730_v18 = vld [vmem:[%s5293_s11 + $0x50] ss:$8 sps:$4 sm:$0xff]   ;;  %v5735_v19 = vld [vmem:[%s5293_s11 + $0x44] ss:$8 sps:$4 sm:$0xff]  }
 0x5e2   : > { %v4405_v29 = vpop.eup %4404 }
 0x5e3   : > { %4011 = vmatmul.mubr.msk.bf16.vlgmr.msra.gmra.mxu0 %vm2000_vm2, %v2183_v52  ;;  %v2175_v3 = vmul.f32 %v4405_v29, %v5633_v63  ;;  %v5739_v52 = vld [vmem:[%s5293_s11 + $0x40] ss:$8 sps:$4 sm:$0xff]  }
 0x5e4   : > { %4021 = vmatpush3.bf16.msra.mxu0 %v4288_v39  ;;  %v4313_v39 = vld [vmem:[%s5293_s11 + $0x24] ss:$8 sps:$4 sm:$0xff]  }
 0x5e5   : > { %4022 = vmatprep.subr.bf16.mxu0 %v4289_v20 }
 0x5e8   : > { %4023 = vmatpush3.bf16.msra.mxu0 %v4289_v20  ;;  %v4311_v20 = vld [vmem:[%s5293_s11 + $0x20] ss:$8 sps:$4 sm:$0xff]  }
 0x5e9   : > { %4024 = vmatprep.subr.bf16.mxu0 %v4290_v26 }
 0x5ec   : > { %4025 = vmatpush3.bf16.msra.mxu0 %v4290_v26 }
 0x5ed   : > { %4026 = vmatprep.subr.bf16.mxu0 %v4291_v54 }
 0x5f0   : > { %4027 = vmatpush3.bf16.msra.mxu0 %v4291_v54 }
 0x5f1   : > { %4028 = vmatprep.subr.bf16.mxu0 %v4292_v1 }
 0x5f4   : > { %4029 = vmatpush3.bf16.msra.mxu0 %v4292_v1 }
 0x5f5   : > { %4030 = vmatprep.subr.bf16.mxu0 %v4293_v56 }
 0x5f8   : > { %4031 = vmatpush3.bf16.msra.mxu0 %v4293_v56  ;;  %v4448_v56 = vld [vmem:[#allocation2 + $0x10] sm:$0xff] }
 0x5f9   : > { %4032 = vmatprep.subr.bf16.mxu0 %v4294_v4 }
 0x5fc   : > { %4033 = vmatpush3.bf16.msra.mxu0 %v4294_v4 }
 0x5fd   : > { %4034 = vmatprep.subr.bf16.mxu0 %v4295_v60 }
 0x600   : > { %4035 = vmatpush3.bf16.msra.mxu0 %v4295_v60  ;;  %v4449_v60 = vld [vmem:[#allocation2] sm:$0xff] }
 0x609   : > { %v2144_v58 = vpop.xlane.xlu1 %2143 }
 0x60a   : > { %4406 = vrcp.f32 %v2144_v58  ;;  %v5743_v58 = vld [vmem:[%s5293_s11 + $0x34] ss:$8 sps:$4 sm:$0xff]  }
 0x60d   : > { %v4231_v11 = vpop.permute.xlu1 %4230 }
 0x60e   : > { %v4233_v22 = vunpack.i.h.bf16 %v4231_v11  ;;  %v4232_v41 = vunpack.i.l.bf16 %v4231_v11  ;;  %v5747_v11 = vld [vmem:[%s5293_s11 + $0x30] ss:$8 sps:$4 sm:$0xff]  }
 0x60f   : > { %v5686_v23 = vpop.f32.mrf.mxu0 }
 0x610   : > { %v1622_v25 = vpack.c.bf16 %v4233_v22, %v4232_v41 }
 0x611   : > { %v3976_v15 = vpop.f32.mrf.mxu0 }
 0x612   : > { %4015 = vmatpush3.bf16.msra.mxu1 %v1622_v25 }
 0x613   : > { %v5688_v16 = vpop.f32.mrf.mxu0  ;;  %2784 = vmatprep.subr.bf16.mxu1 %v5714_v9 }
 0x615   : > { %v3977_v0 = vpop.f32.mrf.mxu0 }
 0x617   : > { %v4407_v30 = vpop.eup %4406 }
 0x618   : > { %v2176_v45 = vmul.f32 %v4407_v30, %v5646_v43 }
 0x61a   : > { %v2184_v33 = vpack.c.bf16 %v2176_v45, %v2175_v3 }
 0x61c   : > { %4017 = vmatmul.mubr.msk.bf16.vlgmr.msra.gmra.mxu1 %vm2000_vm2, %v2184_v33 }
 0x61d   : > { %2785 = vmatpush1.bf16.msra.mxu1 %v5711_v7 }
 0x61e   : > { %2786 = vmatprep.subr.bf16.mxu1 %v5717_v12 }
 0x621   : > { %2787 = vmatpush1.bf16.msra.mxu1 %v5722_v40 }
 0x622   : > { %2788 = vmatprep.subr.bf16.mxu1 %v5726_v13 }
 0x625   : > { %2789 = vmatpush1.bf16.msra.mxu1 %v5730_v18 }
 0x626   : > { %2790 = vmatprep.subr.bf16.mxu1 %v5735_v19 }
 0x629   : > { %2791 = vmatpush1.bf16.msra.mxu1 %v5739_v52 }
 0x62a   : > { %2792 = vmatprep.subr.bf16.mxu1 %v5743_v58 }
 0x62d   : > { %2793 = vmatpush1.bf16.msra.mxu1 %v5747_v11 }
 0x62e   : > { %2794 = vmatprep.subr.bf16.mxu1 %v4313_v39 }
 0x631   : > { %2795 = vmatpush1.bf16.msra.mxu1 %v4311_v20 }
 0x67b   : > { %v2266_v21 = vpop.f32.mrf.mxu1 }
 0x67d   : > { %v3982_v35 = vpop.f32.mrf.mxu1 }
 0x67f   : > { %v2269_v37 = vpop.f32.mrf.mxu1 }
 0x680   : > { %v4234_v38 = vpack.i.bf16 %v2269_v37, %v2266_v21 }
 0x681   : > { %v3983_v28 = vpop.f32.mrf.mxu1 }
 0x682   : > { %4235 = vrot.lane.b32.xlu0 %v4234_v38, %s4798_s24 }
 0x683   : > { %v2310_v53 = vpop.f32.mrf.mxu0 }
 0x685   : > { %v3988_v24 = vpop.f32.mrf.mxu0 }
 0x687   : > { %v2313_v31 = vpop.f32.mrf.mxu0 }
 0x688   : > { %v4239_v42 = vpack.i.bf16 %v2313_v31, %v2310_v53 }
 0x689   : > { %v3989_v32 = vpop.f32.mrf.mxu0 }
 0x68a   : > { %4240 = vrot.lane.b32.xlu1 %v4239_v42, %s4799_s7 }
 0x68b   : > { %v2354_v63 = vpop.f32.mrf.mxu1 }
 0x68d   : > { %v3994_v43 = vpop.f32.mrf.mxu1 }
 0x68f   : > { %v2357_v47 = vpop.f32.mrf.mxu1 }
 0x690   : > { %v4244_v48 = vpack.i.bf16 %v2357_v47, %v2354_v63 }
 0x691   : > { %v3995_v6 = vpop.f32.mrf.mxu1 }
 0x692   : > { %4245 = vrot.lane.b32.xlu1 %v4244_v48, %s4797_s20 }
 0x693   : > { %v5696_v10 = vpop.f32.mrf.mxu0 }
 0x695   : > { %v4000_v50 = vpop.f32.mrf.mxu0 }
 0x697   : > { %v5698_v36 = vpop.f32.mrf.mxu0 }
 0x699   : > { %v4001_v51 = vpop.f32.mrf.mxu0 }
 0x69b   : > { %v2442_v55 = vpop.f32.mrf.mxu1 }
 0x69d   : > { %v4006_v57 = vpop.f32.mrf.mxu1 }
 0x69f   : > { %v2445_v14 = vpop.f32.mrf.mxu1 }
 0x6a0   : > { %v4249_v59 = vpack.i.bf16 %v2445_v14, %v2442_v55 }
 0x6a1   : > { %v4007_v61 = vpop.f32.mrf.mxu1 }
 0x6a2   : > { %4250 = vrot.lane.b32.xlu0 %v4249_v59, %s4798_s24  ;;  %v4319_v59 = vld [vmem:[%s5293_s11 + $0x4] ss:$8 sps:$4 sm:$0xff]   ;;  %v4317_v61 = vld [vmem:[%s5293_s11] ss:$8 sps:$4 sm:$0xff]  }
 0x6a3   : > { %v2486_v62 = vpop.f32.mrf.mxu0 }
 0x6a5   : > { %v4012_v46 = vpop.f32.mrf.mxu0 }
 0x6a7   : > { %v2489_v49 = vpop.f32.mrf.mxu0 }
 0x6a8   : > { %v4254_v27 = vpack.i.bf16 %v2489_v49, %v2486_v62  ;;  %v4800_v62 = vmov 0   ;;  %v3640_v49 = vld [vmem:[%s927_s27] ss:$0 sm:$0xff] }
 0x6a9   : > { %v4013_v34 = vpop.f32.mrf.mxu0  ;;  %2816 = vmatprep.mubr.bf16.mxu1 %v4800_v62 }
 0x6aa   : > { %4255 = vrot.lane.b32.xlu0 %v4254_v27, %s4799_s7 }
 0x6dc   : > { %v2530_v2 = vpop.f32.mrf.mxu1 }
 0x6de   : > { %v4018_v5 = vpop.f32.mrf.mxu1 }
 0x6e0   : > { %v2533_v44 = vpop.f32.mrf.mxu1 }
 0x6e1   : > { %v4259_v8 = vpack.i.bf16 %v2533_v44, %v2530_v2 }
 0x6e2   : > { %v4019_v17 = vpop.f32.mrf.mxu1 }
 0x6e3   : > { %4260 = vrot.lane.b32.xlu1 %v4259_v8, %s4797_s20  ;;  %v4450_v8 = vld [vmem:[#allocation2 + $0x8] sm:$0xff] }
 0x6f4   : > { %v4236_v22 = vpop.permute.xlu0 %4235 }
 0x6f5   : > { %v4238_v25 = vunpack.i.h.bf16 %v4236_v22  ;;  %v4237_v15 = vunpack.i.l.bf16 %v4236_v22  ;;  %v4451_v22 = vld [vmem:[#allocation2 + $0x18] sm:$0xff] }
 0x6f7   : > { %v2562_v3 = vsel %vm1623_vm1, %v5688_v16, %v4238_v25  ;;  %v2561_v45 = vsel %vm1623_vm1, %v5686_v23, %v4237_v15  ;;  %v5836_v15 = vld [vmem:[%s5337_s23 + $0x18] sm:$0xff]  }
 0x6fc   : > { %v4241_v41 = vpop.permute.xlu1 %4240 }
 0x6fd   : > { %v4243_v29 = vunpack.i.h.bf16 %v4241_v41  ;;  %v4242_v0 = vunpack.i.l.bf16 %v4241_v41 }
 0x6ff   : > { %v2564_v35 = vsel %vm2563_vm3, %v2561_v45, %v4242_v0  ;;  %v2565_v37 = vsel %vm2563_vm3, %v2562_v3, %v4243_v29  ;;  %v5841_v29 = vld [vmem:[%s5337_s23 + $0x50] sm:$0xff]   ;;  %v5852_v3 = vld [vmem:[%s5337_s23 + $0x8] sm:$0xff]   ;;  %v5855_v45 = vld [vmem:[%s5337_s23 + $0x40] sm:$0xff]  }
 0x700   : > { %v5844_v0 = vld [vmem:[%s5337_s23 + $0x10] sm:$0xff]  }
 0x704   : > { %v4246_v30 = vpop.permute.xlu1 %4245 }
 0x705   : > { %v4248_v33 = vunpack.i.h.bf16 %v4246_v30  ;;  %v4247_v21 = vunpack.i.l.bf16 %v4246_v30  ;;  %v5849_v30 = vld [vmem:[%s5337_s23 + $0x48] sm:$0xff]  }
 0x707   : > { %v2567_v38 = vsel %vm2566_vm4, %v2564_v35, %v4247_v21  ;;  %v2568_v28 = vsel %vm2566_vm4, %v2565_v37, %v4248_v33  ;;  %v5860_v33 = vld [vmem:[%s5337_s23] sm:$0xff]   ;;  %v1104_v21 = vlaneseq }
 0x708   : > { %v2599_v53 = vpack.c.bf16 %v2568_v28, %v2567_v38  ;;  %v1102_v38 = vld [vmem:[%s5335_s30] sm:$0x3] }
 0x709   : > { %v1105_v35 = vshrl.u32 %v1104_v21, 7 }
 0x70a   : > { %4036 = vmatprep.mubr.bf16.mxu0 %v2599_v53 }
 0x70b   : > { %v1106_v37 = vsub.s32 0, %v1105_v35  ;;  %v1110_v28 = vsub.s32 1, %v1105_v35 }
 0x70d   : > { %v5865_v53 = vrot.slane %v1102_v38, %v1106_v37 }
 0x714   : > { %v4251_v24 = vpop.permute.xlu0 %4250 }
 0x715   : > { %v4253_v42 = vunpack.i.h.bf16 %v4251_v24  ;;  %v4252_v16 = vunpack.i.l.bf16 %v4251_v24  ;;  %v5867_v24 = vrot.slane %v1102_v38, %v1110_v28 }
 0x717   : > { %v2594_v43 = vsel %vm1623_vm1, %v5698_v36, %v4253_v42  ;;  %v2593_v47 = vsel %vm1623_vm1, %v5696_v10, %v4252_v16  ;;  %v4316_v10 = vld [vmem:[%s5293_s11 + $0x14] ss:$8 sps:$4 sm:$0xff]   ;;  %v4314_v36 = vld [vmem:[%s5293_s11 + $0x10] ss:$8 sps:$4 sm:$0xff]  }
 0x718   : > { %2796 = vmatprep.subr.bf16.mxu1 %v4316_v10 }
 0x719   : > { %2797 = vmatpush1.bf16.msra.mxu1 %v4314_v36 }
 0x71a   : > { %2798 = vmatprep.subr.bf16.mxu1 %v4319_v59 }
 0x71c   : > { %v4256_v31 = vpop.permute.xlu0 %4255 }
 0x71d   : > { %v4258_v32 = vunpack.i.h.bf16 %v4256_v31  ;;  %v4257_v23 = vunpack.i.l.bf16 %v4256_v31  ;;  %2799 = vmatpush1.bf16.msra.mxu1 %v4317_v61 }
 0x71e   : > { %3124 = vmatprep.subr.bf16.mxu1 %v5714_v9 }
 0x71f   : > { %v2595_v50 = vsel %vm2563_vm3, %v2593_v47, %v4257_v23  ;;  %v2596_v51 = vsel %vm2563_vm3, %v2594_v43, %v4258_v32 }
 0x755   : > { %v4261_v63 = vpop.permute.xlu1 %4260 }
 0x756   : > { %v4263_v48 = vunpack.i.h.bf16 %v4261_v63  ;;  %v4262_v6 = vunpack.i.l.bf16 %v4261_v63 }
 0x758   : > { %v2598_v55 = vsel %vm2566_vm4, %v2596_v51, %v4263_v48  ;;  %v2597_v57 = vsel %vm2566_vm4, %v2595_v50, %v4262_v6 }
 0x759   : > { %v2600_v14 = vpack.c.bf16 %v2598_v55, %v2597_v57 }
 0x75b   : > { %4037 = vmatmul.mubr.bf16.vlgmr.msra.gmra.mxu0 %v2600_v14 }
 0x81b   : > { %v4038_v26 = vpop.f32.mrf.mxu0 }
 0x81c   : > { %v2692_v44 = vadd.f32 %v4038_v26, %v3640_v49 }
 0x81d   : > { %v2683_v46 = vpop.f32.mrf.mxu0 }
 0x81e   : > { %v2684_v27 = vadd.f32 %v3640_v49, %v2683_v46  ;;  %v5791_v41 = vadd.f32 %v4451_v22, %v2692_v44 }
 0x81f   : > { %v4039_v54 = vpop.f32.mrf.mxu0 }
 0x820   : > { %v5780_v4 = vadd.f32 %v4448_v56, %v2684_v27  ;;  %v2695_v5 = vadd.f32 %v4039_v54, %v3640_v49 }
 0x821   : > { %v2686_v34 = vpop.f32.mrf.mxu0 }
 0x822   : > { %v2687_v1 = vadd.f32 %v3640_v49, %v2686_v34  ;;  %v5788_v17 = vadd.f32 %v4450_v8, %v2695_v5 }
 0x824   : > { %v5782_v2 = vadd.f32 %v4449_v60, %v2687_v1  ;;  %v2703_v25 = vpack.c.bf16 %v5788_v17, %v5791_v41 }
 0x826   : > { %v2702_v9 = vpack.c.bf16 %v5782_v2, %v5780_v4 }
 0x828   : > { %2817 = vmatmul.mubr.bf16.vlgmr.msra.gmra.mxu1 %v2702_v9 }
 0x829   : > { %2826 = vmatprep.mubr.bf16.mxu1 %v4800_v62  ;;  %3125 = vmatpush1.bf16.msra.mxu1 %v5711_v7  ;;  %v4320_v7 = vld [vmem:[%s5337_s23 + $0x78] sm:$0xff]  }
 0x82a   : > { %3126 = vmatprep.subr.bf16.mxu1 %v5717_v12  ;;  %v5805_v12 = vld [vmem:[%s5337_s23 + $0x38] sm:$0xff]   ;;  %3808 = vmatprep.subr.bf16.mxu0 %v4320_v7 }
 0x82b   : > { %3809 = vmatpush3.bf16.msra.mxu0 %v5805_v12 }
 0x82d   : > { %3127 = vmatpush1.bf16.msra.mxu1 %v5722_v40  ;;  %v5809_v40 = vld [vmem:[%s5337_s23 + $0x70] sm:$0xff]  }
 0x82e   : > { %3128 = vmatprep.subr.bf16.mxu1 %v5726_v13  ;;  %v5812_v13 = vld [vmem:[%s5337_s23 + $0x30] sm:$0xff]   ;;  %3810 = vmatprep.subr.bf16.mxu0 %v5809_v40 }
 0x82f   : > { %3811 = vmatpush3.bf16.msra.mxu0 %v5812_v13 }
 0x830   : > { %2827 = vmatmul.mubr.bf16.gmra.mxu1 %v2703_v25 }
 0x831   : > { %3129 = vmatpush1.bf16.msra.mxu1 %v5730_v18  ;;  %3156 = vmatprep.mubr.bf16.mxu1 %v4800_v62  ;;  %v5817_v18 = vld [vmem:[%s5337_s23 + $0x68] sm:$0xff]  }
 0x832   : > { %3130 = vmatprep.subr.bf16.mxu1 %v5735_v19  ;;  %v5820_v19 = vld [vmem:[%s5337_s23 + $0x28] sm:$0xff]   ;;  %3812 = vmatprep.subr.bf16.mxu0 %v5817_v18 }
 0x833   : > { %3813 = vmatpush3.bf16.msra.mxu0 %v5820_v19 }
 0x835   : > { %3131 = vmatpush1.bf16.msra.mxu1 %v5739_v52  ;;  %v5825_v52 = vld [vmem:[%s5337_s23 + $0x60] sm:$0xff]  }
 0x836   : > { %3132 = vmatprep.subr.bf16.mxu1 %v5743_v58  ;;  %v5828_v58 = vld [vmem:[%s5337_s23 + $0x20] sm:$0xff]   ;;  %3814 = vmatprep.subr.bf16.mxu0 %v5825_v52 }
 0x837   : > { %3815 = vmatpush3.bf16.msra.mxu0 %v5828_v58 }
 0x839   : > { %3133 = vmatpush1.bf16.msra.mxu1 %v5747_v11  ;;  %v5833_v11 = vld [vmem:[%s5337_s23 + $0x58] sm:$0xff]  }
 0x83a   : > { %3134 = vmatprep.subr.bf16.mxu1 %v4313_v39  ;;  %3816 = vmatprep.subr.bf16.mxu0 %v5833_v11 }
 0x83b   : > { %3817 = vmatpush3.bf16.msra.mxu0 %v5836_v15 }
 0x83c   : > { %3818 = vmatprep.subr.bf16.mxu0 %v5841_v29 }
 0x83d   : > { %3135 = vmatpush1.bf16.msra.mxu1 %v4311_v20 }
 0x83e   : > { %3136 = vmatprep.subr.bf16.mxu1 %v4316_v10 }
 0x83f   : > { %3819 = vmatpush3.bf16.msra.mxu0 %v5844_v0 }
 0x840   : > { %3820 = vmatprep.subr.bf16.mxu0 %v5849_v30 }
 0x841   : > { %3137 = vmatpush1.bf16.msra.mxu1 %v4314_v36 }
 0x842   : > { %3138 = vmatprep.subr.bf16.mxu1 %v4319_v59 }
 0x843   : > { %3821 = vmatpush3.bf16.msra.mxu0 %v5852_v3 }
 0x844   : > { %3822 = vmatprep.subr.bf16.mxu0 %v5855_v45 }
 0x845   : > { %3139 = vmatpush1.bf16.msra.mxu1 %v4317_v61 }
 0x847   : > { %3823 = vmatpush3.bf16.msra.mxu0 %v5860_v33 }
 0x848   : > { %3836 = vmatprep.subr.bf16.mxu0 %v4320_v7 }
 0x8e8   : > { %v2818_v31 = vpop.f32.mrf.mxu1 }
 0x8e9   : > { %v5870_v42 = vadd.f32 %v2818_v31, %v5865_v53 }
 0x8ea   : > { %v2820_v16 = vpop.f32.mrf.mxu1 }
 0x8eb   : > { %v2837_v32 = vmul.f32 %v5870_v42, %v5870_v42  ;;  %v5875_v23 = vadd.f32 %v2820_v16, %v5867_v24 }
 0x8ec   : > { %v2822_v63 = vpop.f32.mrf.mxu1 }
 0x8ed   : > { %v2845_v43 = vmul.f32 %v2837_v32, %v5870_v42  ;;  %v2838_v47 = vmul.f32 %v5875_v23, %v5875_v23  ;;  %v5881_v48 = vadd.f32 %v2822_v63, %v5865_v53 }
 0x8ee   : > { %v2824_v6 = vpop.f32.mrf.mxu1 }
 0x8ef   : > { %v2853_v50 = vmul.f32 0.044715, %v2845_v43  ;;  %v2846_v51 = vmul.f32 %v2838_v47, %v5875_v23  ;;  %v2839_v55 = vmul.f32 %v5881_v48, %v5881_v48  ;;  %v5887_v57 = vadd.f32 %v2824_v6, %v5867_v24 }
 0x8f0   : > { %v2828_v14 = vpop.f32.mrf.mxu1 }
 0x8f1   : > { %v2861_v39 = vadd.f32 %v2853_v50, %v5870_v42  ;;  %v2854_v20 = vmul.f32 0.044715, %v2846_v51  ;;  %v2847_v10 = vmul.f32 %v2839_v55, %v5881_v48  ;;  %v2840_v36 = vmul.f32 %v5887_v57, %v5887_v57 }
 0x8f2   : > { %v5894_v59 = vadd.f32 %v2828_v14, %v5865_v53  ;;  %v2830_v61 = vpop.f32.mrf.mxu1 }
 0x8f3   : > { %v2869_v26 = vmul.f32 0.7978846, %v2861_v39  ;;  %v2862_v46 = vadd.f32 %v2854_v20, %v5875_v23  ;;  %v2855_v49 = vmul.f32 0.044715, %v2847_v10  ;;  %v2848_v54 = vmul.f32 %v2840_v36, %v5887_v57 }
 0x8f4   : > { %v2841_v27 = vmul.f32 %v5894_v59, %v5894_v59  ;;  %v5901_v34 = vadd.f32 %v2830_v61, %v5867_v24  ;;  %v2832_v1 = vpop.f32.mrf.mxu1 }
 0x8f5   : > { %v2870_v56 = vmul.f32 0.7978846, %v2862_v46  ;;  %v2863_v60 = vadd.f32 %v2855_v49, %v5881_v48  ;;  %v2856_v5 = vmul.f32 0.044715, %v2848_v54  ;;  %4408 = vtanh.f32 %v2869_v26 }
 0x8f6   : > { %v2849_v9 = vmul.f32 %v2841_v27, %v5894_v59  ;;  %v2842_v44 = vmul.f32 %v5901_v34, %v5901_v34  ;;  %v5908_v8 = vadd.f32 %v2832_v1, %v5865_v53  ;;  %v2834_v22 = vpop.f32.mrf.mxu1 }
 0x8f7   : > { %4410 = vtanh.f32 %v2870_v56  ;;  %v2871_v25 = vmul.f32 0.7978846, %v2863_v60  ;;  %v2864_v7 = vadd.f32 %v2856_v5, %v5887_v57  ;;  %v2835_v21 = vadd.f32 %v2834_v22, %v5867_v24 }
 0x8f8   : > { %v2857_v35 = vmul.f32 0.044715, %v2849_v9  ;;  %v2850_v37 = vmul.f32 %v2842_v44, %v5901_v34  ;;  %v2843_v38 = vmul.f32 %v5908_v8, %v5908_v8 }
 0x8f9   : > { %4412 = vtanh.f32 %v2871_v25  ;;  %v2872_v28 = vmul.f32 0.7978846, %v2864_v7  ;;  %v2844_v31 = vmul.f32 %v2835_v21, %v2835_v21 }
 0x8fa   : > { %v2865_v16 = vadd.f32 %v2857_v35, %v5894_v59  ;;  %v2858_v32 = vmul.f32 0.044715, %v2850_v37  ;;  %v2851_v63 = vmul.f32 %v2843_v38, %v5908_v8 }
 0x8fb   : > { %4414 = vtanh.f32 %v2872_v28  ;;  %v2852_v43 = vmul.f32 %v2844_v31, %v2835_v21 }
 0x8fc   : > { %v2873_v47 = vmul.f32 0.7978846, %v2865_v16  ;;  %v2866_v6 = vadd.f32 %v2858_v32, %v5901_v34  ;;  %v2859_v50 = vmul.f32 0.044715, %v2851_v63 }
 0x8fd   : > { %v2860_v51 = vmul.f32 0.044715, %v2852_v43 }
 0x8fe   : > { %4416 = vtanh.f32 %v2873_v47  ;;  %v2874_v55 = vmul.f32 0.7978846, %v2866_v6  ;;  %v2867_v14 = vadd.f32 %v2859_v50, %v5908_v8 }
 0x8ff   : > { %v2868_v39 = vadd.f32 %v2860_v51, %v2835_v21 }
 0x900   : > { %4418 = vtanh.f32 %v2874_v55  ;;  %v2875_v20 = vmul.f32 0.7978846, %v2867_v14 }
 0x901   : > { %v2876_v10 = vmul.f32 0.7978846, %v2868_v39 }
 0x902   : > { %4420 = vtanh.f32 %v2875_v20  ;;  %v4409_v36 = vpop.eup %4408 }
 0x903   : > { %4422 = vtanh.f32 %v2876_v10  ;;  %v2885_v49 = vadd.f32 1.0, %v4409_v36 }
 0x904   : > { %v4411_v61 = vpop.eup %4410 }
 0x905   : > { %v2886_v26 = vadd.f32 1.0, %v4411_v61  ;;  %v2893_v5 = vmul.f32 0.5, %v2885_v49 }
 0x906   : > { %v4413_v46 = vpop.eup %4412 }
 0x907   : > { %v2887_v54 = vadd.f32 1.0, %v4413_v46  ;;  %v2894_v60 = vmul.f32 0.5, %v2886_v26  ;;  %v2901_v37 = vmul.f32 %v2893_v5, %v5870_v42 }
 0x908   : > { %v4415_v27 = vpop.eup %4414 }
 0x909   : > { %v2895_v1 = vmul.f32 0.5, %v2887_v54  ;;  %v2888_v56 = vadd.f32 1.0, %v4415_v27  ;;  %v2902_v7 = vmul.f32 %v2894_v60, %v5875_v23 }
 0x90b   : > { %v4417_v9 = vpop.eup %4416  ;;  %v2896_v44 = vmul.f32 0.5, %v2888_v56  ;;  %v2903_v22 = vmul.f32 %v2895_v1, %v5881_v48 }
 0x90c   : > { %v2889_v28 = vadd.f32 1.0, %v4417_v9 }
 0x90d   : > { %v4419_v25 = vpop.eup %4418  ;;  %v2904_v35 = vmul.f32 %v2896_v44, %v5887_v57  ;;  %v2909_v63 = vpack.c.bf16 %v2903_v22, %v2901_v37 }
 0x90e   : > { %v2890_v38 = vadd.f32 1.0, %v4419_v25  ;;  %v2897_v50 = vmul.f32 0.5, %v2889_v28 }
 0x90f   : > { %v4421_v31 = vpop.eup %4420  ;;  %v2910_v16 = vpack.c.bf16 %v2904_v35, %v2902_v7 }
 0x910   : > { %v4423_v32 = vpop.eup %4422  ;;  %v2891_v43 = vadd.f32 1.0, %v4421_v31  ;;  %v2898_v6 = vmul.f32 0.5, %v2890_v38  ;;  %v2905_v55 = vmul.f32 %v2897_v50, %v5894_v59 }
 0x911   : > { %3041 = vmatprep.mubr.bf16.mxu0 %v2910_v16  ;;  %v2892_v47 = vadd.f32 1.0, %v4423_v32 }
 0x912   : > { %3042 = vmatmul.mubr.bf16.vlgmr.msra.gmra.mxu0 %v2909_v63  ;;  %v2899_v48 = vmul.f32 0.5, %v2891_v43  ;;  %v2906_v42 = vmul.f32 %v2898_v6, %v5901_v34  ;;  %v3724_v6 = vld [vmem:[%s930_s29] ss:$0 sm:$0xff]  ;;  %s4801_s29 = smov [#allocation18]  }
 0x913   : > { %v2900_v51 = vmul.f32 0.5, %v2892_v47  ;;  %3837 = vmatpush3.bf16.msra.mxu0 %v5805_v12  ;;  %s3320_s16 = sshll.u32 %s4801_s29, 4  ;;  %s3321_s16 = int_to_ptr.vmem [resolvable:$true] %s3320_s16 }
 0x914   : > { %v2907_v23 = vmul.f32 %v2899_v48, %v5908_v8  ;;  %3838 = vmatprep.subr.bf16.mxu0 %v5809_v40  ;;  %p4709_p13 = scmp.lt.s32.totalorder %s3321_s16, %s3321_s16 }
 0x915   : > { %v2908_v57 = vmul.f32 %v2900_v51, %v2835_v21 }
 0x916   : > { %v2911_v39 = vpack.c.bf16 %v2907_v23, %v2905_v55  ;;  %v3725_v23 = vld [vmem:[%s933_s13] ss:$0 sm:$0xff]  ;;  %s4702_s13 = scalar_lea.vmem %s3321_s16, 512 }
 0x917   : > { %v2912_v14 = vpack.c.bf16 %v2908_v57, %v2906_v42  ;;  %3839 = vmatpush3.bf16.msra.mxu0 %v5812_v13  ;;  %v5946_v13 = vld [vmem:[%s940_s14] ss:$0 sm:$0xff]  ;;  %p4703_p4 = scmp.ne.s32.totalorder %s3321_s16, %s4702_s13  ;;  %p4710_p2 = scmp.lt.s32.totalorder %s4702_s13, %s4702_s13 }
 0x918   : > { %3840 = vmatprep.subr.bf16.mxu0 %v5817_v18 }
 0x919   : > { %3049 = vmatprep.mubr.bf16.mxu0 %v2912_v14  ;;  %p4704_p10 = pnand %p4703_p4, %p4096_p3  ;;  %p4711_p6 = por %p4710_p2, %p4709_p13 }
 0x91a   : > { %3050 = vmatmul.mubr.bf16.gmra.mxu0 %v2911_v39 }
 0x91b   : > { %3841 = vmatpush3.bf16.msra.mxu0 %v5820_v19  ;;  %p4705_p12 = pneg %p4704_p10 }
 0x91c   : > { %3842 = vmatprep.subr.bf16.mxu0 %v5825_v52 }
 0x91d   : > { %p4712_p8 = pnand %p4711_p6, %p4705_p12 }
 0x91f   : > { %3843 = vmatpush3.bf16.msra.mxu0 %v5828_v58 }
 0x920   : > { %3844 = vmatprep.subr.bf16.mxu0 %v5833_v11 }
 0x923   : > { %3845 = vmatpush3.bf16.msra.mxu0 %v5836_v15 }
 0x924   : > { %3846 = vmatprep.subr.bf16.mxu0 %v5841_v29 }
 0x927   : > { %3847 = vmatpush3.bf16.msra.mxu0 %v5844_v0 }
 0x928   : > { %3848 = vmatprep.subr.bf16.mxu0 %v5849_v30 }
 0x92b   : > { %3849 = vmatpush3.bf16.msra.mxu0 %v5852_v3 }
 0x92c   : > { %3850 = vmatprep.subr.bf16.mxu0 %v5855_v45 }
 0x92f   : > { %3851 = vmatpush3.bf16.msra.mxu0 %v5860_v33 }
 0x9d2   : > { %v3824_v12 = vpop.f32.mrf.mxu0 }
 0x9d4   : > { %v3825_v40 = vpop.f32.mrf.mxu0 }
 0x9d5   : > { %v3826_v18 = vadd.f32 %v3825_v40, %v3824_v12 }
 0x9d6   : > { %v3827_v19 = vpop.f32.mrf.mxu0 }
 0x9d7   : > { %v3044_v52 = vadd.f32 %v3826_v18, %v5946_v13 }
 0x9d8   : > { %v3828_v58 = vpop.f32.mrf.mxu0 }
 0x9d9   : > { %v3829_v11 = vadd.f32 %v3828_v58, %v3827_v19  ;;  %3058 = vadd.xlane.f32.xlu0 %v3044_v52 }
 0x9da   : > { %v3830_v15 = vpop.f32.mrf.mxu0 }
 0x9db   : > { %v3047_v29 = vadd.f32 %v3829_v11, %v5946_v13 }
 0x9dc   : > { %v3831_v0 = vpop.f32.mrf.mxu0 }
 0x9dd   : > { %v3832_v30 = vadd.f32 %v3831_v0, %v3830_v15  ;;  %3060 = vadd.xlane.f32.xlu1 %v3047_v29 }
 0x9de   : > { %v3833_v3 = vpop.f32.mrf.mxu0 }
 0x9df   : > { %v3052_v45 = vadd.f32 %v3832_v30, %v5946_v13 }
 0x9e0   : > { %v3834_v33 = vpop.f32.mrf.mxu0 }
 0x9e1   : > { %v3835_v59 = vadd.f32 %v3834_v33, %v3833_v3  ;;  %3062 = vadd.xlane.f32.xlu0 %v3052_v45 }
 0x9e3   : > { %v3055_v34 = vadd.f32 %v3835_v59, %v5946_v13 }
 0x9e5   : > { %3064 = vadd.xlane.f32.xlu0 %v3055_v34 }
 0xa62   : > { %v3059_v8 = vpop.xlane.xlu0 %3058 }
 0xa63   : > { %v3066_v21 = vmul.f32 0.0078125, %v3059_v8 }
 0xa65   : > { %v3070_v20 = vsub.f32 %v3044_v52, %v3066_v21 }
 0xa66   : > { %v3061_v10 = vpop.xlane.xlu1 %3060 }
 0xa67   : > { %v3067_v36 = vmul.f32 0.0078125, %v3061_v10  ;;  %v3074_v61 = vmul.f32 %v3070_v20, %v3070_v20 }
 0xa69   : > { %v3071_v26 = vsub.f32 %v3047_v29, %v3067_v36  ;;  %3078 = vadd.xlane.f32.xlu0 %v3074_v61 }
 0xa6a   : > { %v3063_v46 = vpop.xlane.xlu0 %3062 }
 0xa6b   : > { %v3068_v49 = vmul.f32 0.0078125, %v3063_v46  ;;  %v3075_v54 = vmul.f32 %v3071_v26, %v3071_v26 }
 0xa6d   : > { %v3072_v27 = vsub.f32 %v3052_v45, %v3068_v49  ;;  %3080 = vadd.xlane.f32.xlu1 %v3075_v54 }
 0xa6e   : > { %v3065_v1 = vpop.xlane.xlu0 %3064 }
 0xa6f   : > { %v3069_v56 = vmul.f32 0.0078125, %v3065_v1  ;;  %v3076_v60 = vmul.f32 %v3072_v27, %v3072_v27 }
 0xa71   : > { %v3073_v5 = vsub.f32 %v3055_v34, %v3069_v56  ;;  %3082 = vadd.xlane.f32.xlu0 %v3076_v60 }
 0xa73   : > { %v3077_v9 = vmul.f32 %v3073_v5, %v3073_v5 }
 0xa75   : > { %3084 = vadd.xlane.f32.xlu1 %v3077_v9 }
 0xaf2   : > { %v3079_v44 = vpop.xlane.xlu0 %3078 }
 0xaf3   : > { %v3086_v22 = vmul.f32 0.0078125, %v3079_v44 }
 0xaf5   : > { %v3090_v25 = vadd.f32 1e-06, %v3086_v22 }
 0xaf6   : > { %v3081_v7 = vpop.xlane.xlu1 %3080 }
 0xaf7   : > { %4424 = vrsqrt.f32 %v3090_v25  ;;  %v3087_v35 = vmul.f32 0.0078125, %v3081_v7 }
 0xaf9   : > { %v3091_v37 = vadd.f32 1e-06, %v3087_v35 }
 0xafa   : > { %v3083_v38 = vpop.xlane.xlu0 %3082 }
 0xafb   : > { %4426 = vrsqrt.f32 %v3091_v37  ;;  %v3088_v28 = vmul.f32 0.0078125, %v3083_v38 }
 0xafd   : > { %v3092_v31 = vadd.f32 1e-06, %v3088_v28 }
 0xafe   : > { %v3085_v16 = vpop.xlane.xlu1 %3084 }
 0xaff   : > { %4428 = vrsqrt.f32 %v3092_v31  ;;  %v3089_v32 = vmul.f32 0.0078125, %v3085_v16 }
 0xb01   : > { %v3093_v63 = vadd.f32 1e-06, %v3089_v32 }
 0xb03   : > { %4430 = vrsqrt.f32 %v3093_v63 }
 0xb04   : > { %v4425_v43 = vpop.eup %4424 }
 0xb05   : > { %v3098_v47 = vmul.f32 %v4425_v43, %v3070_v20 }
 0xb07   : > { %v3108_v51 = vmul.f32 %v3724_v6, %v3098_v47 }
 0xb08   : > { %v4427_v50 = vpop.eup %4426 }
 0xb09   : > { %v3099_v48 = vmul.f32 %v4427_v50, %v3071_v26  ;;  %v3118_v55 = vadd.f32 %v3725_v23, %v3108_v51 }
 0xb0b   : > { %v3109_v42 = vmul.f32 %v3724_v6, %v3099_v48 }
 0xb0c   : > { %v4429_v57 = vpop.eup %4428 }
 0xb0d   : > { %v3119_v14 = vadd.f32 %v3725_v23, %v3109_v42  ;;  %v3100_v39 = vmul.f32 %v4429_v57, %v3072_v27 }
 0xb0f   : > { %v3122_v12 = vpack.c.bf16 %v3119_v14, %v3118_v55  ;;  %v3110_v19 = vmul.f32 %v3724_v6, %v3100_v39 }
 0xb10   : > { %v4431_v40 = vpop.eup %4430 }
 0xb11   : > { %3157 = vmatmul.mubr.bf16.vlgmr.msra.gmra.mxu1 %v3122_v12  ;;  %v3101_v18 = vmul.f32 %v4431_v40, %v3073_v5  ;;  %v3120_v58 = vadd.f32 %v3725_v23, %v3110_v19 }
 0xb12   : > { %3166 = vmatprep.mubr.bf16.mxu1 %v4800_v62 }
 0xb13   : > { %v3111_v52 = vmul.f32 %v3724_v6, %v3101_v18 }
 0xb15   : > { %v3121_v11 = vadd.f32 %v3725_v23, %v3111_v52 }
 0xb17   : > { %v3123_v15 = vpack.c.bf16 %v3121_v11, %v3120_v58 }
 0xb19   : > { %3167 = vmatmul.mubr.bf16.gmra.mxu1 %v3123_v15 }
 0xbd1   : > { %v3158_v29 = vpop.f32.mrf.mxu1 }
 0xbd2   : > { %v5964_v0 = vadd.f32 %v3158_v29, %v5865_v53 }
 0xbd3   : > { %v3160_v30 = vpop.f32.mrf.mxu1 }
 0xbd4   : > { %v3177_v3 = vmul.f32 %v5964_v0, %v5964_v0  ;;  %v5969_v45 = vadd.f32 %v3160_v30, %v5867_v24 }
 0xbd5   : > { %v3162_v33 = vpop.f32.mrf.mxu1 }
 0xbd6   : > { %v3185_v59 = vmul.f32 %v3177_v3, %v5964_v0  ;;  %v3178_v62 = vmul.f32 %v5969_v45, %v5969_v45  ;;  %v5975_v34 = vadd.f32 %v3162_v33, %v5865_v53 }
 0xbd7   : > { %v3164_v8 = vpop.f32.mrf.mxu1 }
 0xbd8   : > { %v3193_v21 = vmul.f32 0.044715, %v3185_v59  ;;  %v3186_v20 = vmul.f32 %v3178_v62, %v5969_v45  ;;  %v3179_v10 = vmul.f32 %v5975_v34, %v5975_v34  ;;  %v5981_v36 = vadd.f32 %v3164_v8, %v5867_v24 }
 0xbd9   : > { %v3168_v61 = vpop.f32.mrf.mxu1 }
 0xbda   : > { %v3201_v26 = vadd.f32 %v3193_v21, %v5964_v0  ;;  %v3194_v46 = vmul.f32 0.044715, %v3186_v20  ;;  %v3187_v49 = vmul.f32 %v3179_v10, %v5975_v34  ;;  %v3180_v54 = vmul.f32 %v5981_v36, %v5981_v36 }
 0xbdb   : > { %v5988_v27 = vadd.f32 %v3168_v61, %v5865_v53  ;;  %v3170_v1 = vpop.f32.mrf.mxu1 }
 0xbdc   : > { %v3209_v56 = vmul.f32 0.7978846, %v3201_v26  ;;  %v3202_v60 = vadd.f32 %v3194_v46, %v5969_v45  ;;  %v3195_v5 = vmul.f32 0.044715, %v3187_v49  ;;  %v3188_v9 = vmul.f32 %v3180_v54, %v5981_v36 }
 0xbdd   : > { %v3181_v44 = vmul.f32 %v5988_v27, %v5988_v27  ;;  %v5995_v22 = vadd.f32 %v3170_v1, %v5867_v24  ;;  %v3172_v25 = vpop.f32.mrf.mxu1 }
 0xbde   : > { %v3210_v7 = vmul.f32 0.7978846, %v3202_v60  ;;  %v3203_v35 = vadd.f32 %v3195_v5, %v5975_v34  ;;  %v3196_v37 = vmul.f32 0.044715, %v3188_v9  ;;  %4432 = vtanh.f32 %v3209_v56 }
 0xbdf   : > { %v3189_v38 = vmul.f32 %v3181_v44, %v5988_v27  ;;  %v3182_v28 = vmul.f32 %v5995_v22, %v5995_v22  ;;  %v3173_v31 = vadd.f32 %v3172_v25, %v5865_v53  ;;  %v3174_v16 = vpop.f32.mrf.mxu1 }
 0xbe0   : > { %4434 = vtanh.f32 %v3210_v7  ;;  %v3211_v32 = vmul.f32 0.7978846, %v3203_v35  ;;  %v3204_v63 = vadd.f32 %v3196_v37, %v5981_v36  ;;  %v3175_v43 = vadd.f32 %v3174_v16, %v5867_v24 }
 0xbe1   : > { %v3197_v47 = vmul.f32 0.044715, %v3189_v38  ;;  %v3190_v6 = vmul.f32 %v3182_v28, %v5995_v22  ;;  %v3183_v50 = vmul.f32 %v3173_v31, %v3173_v31 }
 0xbe2   : > { %4436 = vtanh.f32 %v3211_v32  ;;  %v3212_v48 = vmul.f32 0.7978846, %v3204_v63  ;;  %v3184_v51 = vmul.f32 %v3175_v43, %v3175_v43 }
 0xbe3   : > { %v3205_v23 = vadd.f32 %v3197_v47, %v5988_v27  ;;  %v3198_v42 = vmul.f32 0.044715, %v3190_v6  ;;  %v3191_v57 = vmul.f32 %v3183_v50, %v3173_v31 }
 0xbe4   : > { %4438 = vtanh.f32 %v3212_v48  ;;  %v3192_v53 = vmul.f32 %v3184_v51, %v3175_v43 }
 0xbe5   : > { %v3213_v55 = vmul.f32 0.7978846, %v3205_v23  ;;  %v3206_v14 = vadd.f32 %v3198_v42, %v5995_v22  ;;  %v3199_v39 = vmul.f32 0.044715, %v3191_v57 }
 0xbe6   : > { %v3200_v12 = vmul.f32 0.044715, %v3192_v53 }
 0xbe7   : > { %4440 = vtanh.f32 %v3213_v55  ;;  %v3214_v24 = vmul.f32 0.7978846, %v3206_v14  ;;  %v3207_v40 = vadd.f32 %v3199_v39, %v3173_v31 }
 0xbe8   : > { %v3208_v18 = vadd.f32 %v3200_v12, %v3175_v43 }
 0xbe9   : > { %4442 = vtanh.f32 %v3214_v24  ;;  %v3215_v19 = vmul.f32 0.7978846, %v3207_v40 }
 0xbea   : > { %v3216_v52 = vmul.f32 0.7978846, %v3208_v18 }
 0xbeb   : > { %4444 = vtanh.f32 %v3215_v19  ;;  %v4433_v58 = vpop.eup %4432 }
 0xbec   : > { %4446 = vtanh.f32 %v3216_v52  ;;  %v3225_v30 = vadd.f32 1.0, %v4433_v58 }
 0xbed   : > { %v4435_v11 = vpop.eup %4434 }
 0xbee   : > { %v3226_v15 = vadd.f32 1.0, %v4435_v11  ;;  %v3233_v21 = vmul.f32 0.5, %v3225_v30 }
 0xbef   : > { %v4437_v29 = vpop.eup %4436 }
 0xbf0   : > { %v3227_v3 = vadd.f32 1.0, %v4437_v29  ;;  %v3234_v8 = vmul.f32 0.5, %v3226_v15  ;;  %v3241_v54 = vmul.f32 %v3233_v21, %v5964_v0 }
 0xbf1   : > { %v4439_v33 = vpop.eup %4438 }
 0xbf2   : > { %v3235_v59 = vmul.f32 0.5, %v3227_v3  ;;  %v3228_v62 = vadd.f32 1.0, %v4439_v33  ;;  %v3242_v46 = vmul.f32 %v3234_v8, %v5969_v45 }
 0xbf4   : > { %v4441_v20 = vpop.eup %4440  ;;  %v3236_v10 = vmul.f32 0.5, %v3228_v62  ;;  %v3243_v61 = vmul.f32 %v3235_v59, %v5975_v34 }
 0xbf5   : > { %v3229_v56 = vadd.f32 1.0, %v4441_v20 }
 0xbf6   : > { %v4443_v26 = vpop.eup %4442  ;;  %v3244_v49 = vmul.f32 %v3236_v10, %v5981_v36  ;;  %v3249_v44 = vpack.c.bf16 %v3243_v61, %v3241_v54 }
 0xbf7   : > { %v3230_v1 = vadd.f32 1.0, %v4443_v26  ;;  %v3237_v37 = vmul.f32 0.5, %v3229_v56 }
 0xbf8   : > { %v4445_v60 = vpop.eup %4444  ;;  %v3250_v5 = vpack.c.bf16 %v3244_v49, %v3242_v46 }
 0xbf9   : > { %v4447_v9 = vpop.eup %4446  ;;  %v3231_v25 = vadd.f32 1.0, %v4445_v60  ;;  %v3238_v35 = vmul.f32 0.5, %v3230_v1  ;;  %v3245_v0 = vmul.f32 %v3237_v37, %v5988_v27 }
 0xbfa   : > { %3285 = vmatprep.mubr.bf16.mxu0 %v3250_v5  ;;  %v3232_v7 = vadd.f32 1.0, %v4447_v9 }
 0xbfb   : > { %3286 = vmatmul.mubr.bf16.vlgmr.msra.gmra.mxu0 %v3249_v44  ;;  %v3239_v34 = vmul.f32 0.5, %v3231_v25  ;;  %v3246_v45 = vmul.f32 %v3238_v35, %v5995_v22 }
 0xbfc   : > { %v3240_v38 = vmul.f32 0.5, %v3232_v7 }
 0xbfd   : > { %v3247_v28 = vmul.f32 %v3239_v34, %v3173_v31 }
 0xbfe   : > { %v3248_v36 = vmul.f32 %v3240_v38, %v3175_v43 }
 0xbff   : > { %v3251_v32 = vpack.c.bf16 %v3247_v28, %v3245_v0 }
 0xc00   : > { %v3252_v16 = vpack.c.bf16 %v3248_v36, %v3246_v45 }
 0xc02   : > { %3293 = vmatprep.mubr.bf16.mxu0 %v3252_v16 }
 0xc03   : > { %3294 = vmatmul.mubr.bf16.gmra.mxu0 %v3251_v32 }
 0xcbb   : > { %v3852_v63 = vpop.f32.mrf.mxu0 }
 0xcbd   : > { %v3853_v47 = vpop.f32.mrf.mxu0 }
 0xcbe   : > { %v3854_v6 = vadd.f32 %v3853_v47, %v3852_v63 }
 0xcbf   : > { %v3855_v50 = vpop.f32.mrf.mxu0 }
 0xcc0   : > { %v3288_v48 = vadd.f32 %v3854_v6, %v5946_v13 }
 0xcc1   : > { %v3856_v51 = vpop.f32.mrf.mxu0 }
 0xcc2   : > { %v3302_v23 = vadd.f32 %v3288_v48, %v5780_v4  ;;  %v3857_v42 = vadd.f32 %v3856_v51, %v3855_v50 }
 0xcc3   : > { %v3858_v31 = vpop.f32.mrf.mxu0 }
 0xcc4   : > { %3306 = vst [vmem:[#allocation2 + $0x10] sm:$0xff] %v3302_v23  ;;  %3310 = vst [vmem:[#allocation18] sm:$0xff] %v3302_v23  ;;  %v3291_v22 = vadd.f32 %v3857_v42, %v5946_v13 }
 0xcc5   : > { %v3859_v27 = vpop.f32.mrf.mxu0 }
 0xcc6   : > { %v3303_v43 = vadd.f32 %v3291_v22, %v5782_v2  ;;  %v3860_v57 = vadd.f32 %v3859_v27, %v3858_v31 }
 0xcc7   : > { %v3861_v53 = vpop.f32.mrf.mxu0 }
 0xcc8   : > { %3307 = vst [vmem:[#allocation2] sm:$0xff] %v3303_v43  ;;  %3311 = vst [vmem:[#allocation18 + $0x8] sm:$0xff] %v3303_v43  ;;  %v3296_v55 = vadd.f32 %v3860_v57, %v5946_v13 }
 0xcc9   : > { %v3862_v14 = vpop.f32.mrf.mxu0 }
 0xcca   : > { %v3304_v4 = vadd.f32 %v3296_v55, %v5791_v41  ;;  %v3863_v39 = vadd.f32 %v3862_v14, %v3861_v53 }
 0xccc   : > { %3308 = vst [vmem:[#allocation2 + $0x18] sm:$0xff] %v3304_v4  ;;  %3312 = vst [vmem:[#allocation18 + $0x10] sm:$0xff] %v3304_v4  ;;  %v3299_v12 = vadd.f32 %v3863_v39, %v5946_v13 }
 0xcce   : > { %v3305_v2 = vadd.f32 %v3299_v12, %v5788_v17 }
 0xcd0   : > { %3309 = vst [vmem:[#allocation2 + $0x8] sm:$0xff] %v3305_v2  ;;  %3313 = vst [vmem:[#allocation18 + $0x18] sm:$0xff] %v3305_v2 }
 0xcd1   : > { %4715 = shalt.err (!%p4712_p8)
}
 0xcd2   : > { %s4802_s9 = smov 128   ;;  %s4803_s15 = smov 8  }
 0xcd3   : > { %s6156_s12 = sld [smem:[#allocation46_spill]] }
 0xcd9   : > { %4061 = dma.vmem_to_hbm [thread:$0]  (%p4096_p3), %s3321_s16, 512, %s6156_s12, [#allocation5], %s4802_s9, %s4802_s9, %s4803_s15  }
 0xcda   : > { %4763 = dma.done.wait (%p4096_p3), [#allocation5], 512  }
 0xcdb   : > { %4765 = vsyncadd (%p4096_p3), [#allocation5], 4294966784 }
 0xcdc PF: > { %s6157_s27 = sld [smem:[#allocation27_spill]] }
 0xcdd   : > { %s6158_s24 = sld [smem:[#allocation25_spill]] }
 0xcde   : > { %s6159_s25 = sld [smem:[#allocation26_spill]] }
 0xcdf   : > { %s6160_s26 = sld [smem:[#allocation28_spill]] }
 0xce2   : > { %p38_p7 = scmp.ge.s32.totalorder %s6157_s27, 4  }
 0xce4   :  { %40 = sbr.rel (!%p38_p7) target bundleno = 30 (0x1e), region = 241 }
 0xce9   :  { %3336 = vsyncpa [#allocation4], 1 }
 0xcea   :  { %3338 = vsyncpa [#allocation4 + $0x1], 1 }
 0xceb   :  { %3339 = vsyncpa [#allocation7], 1 }
 0xcec   :  { %3341 = vsyncpa [#allocation7 + $0x1], 1 }
 0xced   :  { %3342 = vsyncpa [#allocation10], 1 }
 0xcee   :  { %3344 = vsyncpa [#allocation10 + $0x1], 1 }
 0xcef   :  { %3345 = vsyncpa [#allocation13], 1 }
 0xcf0   :  { %3347 = vsyncpa [#allocation13 + $0x1], 1 }
 0xcf1   :  { %3348 = vsyncpa [#allocation16], 1 }
 0xcf2   :  { %3350 = vsyncpa [#allocation16 + $0x1], 1 }
 0xcf3   :  { %3351 = vsyncpa [#allocation5], 1 }
 0xcf4   :  { %3353 = vsyncpa [#allocation5 + $0x1], 1 }

</bundles_post_ra>
